<compile_context>
chip_gen: v6e
topology: v6e:2x2x1
jax: 0.10.0
libtpu: 0.0.40
codegen_flags: <defaults>
</compile_context>

<pallas_src>
import functools
import math

import jax
import jax.numpy as jnp
from jax.experimental import pallas as pl
from jax.experimental.pallas import tpu as pltpu


# ----------------------------- Pallas kernels ------------------------------

def _conv3x3_kernel(x_ref, w_ref, scale_ref, shift_ref, o_ref,
                    *, th, wo, cin, cout, pool):
    """Fused 3x3 conv (9 shifted-slice matmuls) + BN + ReLU (+ optional 2x2 pool).

    x_ref:     (1, H+2, W+2, cin)  bf16 -- full padded image, VMEM resident.
    w_ref:     (9, cin, cout)      bf16 -- per-tap weight slabs, tap = dy*3+dx.
    scale_ref: (1, cout)           f32  -- folded BN scale.
    shift_ref: (1, cout)           f32  -- folded BN shift (incl. conv bias).
    o_ref:     (1, th_o, W_o, cout) bf16 output tile.
    """
    r = pl.program_id(1)
    row0 = pl.multiple_of(r * th, th)

    acc = None
    for t in range(9):
        dy, dx = t // 3, t % 3
        a = x_ref[0, pl.ds(row0 + dy, th), pl.ds(dx, wo), :]      # (th, wo, cin)
        a = a.reshape(th * wo, cin)
        part = jnp.dot(a, w_ref[t], preferred_element_type=jnp.float32)
        acc = part if acc is None else acc + part                 # (th*wo, cout) f32

    y = jnp.maximum(acc * scale_ref[...] + shift_ref[...], 0.0)   # BN + ReLU (f32)

    if pool:
        # fused component-wise 2x2 / stride-2 max pool
        y = y.reshape(th, wo // 2, 2, cout)
        y = jnp.maximum(y[:, :, 0, :], y[:, :, 1, :])             # (th, wo/2, cout)
        y = y.reshape(th // 2, 2, wo // 2, cout)
        y = jnp.maximum(y[:, 0, :, :], y[:, 1, :, :])             # (th/2, wo/2, cout)
    else:
        y = y.reshape(th, wo, cout)

    o_ref[0] = y.astype(o_ref.dtype)


def conv3x3_bn_relu(x, w, scale, shift, *, pool):
    """QConv2d(3x3, pad 1) + QBatchNorm2d(eval) + ReLU (+ fused 2x2 max pool).

    x: (B, H, W, Cin) bf16 NHWC.  Returns (B, H', W', Cout) bf16.
    """
    B, H, W, cin = x.shape
    cout = w.shape[-1]
    xp = jnp.pad(x, ((0, 0), (1, 1), (1, 1), (0, 0)))             # "same" padding

    th = min(H, 8)                      # output-row tile -> th*W rows per matmul
    nrb = H // th
    th_o = th // 2 if pool else th
    W_o = W // 2 if pool else W
    H_o = H // 2 if pool else H

    kernel = functools.partial(_conv3x3_kernel, th=th, wo=W,
                               cin=cin, cout=cout, pool=pool)
    return pl.pallas_call(
        kernel,
        out_shape=jax.ShapeDtypeStruct((B, H_o, W_o, cout), jnp.bfloat16),
        grid_spec=pltpu.PrefetchScalarGridSpec(
            num_scalar_prefetch=0,
            grid=(B, nrb),
            in_specs=[
                pl.BlockSpec((1, H + 2, W + 2, cin), lambda b, r: (b, 0, 0, 0)),
                pl.BlockSpec((9, cin, cout), lambda b, r: (0, 0, 0)),
                pl.BlockSpec((1, cout), lambda b, r: (0, 0)),
                pl.BlockSpec((1, cout), lambda b, r: (0, 0)),
            ],
            out_specs=pl.BlockSpec((1, th_o, W_o, cout), lambda b, r: (b, r, 0, 0)),
        ),
        compiler_params=pltpu.CompilerParams(
            dimension_semantics=("parallel", "parallel")),
    )(xp, w, scale, shift)


def _tail_kernel(x_ref, w11, s11, t11, w12, s12, t12, w13, s13, t13, wl, bl,
                 o_ref, *, batch, classes):
    """Fused tail: 1x1 convs -> pool -> centre-tap 3x3 conv -> QLinear -> |q|.

    x_ref: (B*4, 512) bf16 -- conv10 output at 2x2 spatial, rows (b,h,w)-major.
    """
    h = jnp.dot(x_ref[...], w11[...], preferred_element_type=jnp.float32)
    h = jnp.maximum(h * s11[...] + t11[...], 0.0)                 # (B*4, 2048)

    h = jnp.dot(h.astype(jnp.bfloat16), w12[...],
                preferred_element_type=jnp.float32)
    h = jnp.maximum(h * s12[...] + t12[...], 0.0)                 # (B*4, 256)

    # QMaxPool2d(2x2) over the 2x2 spatial positions -> 1x1 (component-wise).
    h = h.reshape(batch, 4, h.shape[-1])
    h = jnp.maximum(jnp.maximum(h[:, 0, :], h[:, 1, :]),
                    jnp.maximum(h[:, 2, :], h[:, 3, :]))          # (B, 256)

    # Final 3x3 conv applied to a 1x1 (zero-padded) map == its centre tap.
    h = jnp.dot(h.astype(jnp.bfloat16), w13[...],
                preferred_element_type=jnp.float32)
    h = jnp.maximum(h * s13[...] + t13[...], 0.0)                 # (B, 256)

    # Global qmax_pool over 1x1 spatial is identity; QDropout is identity.
    # QLinear (per quaternion component) + QuaternionToReal (norm).
    hb = h.astype(jnp.bfloat16)
    norm = None
    for c in range(4):
        yc = jnp.dot(hb, wl[c], preferred_element_type=jnp.float32) + bl[c]
        norm = yc * yc if norm is None else norm + yc * yc        # (B, classes)
    o_ref[...] = jnp.sqrt(norm).astype(o_ref.dtype)


def qtail(feat, t, *, batch, classes):
    kernel = functools.partial(_tail_kernel, batch=batch, classes=classes)
    return pl.pallas_call(
        kernel,
        out_shape=jax.ShapeDtypeStruct((batch, classes), jnp.float32),
    )(feat, t["w11"], t["s11"], t["t11"], t["w12"], t["s12"], t["t12"],
      t["w13"], t["s13"], t["t13"], t["wl"], t["bl"])


# ------------------------- quaternion weight glue ---------------------------

def _init(key, shape, std):
    return std * jax.random.normal(key, shape, dtype=jnp.float32)


def quaternion_conv_weight(key, cin, cout, k):
    """Real Hamilton-block weight for a QuaternionConv, as (k*k, cin, cout) slabs."""
    kr, ki, kj, kk = jax.random.split(key, 4)
    shp = (cout // 4, cin // 4, k, k)
    std = 1.0 / math.sqrt(cin * k * k)
    r = _init(kr, shp, std)
    i = _init(ki, shp, std)
    j = _init(kj, shp, std)
    q = _init(kk, shp, std)
    row_r = jnp.concatenate([r, -i, -j, -q], axis=1)
    row_i = jnp.concatenate([i, r, -q, j], axis=1)
    row_j = jnp.concatenate([j, q, r, -i], axis=1)
    row_k = jnp.concatenate([q, -j, i, r], axis=1)
    w = jnp.concatenate([row_r, row_i, row_j, row_k], axis=0)     # (cout, cin, k, k)
    # tap-major ((dy,dx)), then (cin, cout)
    return jnp.transpose(w, (2, 3, 1, 0)).reshape(k * k, cin, cout)


def quaternion_linear_weight(key, fin, fout):
    """Real (fin, fout) weight for QuaternionLinear; columns [r | i | j | k]."""
    kr, ki, kj, kk = jax.random.split(key, 4)
    shp = (fin // 4, fout // 4)
    std = 1.0 / math.sqrt(fin)
    r = _init(kr, shp, std)
    i = _init(ki, shp, std)
    j = _init(kj, shp, std)
    q = _init(kk, shp, std)
    col_r = jnp.concatenate([r, -i, -j, -q], axis=0)
    col_i = jnp.concatenate([i, r, -q, j], axis=0)
    col_j = jnp.concatenate([j, q, r, -i], axis=0)
    col_k = jnp.concatenate([q, -j, i, r], axis=0)
    return jnp.concatenate([col_r, col_i, col_j, col_k], axis=1)  # (fin, fout)


def make_qconv_params(key, cin, cout, k):
    """Weight slabs + folded BN scale/shift (conv bias included) for one layer."""
    wk, bk, gk, bek, mk, vk = jax.random.split(key, 6)
    w = quaternion_conv_weight(wk, cin, cout, k)                  # (k*k, cin, cout)
    bias = 0.01 * jax.random.normal(bk, (cout,), jnp.float32)
    gamma = 1.0 + 0.01 * jax.random.normal(gk, (cout,), jnp.float32)
    beta = 0.01 * jax.random.normal(bek, (cout,), jnp.float32)
    mean = 0.01 * jax.random.normal(mk, (cout,), jnp.float32)
    var = 1.0 + 0.01 * jnp.abs(jax.random.normal(vk, (cout,), jnp.float32))
    scale = gamma * jax.lax.rsqrt(var + 1e-5)
    shift = beta + (bias - mean) * scale
    return w, scale, shift


def build_params(key, multiplier=1, classes=10):
    m = multiplier
    # (cin, cout, pool_after) for the ten 3x3 feature convs.
    cfg = [
        (4, 64 * m, False),
        (64 * m, 128 * m, False),
        (128 * m, 128 * m, False),
        (128 * m, 128 * m, True),
        (128 * m, 128 * m, False),
        (128 * m, 128 * m, False),
        (128 * m, 256 * m, True),
        (256 * m, 256 * m, False),
        (256 * m, 256 * m, True),
        (256 * m, 512 * m, True),
    ]
    keys = jax.random.split(key, len(cfg) + 8)

    convs = []
    cin_pad0 = 128                       # network input channels zero-padded 4->128
    cin_prev_padded = cin_pad0
    for idx, (cin, cout, pool) in enumerate(cfg):
        w, scale, shift = make_qconv_params(keys[idx], cin, cout, 3)
        cout_p = max(cout, 128)          # lane-dense output channels
        w = jnp.pad(w, ((0, 0), (0, cin_prev_padded - cin), (0, cout_p - cout)))
        scale = jnp.pad(scale, (0, cout_p - cout), constant_values=1.0)
        shift = jnp.pad(shift, (0, cout_p - cout))
        convs.append(dict(w=w.astype(jnp.bfloat16),
                          scale=scale[None, :],
                          shift=shift[None, :],
                          pool=pool))
        cin_prev_padded = cout_p

    n = len(cfg)
    w11, s11, t11 = make_qconv_params(keys[n + 0], 512 * m, 2048 * m, 1)
    w12, s12, t12 = make_qconv_params(keys[n + 1], 2048 * m, 256 * m, 1)
    w13, s13, t13 = make_qconv_params(keys[n + 2], 256 * m, 256 * m, 3)
    wl = quaternion_linear_weight(keys[n + 3], 256 * m, classes * 4)
    bl = 0.01 * jax.random.normal(keys[n + 4], (classes * 4,), jnp.float32)

    tail = dict(
        w11=w11[0].astype(jnp.bfloat16), s11=s11[None, :], t11=t11[None, :],
        w12=w12[0].astype(jnp.bfloat16), s12=s12[None, :], t12=t12[None, :],
        # 3x3 conv on a 1x1 zero-padded map reduces exactly to its centre tap.
        w13=w13[4].astype(jnp.bfloat16), s13=s13[None, :], t13=t13[None, :],
        wl=wl.reshape(256 * m, 4, classes).transpose(1, 0, 2).astype(jnp.bfloat16),
        bl=bl.reshape(4, 1, classes),
    )
    return dict(convs=convs, tail=tail, classes=classes, cin_pad=cin_pad0)


# ------------------------------- the model ----------------------------------

def qsimplenet_forward(x_nchw, params):
    # layout: accept NCHW (PyTorch), compute in NHWC with bf16 activations.
    x = jnp.transpose(x_nchw, (0, 2, 3, 1)).astype(jnp.bfloat16)
    B, H, W, C = x.shape
    cpad = params["cin_pad"] - C
    if cpad > 0:                          # zero channels * zero weight rows = exact
        x = jnp.pad(x, ((0, 0), (0, 0), (0, 0), (0, cpad)))

    for layer in params["convs"]:         # QDropout2d after pools: identity (eval).
        x = conv3x3_bn_relu(x, layer["w"], layer["scale"], layer["shift"],
                            pool=layer["pool"])

    B, Hc, Wc, Cc = x.shape
    # Fused tail assumes the last pooled feature map is 2x2 (true for 32x32 input).
    assert Hc == 2 and Wc == 2, (Hc, Wc)
    feat = x.reshape(B * Hc * Wc, Cc)     # rows (b, h, w)-major
    return qtail(feat, params["tail"], batch=B, classes=params["classes"])


if __name__ == "__main__":
    key = jax.random.PRNGKey(0)
    pk, xk = jax.random.split(key)
    # multiply_filters=False configuration (multiplier=1) keeps shapes small;
    # 5 stride-2 pools => minimum spatial size is 32.
    params = build_params(pk, multiplier=1, classes=10)
    x = jax.random.normal(xk, (2, 4, 32, 32), dtype=jnp.float32)  # NCHW, 4 = quaternion channels
    out = qsimplenet_forward(x, params)
    out = jax.block_until_ready(out)
    assert out.shape == (2, 10), out.shape
    assert bool(jnp.all(jnp.isfinite(out)))
    print("KERNEL_OK")
</pallas_src>

<mosaic_0001>
module attributes {stable_mosaic.version = 11 : i64} {
  func.func @_conv3x3_kernel(%arg0: i32, %arg1: i32, %arg2: memref<1x34x34x128xbf16, #tpu.memory_space<vmem>>, %arg3: memref<9x128x128xbf16, #tpu.memory_space<vmem>>, %arg4: memref<1x128xf32, #tpu.memory_space<vmem>>, %arg5: memref<1x128xf32, #tpu.memory_space<vmem>>, %arg6: memref<1x8x32x128xbf16, #tpu.memory_space<vmem>>) attributes {dimension_semantics = [#tpu.dimension_semantics<parallel>, #tpu.dimension_semantics<parallel>], iteration_bounds = array<i64: 2, 4>, scalar_prefetch = 0 : i64, scratch_operands = 0 : i64, tpu.core_type = #tpu.core_type<tc>, window_params = [{transform_indices = @transform_0, window_bounds = array<i64: 1, 34, 34, 128>}, {pipeline_mode = #tpu.pipeline_mode<synchronous>, transform_indices = @transform_1, window_bounds = array<i64: 9, 128, 128>}, {pipeline_mode = #tpu.pipeline_mode<synchronous>, transform_indices = @transform_2, window_bounds = array<i64: 1, 128>}, {pipeline_mode = #tpu.pipeline_mode<synchronous>, transform_indices = @transform_3, window_bounds = array<i64: 1, 128>}, {transform_indices = @transform_4, window_bounds = array<i64: 1, 8, 32, 128>}]} {
    %c8_i32 = arith.constant 8 : i32
    %0 = arith.muli %arg1, %c8_i32 : i32
    %1 = tpu.assume_multiple %0, 8 : i32
    %c0_i32 = arith.constant 0 : i32
    %2 = arith.addi %1, %c0_i32 : i32
    %c0 = arith.constant 0 : index
    %3 = arith.index_cast %2 : i32 to index
    %c0_0 = arith.constant 0 : index
    %c0_1 = arith.constant 0 : index
    %4 = vector.load %arg2[%c0, %3, %c0_0, %c0_1] : memref<1x34x34x128xbf16, #tpu.memory_space<vmem>>, vector<1x8x32x128xbf16>
    %5 = vector.shape_cast %4 : vector<1x8x32x128xbf16> to vector<8x32x128xbf16>
    %6 = vector.shape_cast %5 : vector<8x32x128xbf16> to vector<256x128xbf16>
    %c0_2 = arith.constant 0 : index
    %c0_3 = arith.constant 0 : index
    %c0_4 = arith.constant 0 : index
    %7 = vector.load %arg3[%c0_2, %c0_3, %c0_4] : memref<9x128x128xbf16, #tpu.memory_space<vmem>>, vector<1x128x128xbf16>
    %8 = vector.shape_cast %7 : vector<1x128x128xbf16> to vector<128x128xbf16>
    %cst = arith.constant dense<0.000000e+00> : vector<256x128xf32>
    %9 = tpu.matmul %6, %8, %cst {dimension_numbers = #tpu.dot_dimension_numbers<[1], [0], [0], [1], [0, 0, 1, 1], [], []>} : vector<256x128xbf16>, vector<128x128xbf16>, vector<256x128xf32> -> vector<256x128xf32>
    %c0_i32_5 = arith.constant 0 : i32
    %10 = arith.addi %1, %c0_i32_5 : i32
    %c0_6 = arith.constant 0 : index
    %11 = arith.index_cast %10 : i32 to index
    %c1 = arith.constant 1 : index
    %c0_7 = arith.constant 0 : index
    %12 = vector.load %arg2[%c0_6, %11, %c1, %c0_7] : memref<1x34x34x128xbf16, #tpu.memory_space<vmem>>, vector<1x8x32x128xbf16>
    %13 = vector.shape_cast %12 : vector<1x8x32x128xbf16> to vector<8x32x128xbf16>
    %14 = vector.shape_cast %13 : vector<8x32x128xbf16> to vector<256x128xbf16>
    %c1_8 = arith.constant 1 : index
    %c0_9 = arith.constant 0 : index
    %c0_10 = arith.constant 0 : index
    %15 = vector.load %arg3[%c1_8, %c0_9, %c0_10] : memref<9x128x128xbf16, #tpu.memory_space<vmem>>, vector<1x128x128xbf16>
    %16 = vector.shape_cast %15 : vector<1x128x128xbf16> to vector<128x128xbf16>
    %cst_11 = arith.constant dense<0.000000e+00> : vector<256x128xf32>
    %17 = tpu.matmul %14, %16, %cst_11 {dimension_numbers = #tpu.dot_dimension_numbers<[1], [0], [0], [1], [0, 0, 1, 1], [], []>} : vector<256x128xbf16>, vector<128x128xbf16>, vector<256x128xf32> -> vector<256x128xf32>
    %18 = arith.addf %9, %17 : vector<256x128xf32>
    %c0_i32_12 = arith.constant 0 : i32
    %19 = arith.addi %1, %c0_i32_12 : i32
    %c0_13 = arith.constant 0 : index
    %20 = arith.index_cast %19 : i32 to index
    %c2 = arith.constant 2 : index
    %c0_14 = arith.constant 0 : index
    %21 = vector.load %arg2[%c0_13, %20, %c2, %c0_14] : memref<1x34x34x128xbf16, #tpu.memory_space<vmem>>, vector<1x8x32x128xbf16>
    %22 = vector.shape_cast %21 : vector<1x8x32x128xbf16> to vector<8x32x128xbf16>
    %23 = vector.shape_cast %22 : vector<8x32x128xbf16> to vector<256x128xbf16>
    %c2_15 = arith.constant 2 : index
    %c0_16 = arith.constant 0 : index
    %c0_17 = arith.constant 0 : index
    %24 = vector.load %arg3[%c2_15, %c0_16, %c0_17] : memref<9x128x128xbf16, #tpu.memory_space<vmem>>, vector<1x128x128xbf16>
    %25 = vector.shape_cast %24 : vector<1x128x128xbf16> to vector<128x128xbf16>
    %cst_18 = arith.constant dense<0.000000e+00> : vector<256x128xf32>
    %26 = tpu.matmul %23, %25, %cst_18 {dimension_numbers = #tpu.dot_dimension_numbers<[1], [0], [0], [1], [0, 0, 1, 1], [], []>} : vector<256x128xbf16>, vector<128x128xbf16>, vector<256x128xf32> -> vector<256x128xf32>
    %27 = arith.addf %18, %26 : vector<256x128xf32>
    %c1_i32 = arith.constant 1 : i32
    %28 = arith.addi %1, %c1_i32 : i32
    %c0_19 = arith.constant 0 : index
    %29 = arith.index_cast %28 : i32 to index
    %c0_20 = arith.constant 0 : index
    %c0_21 = arith.constant 0 : index
    %30 = vector.load %arg2[%c0_19, %29, %c0_20, %c0_21] : memref<1x34x34x128xbf16, #tpu.memory_space<vmem>>, vector<1x8x32x128xbf16>
    %31 = vector.shape_cast %30 : vector<1x8x32x128xbf16> to vector<8x32x128xbf16>
    %32 = vector.shape_cast %31 : vector<8x32x128xbf16> to vector<256x128xbf16>
    %c3 = arith.constant 3 : index
    %c0_22 = arith.constant 0 : index
    %c0_23 = arith.constant 0 : index
    %33 = vector.load %arg3[%c3, %c0_22, %c0_23] : memref<9x128x128xbf16, #tpu.memory_space<vmem>>, vector<1x128x128xbf16>
    %34 = vector.shape_cast %33 : vector<1x128x128xbf16> to vector<128x128xbf16>
    %cst_24 = arith.constant dense<0.000000e+00> : vector<256x128xf32>
    %35 = tpu.matmul %32, %34, %cst_24 {dimension_numbers = #tpu.dot_dimension_numbers<[1], [0], [0], [1], [0, 0, 1, 1], [], []>} : vector<256x128xbf16>, vector<128x128xbf16>, vector<256x128xf32> -> vector<256x128xf32>
    %36 = arith.addf %27, %35 : vector<256x128xf32>
    %c1_i32_25 = arith.constant 1 : i32
    %37 = arith.addi %1, %c1_i32_25 : i32
    %c0_26 = arith.constant 0 : index
    %38 = arith.index_cast %37 : i32 to index
    %c1_27 = arith.constant 1 : index
    %c0_28 = arith.constant 0 : index
    %39 = vector.load %arg2[%c0_26, %38, %c1_27, %c0_28] : memref<1x34x34x128xbf16, #tpu.memory_space<vmem>>, vector<1x8x32x128xbf16>
    %40 = vector.shape_cast %39 : vector<1x8x32x128xbf16> to vector<8x32x128xbf16>
    %41 = vector.shape_cast %40 : vector<8x32x128xbf16> to vector<256x128xbf16>
    %c4 = arith.constant 4 : index
    %c0_29 = arith.constant 0 : index
    %c0_30 = arith.constant 0 : index
    %42 = vector.load %arg3[%c4, %c0_29, %c0_30] : memref<9x128x128xbf16, #tpu.memory_space<vmem>>, vector<1x128x128xbf16>
    %43 = vector.shape_cast %42 : vector<1x128x128xbf16> to vector<128x128xbf16>
    %cst_31 = arith.constant dense<0.000000e+00> : vector<256x128xf32>
    %44 = tpu.matmul %41, %43, %cst_31 {dimension_numbers = #tpu.dot_dimension_numbers<[1], [0], [0], [1], [0, 0, 1, 1], [], []>} : vector<256x128xbf16>, vector<128x128xbf16>, vector<256x128xf32> -> vector<256x128xf32>
    %45 = arith.addf %36, %44 : vector<256x128xf32>
    %c1_i32_32 = arith.constant 1 : i32
    %46 = arith.addi %1, %c1_i32_32 : i32
    %c0_33 = arith.constant 0 : index
    %47 = arith.index_cast %46 : i32 to index
    %c2_34 = arith.constant 2 : index
    %c0_35 = arith.constant 0 : index
    %48 = vector.load %arg2[%c0_33, %47, %c2_34, %c0_35] : memref<1x34x34x128xbf16, #tpu.memory_space<vmem>>, vector<1x8x32x128xbf16>
    %49 = vector.shape_cast %48 : vector<1x8x32x128xbf16> to vector<8x32x128xbf16>
    %50 = vector.shape_cast %49 : vector<8x32x128xbf16> to vector<256x128xbf16>
    %c5 = arith.constant 5 : index
    %c0_36 = arith.constant 0 : index
    %c0_37 = arith.constant 0 : index
    %51 = vector.load %arg3[%c5, %c0_36, %c0_37] : memref<9x128x128xbf16, #tpu.memory_space<vmem>>, vector<1x128x128xbf16>
    %52 = vector.shape_cast %51 : vector<1x128x128xbf16> to vector<128x128xbf16>
    %cst_38 = arith.constant dense<0.000000e+00> : vector<256x128xf32>
    %53 = tpu.matmul %50, %52, %cst_38 {dimension_numbers = #tpu.dot_dimension_numbers<[1], [0], [0], [1], [0, 0, 1, 1], [], []>} : vector<256x128xbf16>, vector<128x128xbf16>, vector<256x128xf32> -> vector<256x128xf32>
    %54 = arith.addf %45, %53 : vector<256x128xf32>
    %c2_i32 = arith.constant 2 : i32
    %55 = arith.addi %1, %c2_i32 : i32
    %c0_39 = arith.constant 0 : index
    %56 = arith.index_cast %55 : i32 to index
    %c0_40 = arith.constant 0 : index
    %c0_41 = arith.constant 0 : index
    %57 = vector.load %arg2[%c0_39, %56, %c0_40, %c0_41] : memref<1x34x34x128xbf16, #tpu.memory_space<vmem>>, vector<1x8x32x128xbf16>
    %58 = vector.shape_cast %57 : vector<1x8x32x128xbf16> to vector<8x32x128xbf16>
    %59 = vector.shape_cast %58 : vector<8x32x128xbf16> to vector<256x128xbf16>
    %c6 = arith.constant 6 : index
    %c0_42 = arith.constant 0 : index
    %c0_43 = arith.constant 0 : index
    %60 = vector.load %arg3[%c6, %c0_42, %c0_43] : memref<9x128x128xbf16, #tpu.memory_space<vmem>>, vector<1x128x128xbf16>
    %61 = vector.shape_cast %60 : vector<1x128x128xbf16> to vector<128x128xbf16>
    %cst_44 = arith.constant dense<0.000000e+00> : vector<256x128xf32>
    %62 = tpu.matmul %59, %61, %cst_44 {dimension_numbers = #tpu.dot_dimension_numbers<[1], [0], [0], [1], [0, 0, 1, 1], [], []>} : vector<256x128xbf16>, vector<128x128xbf16>, vector<256x128xf32> -> vector<256x128xf32>
    %63 = arith.addf %54, %62 : vector<256x128xf32>
    %c2_i32_45 = arith.constant 2 : i32
    %64 = arith.addi %1, %c2_i32_45 : i32
    %c0_46 = arith.constant 0 : index
    %65 = arith.index_cast %64 : i32 to index
    %c1_47 = arith.constant 1 : index
    %c0_48 = arith.constant 0 : index
    %66 = vector.load %arg2[%c0_46, %65, %c1_47, %c0_48] : memref<1x34x34x128xbf16, #tpu.memory_space<vmem>>, vector<1x8x32x128xbf16>
    %67 = vector.shape_cast %66 : vector<1x8x32x128xbf16> to vector<8x32x128xbf16>
    %68 = vector.shape_cast %67 : vector<8x32x128xbf16> to vector<256x128xbf16>
    %c7 = arith.constant 7 : index
    %c0_49 = arith.constant 0 : index
    %c0_50 = arith.constant 0 : index
    %69 = vector.load %arg3[%c7, %c0_49, %c0_50] : memref<9x128x128xbf16, #tpu.memory_space<vmem>>, vector<1x128x128xbf16>
    %70 = vector.shape_cast %69 : vector<1x128x128xbf16> to vector<128x128xbf16>
    %cst_51 = arith.constant dense<0.000000e+00> : vector<256x128xf32>
    %71 = tpu.matmul %68, %70, %cst_51 {dimension_numbers = #tpu.dot_dimension_numbers<[1], [0], [0], [1], [0, 0, 1, 1], [], []>} : vector<256x128xbf16>, vector<128x128xbf16>, vector<256x128xf32> -> vector<256x128xf32>
    %72 = arith.addf %63, %71 : vector<256x128xf32>
    %c2_i32_52 = arith.constant 2 : i32
    %73 = arith.addi %1, %c2_i32_52 : i32
    %c0_53 = arith.constant 0 : index
    %74 = arith.index_cast %73 : i32 to index
    %c2_54 = arith.constant 2 : index
    %c0_55 = arith.constant 0 : index
    %75 = vector.load %arg2[%c0_53, %74, %c2_54, %c0_55] : memref<1x34x34x128xbf16, #tpu.memory_space<vmem>>, vector<1x8x32x128xbf16>
    %76 = vector.shape_cast %75 : vector<1x8x32x128xbf16> to vector<8x32x128xbf16>
    %77 = vector.shape_cast %76 : vector<8x32x128xbf16> to vector<256x128xbf16>
    %c8 = arith.constant 8 : index
    %c0_56 = arith.constant 0 : index
    %c0_57 = arith.constant 0 : index
    %78 = vector.load %arg3[%c8, %c0_56, %c0_57] : memref<9x128x128xbf16, #tpu.memory_space<vmem>>, vector<1x128x128xbf16>
    %79 = vector.shape_cast %78 : vector<1x128x128xbf16> to vector<128x128xbf16>
    %cst_58 = arith.constant dense<0.000000e+00> : vector<256x128xf32>
    %80 = tpu.matmul %77, %79, %cst_58 {dimension_numbers = #tpu.dot_dimension_numbers<[1], [0], [0], [1], [0, 0, 1, 1], [], []>} : vector<256x128xbf16>, vector<128x128xbf16>, vector<256x128xf32> -> vector<256x128xf32>
    %81 = arith.addf %72, %80 : vector<256x128xf32>
    %c0_59 = arith.constant 0 : index
    %c0_60 = arith.constant 0 : index
    %82 = vector.load %arg4[%c0_59, %c0_60] : memref<1x128xf32, #tpu.memory_space<vmem>>, vector<1x128xf32>
    %83 = vector.broadcast %82 : vector<1x128xf32> to vector<256x128xf32>
    %84 = arith.mulf %81, %83 : vector<256x128xf32>
    %c0_61 = arith.constant 0 : index
    %c0_62 = arith.constant 0 : index
    %85 = vector.load %arg5[%c0_61, %c0_62] : memref<1x128xf32, #tpu.memory_space<vmem>>, vector<1x128xf32>
    %86 = vector.broadcast %85 : vector<1x128xf32> to vector<256x128xf32>
    %87 = arith.addf %84, %86 : vector<256x128xf32>
    %cst_63 = arith.constant 0.000000e+00 : f32
    %88 = vector.broadcast %cst_63 : f32 to vector<256x128xf32>
    %89 = arith.maximumf %87, %88 : vector<256x128xf32>
    %90 = vector.shape_cast %89 : vector<256x128xf32> to vector<8x32x128xf32>
    %91 = arith.truncf %90 : vector<8x32x128xf32> to vector<8x32x128xbf16>
    %c0_64 = arith.constant 0 : index
    %c0_65 = arith.constant 0 : index
    %c0_66 = arith.constant 0 : index
    %c0_67 = arith.constant 0 : index
    %92 = vector.load %arg6[%c0_64, %c0_65, %c0_66, %c0_67] : memref<1x8x32x128xbf16, #tpu.memory_space<vmem>>, vector<1x8x32x128xbf16>
    %93 = vector.shape_cast %92 : vector<1x8x32x128xbf16> to vector<8x32x128xbf16>
    %94 = vector.shape_cast %91 : vector<8x32x128xbf16> to vector<1x8x32x128xbf16>
    tpu.vector_store %arg6[%c0_64, %c0_65, %c0_66, %c0_67], %94 {strides = array<i32>} : memref<1x8x32x128xbf16, #tpu.memory_space<vmem>>, vector<1x8x32x128xbf16>,
    return
  }
  func.func @transform_0(%arg0: i32, %arg1: i32) -> (i32, i32, i32, i32) {
    %c0_i32 = arith.constant 0 : i32
    %c0_i32_0 = arith.constant 0 : i32
    %c0_i32_1 = arith.constant 0 : i32
    %c0_i32_2 = arith.constant 0 : i32
    return %arg0, %c0_i32, %c0_i32_0, %c0_i32_1 : i32, i32, i32, i32
  }
  func.func @transform_1(%arg0: i32, %arg1: i32) -> (i32, i32, i32) {
    %c0_i32 = arith.constant 0 : i32
    %c0_i32_0 = arith.constant 0 : i32
    %c0_i32_1 = arith.constant 0 : i32
    %c0_i32_2 = arith.constant 0 : i32
    return %c0_i32, %c0_i32_0, %c0_i32_1 : i32, i32, i32
  }
  func.func @transform_2(%arg0: i32, %arg1: i32) -> (i32, i32) {
    %c0_i32 = arith.constant 0 : i32
    %c0_i32_0 = arith.constant 0 : i32
    %c0_i32_1 = arith.constant 0 : i32
    return %c0_i32, %c0_i32_0 : i32, i32
  }
  func.func @transform_3(%arg0: i32, %arg1: i32) -> (i32, i32) {
    %c0_i32 = arith.constant 0 : i32
    %c0_i32_0 = arith.constant 0 : i32
    %c0_i32_1 = arith.constant 0 : i32
    return %c0_i32, %c0_i32_0 : i32, i32
  }
  func.func @transform_4(%arg0: i32, %arg1: i32) -> (i32, i32, i32, i32) {
    %c0_i32 = arith.constant 0 : i32
    %c0_i32_0 = arith.constant 0 : i32
    %c0_i32_1 = arith.constant 0 : i32
    return %arg0, %arg1, %c0_i32, %c0_i32_0 : i32, i32, i32, i32
  }
}

</mosaic_0001>

<bundles_post_ra>
// kernel: tpu_custom_call.1
= control target key start
LH: loop header
LB: loop body
LE: loop exit
PB: predicated region body
PF: predicated region fallthrough
CT: control target
= control target key end

     0   :  { %9 = vsyncpa [#allocation3], 0  ;;  %s9669_s0 = inlined_call_operand.vmem [shape: bf16[2,34,34,128], index: 0, kind: input, shape index: {}]   ;;  %s9670_s1 = inlined_call_operand.vmem [shape: bf16[9,128,128], index: 1, kind: input, shape index: {}]   ;;  %s9671_s2 = inlined_call_operand.vmem [shape: f32[1,128], index: 2, kind: input, shape index: {}]   ;;  %s9672_s3 = inlined_call_operand.vmem [shape: f32[1,128], index: 3, kind: input, shape index: {}]   ;;  %s9673_s4 = inlined_call_operand.hbm [shape: bf16[2,32,32,128], index: 4, kind: output, shape index: {}]  }
   0x1   :  { %11 = vsyncpa [#allocation3 + $0x1], 0  ;;  %s6903_s15 = smov 0   ;;  %s6905_s16 = smov 0  }
   0x2   :  { %s6907_s17 = smov 0   ;;  %s6909_s18 = smov 0  }
   0x3   :  { %s6911_s19 = smov 0   ;;  %s6913_s20 = smov 0  }
   0x4   :  { %s6915_s21 = smov 0   ;;  %s6917_s22 = smov 0  }
   0x5 LB: > { %s5204_s23 = sadd.s32 4294967295, %s6873_s22   ;;  %s5205_s24 = sadd.s32 4294967294, %s6873_s22   ;;  %s6873_s22 = sphi %s6917_s22, %s17_s22   ;;  %s6869_s21 = sphi %s6915_s21, %s9839_s21   ;;  %s6865_s20 = sphi %s6913_s20, %s9838_s20   ;;  %s6861_s19 = sphi %s6911_s19, %s9837_s19   ;;  %s6857_s18 = sphi %s6909_s18, %s9836_s18   ;;  %s6853_s17 = sphi %s6907_s17, %s9835_s17   ;;  %s6849_s16 = sphi %s6905_s16, %s9834_s16   ;;  %s6845_s15 = sphi %s6903_s15, %s9833_s15  }
   0x6   : > { %s26_s25 = sadd.s32 1, %s6865_s20  ;;  %s29_s26 = sadd.s32 1, %s6869_s21 }
   0x7   : > { %p27_p0 = scmp.ge.s32.totalorder %s26_s25, 4  ;;  %p137_p1 = scmp.ne.s32.totalorder %s6853_s17, %s6849_s16 }
   0x8   : > { %p138_p2 = scmp.eq.s32.totalorder %s5204_s23, 7  ;;  %p143_p5 = scmp.ne.s32.totalorder %s6849_s16, %s6845_s15 }
   0x9   : > { %s9841_s25 = smov (%p27_p0, %s26_s25), 0  ;;  %s9843_s26 = smov (!%p27_p0, %s29_s26), %s6869_s21 }
   0xa   : > { %s123_s27 = ssub.s32 %s6865_s20, %s9841_s25  ;;  %p6954_p3 = por %p138_p2, %p137_p1 }
   0xb   : > { %p31_p4 = scmp.ge.s32.totalorder %s9843_s26, 2  ;;  %p144_p6 = scmp.eq.s32.totalorder %s5205_s24, 7 }
   0xc   : > { %p5208_p7 = scmp.ge.s32.totalorder %s6873_s22, 1  ;;  %p179_p9 = scmp.lt.s32.totalorder %s6873_s22, 9 }
   0xd   : > { %s9845_s26 = smov (%p31_p4, %s9843_s26), 0  ;;  %p6963_p8 = por %p144_p6, %p143_p5 }
   0xe   : > { %s122_s30 = ssub.s32 %s6869_s21, %s9845_s26  ;;  %s127_s5 = sadd.s32 1, %s6853_s17 }
   0xf   : > { %s124_s6 = sor.u32 %s123_s27, %s122_s30  ;;  %p180_p10 = pnand %p5208_p7, %p179_p9 }
  0x10   : > { %p125_p11 = scmp.eq.s32.totalorder %s124_s6, 0 }
  0x11   : > { %183 = sbr.rel (%p180_p10) target bundleno = 584 (0x248), region = 36 }
  0x12   : > { %s6972_s7 = scalar_select %p125_p11, %s6853_s17, %s127_s5  }
  0x16   : > { %v6654_v0 = vld [vmem:[%s9670_s1 + $0x78] sm:$0xff]   ;;  %p205_p12 = scmp.lt.s32.totalorder %s6861_s19, 1  ;;  %v6655_v1 = vld [vmem:[%s9670_s1 + $0x70] sm:$0xff]   ;;  %s5787_s13 = smul.u32 160, %s6857_s18  ;;  %v6656_v2 = vld [vmem:[%s9670_s1 + $0x68] sm:$0xff]   ;;  %vm1246_vm3 = vcmask 1042432  }
  0x17   : > { %6132 = vmatprep.subr.bf16.mxu0 %v6654_v0  ;;  %6564 = vmatprep.subr.bf16.mxu1 %v6654_v0  ;;  %v6657_v3 = vld [vmem:[%s9670_s1 + $0x60] sm:$0xff]   ;;  %vm272_vm0 = vsmask.f32 3328  ;;  %vm273_vm1 = vsmask.f32 7440  ;;  %v6658_v19 = vld [vmem:[%s9670_s1 + $0x58] sm:$0xff]  }
  0x18   : > { %s206_s12 = scalar_select %p205_p12, %s6861_s19, 1  ;;  %6133 = vmatpush3.bf16.msra.mxu0 %v6654_v0  ;;  %6572 = vmatpush3.bf16.msra.mxu1 %v6654_v0  ;;  %v6659_v28 = vld [vmem:[%s9670_s1 + $0x50] sm:$0xff]   ;;  %vm7022_vm2 = vmor %vm272_vm0, %vm273_vm1  ;;  %v6660_v54 = vld [vmem:[%s9670_s1 + $0x48] sm:$0xff]   ;;  %vm1247_vm4 = vcmask 1046532  }
  0x19   : > { %6134 = vmatprep.subr.bf16.mxu0 %v6655_v1  ;;  %6565 = vmatprep.subr.bf16.mxu1 %v6655_v1  ;;  %vm7314_vm5 = vmor %vm1246_vm3, %vm1247_vm4  ;;  %s202_s27 = sand.u32 1, %s6849_s16   ;;  %s5820_s6 = sshll.u32 %s6857_s18, 5 }
  0x1a   : > { %s6580_s24 = smul.u32 680, %s206_s12  ;;  %s5209_s30 = sshll.u32 %s202_s27, 7 }
  0x1b   : > { %s5783_s8 = sshll.u32 %s6861_s19, 7  ;;  %s6875_s23 = smov [#allocation2]  }
  0x1c   : > { %s209_s5 = scalar_lea.vmem %s9669_s0, %s6580_s24  ;;  %6135 = vmatpush3.bf16.msra.mxu0 %v6655_v1  ;;  %6573 = vmatpush3.bf16.msra.mxu1 %v6655_v1  ;;  %s5115_s10 = sadd.s32 %s5820_s6, %s5783_s8 }
  0x1d   : > { %s6992_s9 = scalar_lea.vmem %s209_s5, %s5787_s13  ;;  %6136 = vmatprep.subr.bf16.mxu0 %v6656_v2  ;;  %6566 = vmatprep.subr.bf16.mxu1 %v6656_v2  ;;  %s9489_s5 = scalar_lea.vmem [#allocation2], %s5209_s30 }
  0x1e   : > { %v6995_v4 = vld [vmem:[%s6992_s9] sm:$0xf]  ;;  %v6998_v5 = vld [vmem:[%s6992_s9 + $0x4] sm:$0xf]  ;;  %v7001_v6 = vld [vmem:[%s6992_s9 + $0x8] sm:$0xf] }
  0x1f   : > { %v276_v7 = vshrl.u32 %v6995_v4, 16  ;;  %v279_v8 = vshll.u32 %v6995_v4, 16  ;;  %v285_v9 = vshll.u32 %v6998_v5, 16  ;;  %v289_v10 = vshrl.u32 %v6998_v5, 16  ;;  %v232_v13 = vld [vmem:[%s6992_s9 + $0x50] sm:$0xf] }
  0x20   : > { %v295_v11 = vshll.u32 %v7001_v6, 16  ;;  %v299_v12 = vshrl.u32 %v7001_v6, 16  ;;  %6137 = vmatpush3.bf16.msra.mxu0 %v6656_v2  ;;  %6574 = vmatpush3.bf16.msra.mxu1 %v6656_v2  ;;  %v233_v16 = vld [vmem:[%s6992_s9 + $0x54] sm:$0xf]  ;;  %v234_v17 = vld [vmem:[%s6992_s9 + $0x58] sm:$0xf]  ;;  %v5254_v18 = vcombine.low %v6995_v4, %v6998_v5 }
  0x21   : > { %v278_v14 = vrot.slane %v276_v7, 4  ;;  %v281_v15 = vrot.slane %v279_v8, 5  ;;  %6138 = vmatprep.subr.bf16.mxu0 %v6657_v3  ;;  %6567 = vmatprep.subr.bf16.mxu1 %v6657_v3  ;;  %v287_v20 = vrot.slane %v285_v9, 5  ;;  %v291_v21 = vrot.slane %v289_v10, 4  ;;  %v7027_v34 = vld [vmem:[%s6992_s9 + $0xc] sm:$0xf] }
  0x22   : > { %v297_v22 = vrot.slane %v295_v11, 5  ;;  %v301_v23 = vrot.slane %v299_v12, 4  ;;  %v452_v25 = vshrl.u32 %v232_v13, 16  ;;  %v455_v26 = vshll.u32 %v232_v13, 16  ;;  %v7030_v35 = vld [vmem:[%s6992_s9 + $0x10] sm:$0x1] }
  0x23   : > { %v282_v24 = vor.u32 %v281_v15, %v278_v14  ;;  %v461_v27 = vshll.u32 %v233_v16, 16  ;;  %v292_v30 = vor.u32 %v291_v21, %v287_v20  ;;  %v465_v32 = vshrl.u32 %v233_v16, 16  ;;  %v7035_v44 = vld [vmem:[%s6992_s9 + $0x5c] sm:$0xf]  ;;  %v268_v53 = vld [vmem:[%s6992_s9 + $0x60] sm:$0x1] }
  0x24   : > { %v302_v31 = vor.u32 %v301_v23, %v297_v22  ;;  %v471_v33 = vshll.u32 %v234_v17, 16  ;;  %6139 = vmatpush3.bf16.msra.mxu0 %v6657_v3  ;;  %6575 = vmatpush3.bf16.msra.mxu1 %v6657_v3  ;;  %v454_v37 = vrot.slane %v452_v25, 4  ;;  %v457_v38 = vrot.slane %v455_v26, 5  ;;  %v7056_v3 = vld [vmem:[%s6992_s9 + $0x14] sm:$0xf]  ;;  %v6661_v12 = vld [vmem:[%s9670_s1 + $0x40] sm:$0xff]  }
  0x25   : > { %v283_v36 = vrot.slane %v282_v24, 4  ;;  %v463_v39 = vrot.slane %v461_v27, 5  ;;  %6140 = vmatprep.subr.bf16.mxu0 %v6658_v19  ;;  %6568 = vmatprep.subr.bf16.mxu1 %v6658_v19  ;;  %v293_v40 = vrot.slane %v292_v30, 4  ;;  %v467_v42 = vrot.slane %v465_v32, 4  ;;  %v7062_v11 = vld [vmem:[%s6992_s9 + $0x18] sm:$0xf] }
  0x26   : > { %v7032_v41 = vrot.slane %v302_v31, 4  ;;  %v473_v43 = vrot.slane %v471_v33, 5  ;;  %v458_v46 = vor.u32 %v457_v38, %v454_v37  ;;  %v475_v47 = vshrl.u32 %v234_v17, 16  ;;  %v7068_v16 = vld [vmem:[%s6992_s9 + $0x1c] sm:$0xf]  ;;  %s5784_s18 = sshll.u32 %s5115_s10, 6 }
  0x27   : > { %v288_v45 = vsel %vm7022_vm2, %v283_v36, %v287_v20  ;;  %v305_v48 = vshll.u32 %v7027_v34, 16  ;;  %v298_v49 = vsel %vm7022_vm2, %v293_v40, %v297_v22  ;;  %v468_v50 = vor.u32 %v467_v42, %v463_v39  ;;  %v236_v23 = vld [vmem:[%s6992_s9 + $0x64] sm:$0xf]  ;;  %v7081_v33 = vld [vmem:[%s6992_s9 + $0x68] sm:$0xf]  ;;  %v6662_v37 = vld [vmem:[%s9670_s1 + $0x38] sm:$0xff]   ;;  %s9611_s13 = scalar_lea.hbm %s9673_s4, %s5784_s18 }
  0x28   : > { %v309_v51 = vshrl.u32 %v7027_v34, 16  ;;  %v315_v52 = vshll.u32 %v7030_v35, 16  ;;  %6141 = vmatpush3.bf16.msra.mxu0 %v6658_v19  ;;  %6576 = vmatpush3.bf16.msra.mxu1 %v6658_v19  ;;  %v5230_v55 = vcombine.low %v288_v45, %v298_v49  ;;  %v459_v56 = vrot.slane %v458_v46, 4  ;;  %v7087_v40 = vld [vmem:[%s6992_s9 + $0x6c] sm:$0xf]  ;;  %s5118_s19 = sshll.u32 %s9489_s5, 4  ;;  %s9613_s19 = int_to_ptr.vmem [resolvable:$true] %s5118_s19 }
  0x29   : > { %v477_v57 = vrot.slane %v475_v47, 4  ;;  %v307_v58 = vrot.slane %v305_v48, 5  ;;  %6142 = vmatprep.subr.bf16.mxu0 %v6659_v28  ;;  %6569 = vmatprep.subr.bf16.mxu1 %v6659_v28  ;;  %v469_v59 = vrot.slane %v468_v50, 4  ;;  %v1260_v62 = vrot.slane %v7030_v35, 5  ;;  %v7093_v48 = vld [vmem:[%s6992_s9 + $0x20] sm:$0xf] }
  0x2a   : > { %v311_v60 = vrot.slane %v309_v51, 4  ;;  %v317_v61 = vrot.slane %v315_v52, 5  ;;  %6148 = vmatprep.mubr.bf16.mxu0 %v5230_v55  ;;  %v464_v63 = vsel %vm7022_vm2, %v459_v56, %v463_v39  ;;  %v481_v2 = vshll.u32 %v7035_v44, 16  ;;  %v6664_v55 = vld [vmem:[%s9670_s1 + $0x30] sm:$0xff]   ;;  %s6781_s14 = scalar_lea.vmem %s9613_s19, 2048  ;;  %s6785_s24 = sshll.u32 %s6875_s23, 4  ;;  %s6786_s24 = int_to_ptr.vmem [resolvable:$false] %s6785_s24 }
  0x2b   : > { %v478_v0 = vor.u32 %v477_v57, %v473_v43  ;;  %v308_v1 = vsel %vm7022_vm2, %v7032_v41, %v307_v58  ;;  %v474_v7 = vsel %vm7022_vm2, %v469_v59, %v473_v43  ;;  %v485_v9 = vshrl.u32 %v7035_v44, 16  ;;  %v6663_v43 = vld [vmem:[%s9670_s1 + $0xb8] sm:$0xff]   ;;  %p6782_p13 = scmp.ne.s32.totalorder %s9613_s19, %s6781_s14  ;;  %s6787_s30 = scalar_lea.vmem %s6786_s24, 4096 }
  0x2c   : > { %v312_v8 = vor.u32 %v311_v60, %v307_v58  ;;  %v491_v10 = vshll.u32 %v268_v53, 16  ;;  %6143 = vmatpush3.bf16.msra.mxu0 %v6659_v28  ;;  %6577 = vmatpush3.bf16.msra.mxu1 %v6659_v28  ;;  %v5238_v14 = vcombine.low %v464_v63, %v474_v7  ;;  %v483_v15 = vrot.slane %v481_v2, 5  ;;  %v7098_v53 = vld [vmem:[%s6992_s9 + $0x24] sm:$0x1]  ;;  %v6665_v60 = vld [vmem:[%s9670_s1 + $0xb0] sm:$0xff]   ;;  %p6788_p2 = scmp.lt.s32.totalorder %s9613_s19, %s6786_s24  ;;  %p6789_p4 = scmp.lt.s32.totalorder %s6787_s30, %s6781_s14 }
  0x2d   : > { %v479_v13 = vrot.slane %v478_v0, 4  ;;  %v320_v17 = vshrl.u32 %v7056_v3, 16  ;;  %6144 = vmatprep.subr.bf16.mxu0 %v6660_v54  ;;  %6570 = vmatprep.subr.bf16.mxu1 %v6660_v54  ;;  %v487_v20 = vrot.slane %v485_v9, 4  ;;  %v323_v22 = vshll.u32 %v7056_v3, 16  ;;  %p6783_p0 = pnand %p6782_p13, %p6954_p3 }
  0x2e   : > { %v313_v19 = vrot.slane %v312_v8, 4  ;;  %v493_v21 = vrot.slane %v491_v10, 5  ;;  %6164 = vmatprep.mubr.bf16.mxu1 %v5238_v14  ;;  %v329_v26 = vshll.u32 %v7062_v11, 16  ;;  %v333_v27 = vshrl.u32 %v7062_v11, 16  ;;  %p6790_p5 = por %p6789_p4, %p6788_p2 }
  0x2f   : > { %v484_v24 = vsel %vm7022_vm2, %v479_v13, %v483_v15  ;;  %v322_v25 = vrot.slane %v320_v17, 4  ;;  %v488_v30 = vor.u32 %v487_v20, %v483_v15  ;;  %v325_v31 = vrot.slane %v323_v22, 5  ;;  %p6784_p1 = pneg %p6783_p0 }
  0x30   : > { %v318_v28 = vsel %vm7022_vm2, %v313_v19, %v317_v61  ;;  %v339_v32 = vshll.u32 %v7068_v16, 16  ;;  %6145 = vmatpush3.bf16.msra.mxu0 %v6660_v54  ;;  %6578 = vmatpush3.bf16.msra.mxu1 %v6660_v54  ;;  %v331_v38 = vrot.slane %v329_v26, 5  ;;  %v335_v39 = vrot.slane %v333_v27, 4 }
  0x31   : > { %v5231_v36 = vcombine.low %v308_v1, %v318_v28  ;;  %v496_v41 = vshrl.u32 %v236_v23, 16  ;;  %6146 = vmatprep.subr.bf16.mxu0 %v6661_v12  ;;  %6571 = vmatprep.subr.bf16.mxu1 %v6661_v12  ;;  %v489_v42 = vrot.slane %v488_v30, 4  ;;  %v326_v45 = vor.u32 %v325_v31, %v322_v25  ;;  %v7110_v1 = vld [vmem:[%s6992_s9 + $0x70] sm:$0xf]  ;;  %v6666_v31 = vld [vmem:[%s9670_s1 + $0x28] sm:$0xff]   ;;  %p6791_p6 = pnand %p6790_p5, %p6784_p1 }
  0x32   : > { %v341_v46 = vrot.slane %v339_v32, 5  ;;  %v499_v47 = vshll.u32 %v236_v23, 16  ;;  %v336_v49 = vor.u32 %v335_v39, %v331_v38  ;;  %v505_v51 = vshll.u32 %v7081_v33, 16  ;;  %v7131_v32 = vld [vmem:[%s6992_s9 + $0x28] sm:$0xf] }
  0x33   : > { %v498_v50 = vrot.slane %v496_v41, 4  ;;  %v509_v52 = vshrl.u32 %v7081_v33, 16  ;;  %v494_v54 = vsel %vm7022_vm2, %v489_v42, %v493_v21  ;;  %v327_v56 = vrot.slane %v326_v45, 4  ;;  %v6667_v41 = vld [vmem:[%s9670_s1 + $0xa8] sm:$0xff]  }
  0x34   : > { %v501_v57 = vrot.slane %v499_v47, 5  ;;  %v515_v58 = vshll.u32 %v7087_v40, 16  ;;  %6147 = vmatpush3.bf16.msra.mxu0 %v6661_v12  ;;  %6579 = vmatpush3.bf16.msra.mxu1 %v6661_v12  ;;  %v5239_v59 = vcombine.low %v484_v24, %v494_v54  ;;  %v337_v61 = vrot.slane %v336_v49, 4  ;;  %v7121_v24 = vld [vmem:[%s6992_s9 + $0x74] sm:$0x1] }
  0x35   : > { %v507_v63 = vrot.slane %v505_v51, 5  ;;  %v511_v0 = vrot.slane %v509_v52, 4  ;;  %6180 = vmatprep.subr.bf16.mxu1 %v6662_v37  ;;  %6228 = vmatprep.subr.bf16.mxu0 %v6663_v43  ;;  %v332_v2 = vsel %vm7022_vm2, %v327_v56, %v331_v38  ;;  %v343_v9 = vshrl.u32 %v7068_v16, 16  ;;  %v7140_v42 = vld [vmem:[%s6992_s9 + $0x2c] sm:$0xf] }
  0x36   : > { %v502_v7 = vor.u32 %v501_v57, %v498_v50  ;;  %v517_v8 = vrot.slane %v515_v58, 5  ;;  %v342_v10 = vsel %vm7022_vm2, %v337_v61, %v341_v46  ;;  %v349_v13 = vshll.u32 %v7093_v48, 16  ;;  %v7144_v52 = vld [vmem:[%s6992_s9 + $0x30] sm:$0xf] }
  0x37   : > { %v512_v12 = vor.u32 %v511_v0, %v507_v63  ;;  %v353_v14 = vshrl.u32 %v7093_v48, 16  ;;  %6149 = vmatmul.mubr.bf16.vlgmr.msra.gmra.mxu0 %v5231_v36  ;;  %6165 = vmatmul.mubr.bf16.vlgmr.msra.gmra.mxu1 %v5239_v59  ;;  %v5232_v15 = vcombine.low %v332_v2, %v342_v10  ;;  %v345_v19 = vrot.slane %v343_v9, 4  ;;  %v6669_v2 = vld [vmem:[%s9670_s1 + $0xa0] sm:$0xff]  }
  0x38   : > { %v503_v17 = vrot.slane %v502_v7, 4  ;;  %v359_v20 = vshll.u32 %v7098_v53, 16  ;;  %6181 = vmatpush3.bf16.msra.mxu1 %v6662_v37  ;;  %6229 = vmatpush3.bf16.msra.mxu0 %v6663_v43  ;;  %v351_v22 = vrot.slane %v349_v13, 5  ;;  %v519_v25 = vshrl.u32 %v7087_v40, 16 }
  0x39   : > { %v513_v21 = vrot.slane %v512_v12, 4  ;;  %v355_v23 = vrot.slane %v353_v14, 4  ;;  %6182 = vmatprep.subr.bf16.mxu1 %v6664_v55  ;;  %6230 = vmatprep.subr.bf16.mxu0 %v6665_v60  ;;  %v346_v27 = vor.u32 %v345_v19, %v341_v46  ;;  %v525_v30 = vshll.u32 %v7110_v1, 16  ;;  %v7167_v14 = vld [vmem:[%s6992_s9 + $0x80] sm:$0xf] }
  0x3a   : > { %v508_v26 = vsel %vm7022_vm2, %v503_v17, %v507_v63  ;;  %v361_v28 = vrot.slane %v359_v20, 5  ;;  %6152 = vmatprep.mubr.bf16.mxu0 %v5232_v15  ;;  %v521_v38 = vrot.slane %v519_v25, 4  ;;  %v529_v39 = vshrl.u32 %v7110_v1, 16 }
  0x3b   : > { %v518_v36 = vsel %vm7022_vm2, %v513_v21, %v517_v8  ;;  %v356_v37 = vor.u32 %v355_v23, %v351_v22  ;;  %v347_v45 = vrot.slane %v346_v27, 4  ;;  %v527_v46 = vrot.slane %v525_v30, 5  ;;  %v7174_v21 = vld [vmem:[%s6992_s9 + $0x34] sm:$0xf]  ;;  %v6670_v27 = vld [vmem:[%s9670_s1 + $0x18] sm:$0xff]  }
  0x3c   : > { %v5240_v43 = vcombine.low %v508_v26, %v518_v36  ;;  %v535_v47 = vshll.u32 %v7121_v24, 16  ;;  %6183 = vmatpush3.bf16.msra.mxu1 %v6664_v55  ;;  %6231 = vmatpush3.bf16.msra.mxu0 %v6665_v60  ;;  %v522_v50 = vor.u32 %v521_v38, %v517_v8  ;;  %v531_v51 = vrot.slane %v529_v39, 4  ;;  %v6668_v55 = vld [vmem:[%s9670_s1 + $0x20] sm:$0xff]   ;;  %v7155_v60 = vld [vmem:[%s6992_s9 + $0x78] sm:$0xf] }
  0x3d   : > { %v357_v49 = vrot.slane %v356_v37, 4  ;;  %v364_v54 = vshrl.u32 %v7131_v32, 16  ;;  %v352_v56 = vsel %vm7022_vm2, %v347_v45, %v351_v22  ;;  %6184 = vmatprep.subr.bf16.mxu1 %v6666_v31  ;;  %v367_v58 = vshll.u32 %v7131_v32, 16  ;;  %6232 = vmatprep.subr.bf16.mxu0 %v6667_v41  ;;  %v7163_v8 = vld [vmem:[%s6992_s9 + $0x7c] sm:$0xf] }
  0x3e   : > { %6168 = vmatprep.mubr.bf16.mxu1 %v5240_v43  ;;  %v537_v57 = vrot.slane %v535_v47, 5  ;;  %v373_v59 = vshll.u32 %v7140_v42, 16  ;;  %v523_v63 = vrot.slane %v522_v50, 4  ;;  %v532_v0 = vor.u32 %v531_v51, %v527_v46  ;;  %v7185_v37 = vld [vmem:[%s6992_s9 + $0x38] sm:$0x1] }
  0x3f   : > { %v362_v61 = vsel %vm7022_vm2, %v357_v49, %v361_v28  ;;  %v366_v7 = vrot.slane %v364_v54, 4  ;;  %v369_v10 = vrot.slane %v367_v58, 5  ;;  %v377_v13 = vshrl.u32 %v7140_v42, 16  ;;  %v6671_v38 = vld [vmem:[%s9670_s1 + $0x98] sm:$0xff]   ;;  %v6673_v58 = vld [vmem:[%s9670_s1 + $0x90] sm:$0xff]  }
  0x40   : > { %v5233_v9 = vcombine.low %v352_v56, %v362_v61  ;;  %v375_v12 = vrot.slane %v373_v59, 5  ;;  %v528_v15 = vsel %vm7022_vm2, %v523_v63, %v527_v46  ;;  %v533_v17 = vrot.slane %v532_v0, 4  ;;  %6185 = vmatpush3.bf16.msra.mxu1 %v6666_v31  ;;  %6233 = vmatpush3.bf16.msra.mxu0 %v6667_v41 }
  0x41   : > { %v383_v19 = vshll.u32 %v7144_v52, 16  ;;  %v540_v20 = vshrl.u32 %v7155_v60, 16  ;;  %6186 = vmatprep.subr.bf16.mxu1 %v6668_v55  ;;  %v370_v22 = vor.u32 %v369_v10, %v366_v7  ;;  %v379_v23 = vrot.slane %v377_v13, 4  ;;  %6234 = vmatprep.subr.bf16.mxu0 %v6669_v2 }
  0x42   : > { %6153 = vmatmul.mubr.bf16.gmra.mxu0 %v5233_v9  ;;  %v543_v25 = vshll.u32 %v7155_v60, 16  ;;  %v549_v26 = vshll.u32 %v7163_v8, 16  ;;  %v538_v28 = vsel %vm7022_vm2, %v533_v17, %v537_v57  ;;  %v553_v36 = vshrl.u32 %v7163_v8, 16 }
  0x43   : > { %v385_v30 = vrot.slane %v383_v19, 5  ;;  %v542_v31 = vrot.slane %v540_v20, 4  ;;  %v5241_v39 = vcombine.low %v528_v15, %v538_v28  ;;  %v371_v41 = vrot.slane %v370_v22, 4  ;;  %v7209_v20 = vld [vmem:[%s6992_s9 + $0x88] sm:$0x1] }
  0x44   : > { %v380_v43 = vor.u32 %v379_v23, %v375_v12  ;;  %v545_v45 = vrot.slane %v543_v25, 5  ;;  %6187 = vmatpush3.bf16.msra.mxu1 %v6668_v55  ;;  %6235 = vmatpush3.bf16.msra.mxu0 %v6669_v2  ;;  %v551_v46 = vrot.slane %v549_v26, 5  ;;  %v555_v47 = vrot.slane %v553_v36, 4  ;;  %v6672_v55 = vld [vmem:[%s9670_s1 + $0x10] sm:$0xff]   ;;  %v7203_v2 = vld [vmem:[%s6992_s9 + $0x84] sm:$0xf] }
  0x45   : > { %v559_v49 = vshll.u32 %v7167_v14, 16  ;;  %v387_v50 = vshrl.u32 %v7144_v52, 16  ;;  %6169 = vmatmul.mubr.bf16.gmra.mxu1 %v5241_v39  ;;  %v376_v51 = vsel %vm7022_vm2, %v371_v41, %v375_v12  ;;  %v393_v57 = vshll.u32 %v7174_v21, 16  ;;  %6188 = vmatprep.subr.bf16.mxu1 %v6670_v27  ;;  %v7216_v28 = vld [vmem:[%s6992_s9 + $0x3c] sm:$0xf]  ;;  %v6675_v41 = vld [vmem:[%s9670_s1 + $0x88] sm:$0xff]  }
  0x46   : > { %v381_v54 = vrot.slane %v380_v43, 4  ;;  %v546_v56 = vor.u32 %v545_v45, %v542_v31  ;;  %v556_v59 = vor.u32 %v555_v47, %v551_v46  ;;  %v397_v0 = vshrl.u32 %v7174_v21, 16  ;;  %6236 = vmatprep.subr.bf16.mxu0 %v6671_v38  ;;  %v7225_v39 = vld [vmem:[%s6992_s9 + $0x40] sm:$0xf] }
  0x47   : > { %v561_v61 = vrot.slane %v559_v49, 5  ;;  %v389_v63 = vrot.slane %v387_v50, 4  ;;  %v395_v10 = vrot.slane %v393_v57, 5  ;;  %v403_v12 = vshll.u32 %v7185_v37, 16  ;;  %v7232_v49 = vld [vmem:[%s6992_s9 + $0x44] sm:$0xf] }
  0x48   : > { %v386_v7 = vsel %vm7022_vm2, %v381_v54, %v385_v30  ;;  %v547_v9 = vrot.slane %v546_v56, 4  ;;  %v557_v15 = vrot.slane %v556_v59, 4  ;;  %v399_v19 = vrot.slane %v397_v0, 4  ;;  %6189 = vmatpush3.bf16.msra.mxu1 %v6670_v27  ;;  %6237 = vmatpush3.bf16.msra.mxu0 %v6671_v38  ;;  %v7235_v50 = vld [vmem:[%s6992_s9 + $0x8c] sm:$0xf] }
  0x49   : > { %v5234_v13 = vcombine.low %v376_v51, %v386_v7  ;;  %v390_v17 = vor.u32 %v389_v63, %v385_v30  ;;  %v405_v23 = vrot.slane %v403_v12, 5  ;;  %v563_v25 = vshrl.u32 %v7167_v14, 16  ;;  %6190 = vmatprep.subr.bf16.mxu1 %v6672_v55  ;;  %6238 = vmatprep.subr.bf16.mxu0 %v6673_v58  ;;  %v6674_v30 = vld [vmem:[%s9670_s1 + $0x8] sm:$0xff]   ;;  %v7241_v59 = vld [vmem:[%s6992_s9 + $0x90] sm:$0xf]  ;;  %v6676_v63 = vld [vmem:[%s9670_s1] sm:$0xff]  }
  0x4a   : > { %v552_v22 = vsel %vm7022_vm2, %v547_v9, %v551_v46  ;;  %v569_v26 = vshll.u32 %v7203_v2, 16  ;;  %v562_v27 = vsel %vm7022_vm2, %v557_v15, %v561_v61  ;;  %v400_v36 = vor.u32 %v399_v19, %v395_v10 }
  0x4b   : > { %6156 = vmatprep.mubr.bf16.mxu0 %v5234_v13  ;;  %v391_v31 = vrot.slane %v390_v17, 4  ;;  %v573_v38 = vshrl.u32 %v7203_v2, 16  ;;  %v5242_v43 = vcombine.low %v552_v22, %v562_v27  ;;  %v565_v45 = vrot.slane %v563_v25, 4  ;;  %v7255_v25 = vld [vmem:[%s6992_s9 + $0x94] sm:$0xf] }
  0x4c   : > { %v571_v46 = vrot.slane %v569_v26, 5  ;;  %v579_v47 = vshll.u32 %v7209_v20, 16  ;;  %v401_v54 = vrot.slane %v400_v36, 4  ;;  %6191 = vmatpush3.bf16.msra.mxu1 %v6672_v55  ;;  %6239 = vmatpush3.bf16.msra.mxu0 %v6673_v58  ;;  %v408_v57 = vshrl.u32 %v7216_v28, 16  ;;  %v6677_v55 = vld [vmem:[%s9670_s1 + $0x80] sm:$0xff]   ;;  %v7260_v26 = vld [vmem:[%s9670_s1 + $0xf8] sm:$0xff]  }
  0x4d   : > { %v396_v51 = vsel %vm7022_vm2, %v391_v31, %v395_v10  ;;  %v575_v56 = vrot.slane %v573_v38, 4  ;;  %6172 = vmatprep.mubr.bf16.mxu1 %v5242_v43  ;;  %v566_v0 = vor.u32 %v565_v45, %v561_v61  ;;  %v411_v9 = vshll.u32 %v7216_v28, 16  ;;  %6192 = vmatprep.subr.bf16.mxu1 %v6674_v30  ;;  %v7267_v38 = vld [vmem:[%s9670_s1 + $0x138] sm:$0xff]  }
  0x4e   : > { %v581_v7 = vrot.slane %v579_v47, 5  ;;  %v417_v10 = vshll.u32 %v7225_v39, 16  ;;  %v406_v58 = vsel %vm7022_vm2, %v401_v54, %v405_v23  ;;  %v410_v13 = vrot.slane %v408_v57, 4  ;;  %6240 = vmatprep.subr.bf16.mxu0 %v6675_v41  ;;  %v7276_v57 = vld [vmem:[%s6992_s9 + $0x48] sm:$0xf] }
  0x4f   : > { %v576_v12 = vor.u32 %v575_v56, %v571_v46  ;;  %v421_v15 = vshrl.u32 %v7225_v39, 16  ;;  %v5235_v17 = vcombine.low %v396_v51, %v406_v58  ;;  %v567_v61 = vrot.slane %v566_v0, 4  ;;  %v7279_v58 = vld [vmem:[%s6992_s9 + $0x4c] sm:$0x1] }
  0x50   : > { %v413_v19 = vrot.slane %v411_v9, 5  ;;  %v419_v22 = vrot.slane %v417_v10, 5  ;;  %v427_v23 = vshll.u32 %v7232_v49, 16  ;;  %v584_v36 = vshrl.u32 %v7235_v50, 16  ;;  %6193 = vmatpush3.bf16.msra.mxu1 %v6674_v30  ;;  %6241 = vmatpush3.bf16.msra.mxu0 %v6675_v41 }
  0x51   : > { %v577_v27 = vrot.slane %v576_v12, 4  ;;  %v423_v31 = vrot.slane %v421_v15, 4  ;;  %6157 = vmatmul.mubr.bf16.gmra.mxu0 %v5235_v17  ;;  %v572_v43 = vsel %vm7022_vm2, %v567_v61, %v571_v46  ;;  %v587_v47 = vshll.u32 %v7235_v50, 16  ;;  %6194 = vmatprep.subr.bf16.mxu1 %v6676_v63  ;;  %v7285_v17 = vld [vmem:[%s6992_s9 + $0x98] sm:$0xf] }
  0x52   : > { %v414_v45 = vor.u32 %v413_v19, %v410_v13  ;;  %v593_v51 = vshll.u32 %v7241_v59, 16  ;;  %v429_v54 = vrot.slane %v427_v23, 5  ;;  %v586_v56 = vrot.slane %v584_v36, 4  ;;  %6242 = vmatprep.subr.bf16.mxu0 %v6677_v55 }
  0x53   : > { %v582_v30 = vsel %vm7022_vm2, %v577_v27, %v581_v7  ;;  %v424_v41 = vor.u32 %v423_v31, %v419_v22  ;;  %v589_v9 = vrot.slane %v587_v47, 5  ;;  %v597_v13 = vshrl.u32 %v7241_v59, 16 }
  0x54   : > { %v5243_v46 = vcombine.low %v572_v43, %v582_v30  ;;  %v415_v0 = vrot.slane %v414_v45, 4  ;;  %v595_v10 = vrot.slane %v593_v51, 5  ;;  %v603_v7 = vshll.u32 %v7255_v25, 16  ;;  %6195 = vmatpush3.bf16.msra.mxu1 %v6676_v63  ;;  %6243 = vmatpush3.bf16.msra.mxu0 %v6677_v55  ;;  %v7295_v63 = vld [vmem:[%s6992_s9 + $0x9c] sm:$0x1] }
  0x55   : > { %v425_v12 = vrot.slane %v424_v41, 4  ;;  %v431_v15 = vshrl.u32 %v7232_v49, 16  ;;  %v590_v19 = vor.u32 %v589_v9, %v586_v56  ;;  %v437_v27 = vshll.u32 %v7276_v57, 16  ;;  %6276 = vmatprep.subr.bf16.mxu1 %v7260_v26  ;;  %6324 = vmatprep.subr.bf16.mxu0 %v7267_v38 }
  0x56   : > { %6173 = vmatmul.mubr.bf16.gmra.mxu1 %v5243_v46  ;;  %v420_v61 = vsel %vm7022_vm2, %v415_v0, %v419_v22  ;;  %v441_v31 = vshrl.u32 %v7276_v57, 16  ;;  %v599_v36 = vrot.slane %v597_v13, 4  ;;  %v605_v43 = vrot.slane %v603_v7, 5  ;;  %v1222_v7 = vld [vmem:[%s6992_s9] sm:$0xe] }
  0x57   : > { %v430_v23 = vsel %vm7022_vm2, %v425_v12, %v429_v54  ;;  %v433_v45 = vrot.slane %v431_v15, 4  ;;  %v591_v22 = vrot.slane %v590_v19, 4  ;;  %v439_v47 = vrot.slane %v437_v27, 5 }
  0x58   : > { %v5236_v55 = vcombine.low %v420_v61, %v430_v23  ;;  %v443_v51 = vrot.slane %v441_v31, 4  ;;  %v600_v30 = vor.u32 %v599_v36, %v595_v10  ;;  %v447_v56 = vshll.u32 %v7279_v58, 16 }
  0x59   : > { %v434_v41 = vor.u32 %v433_v45, %v429_v54  ;;  %v607_v46 = vshrl.u32 %v7255_v25, 16  ;;  %v596_v0 = vsel %vm7022_vm2, %v591_v22, %v595_v10  ;;  %v613_v12 = vshll.u32 %v7285_v17, 16 }
  0x5a   : > { %6160 = vmatprep.mubr.bf16.mxu0 %v5236_v55  ;;  %v444_v9 = vor.u32 %v443_v51, %v439_v47  ;;  %v617_v13 = vshrl.u32 %v7285_v17, 16  ;;  %v601_v15 = vrot.slane %v600_v30, 4  ;;  %v449_v19 = vrot.slane %v447_v56, 5 }
  0x5b   : > { %v435_v61 = vrot.slane %v434_v41, 4  ;;  %v609_v27 = vrot.slane %v607_v46, 4  ;;  %v615_v31 = vrot.slane %v613_v12, 5  ;;  %v623_v36 = vshll.u32 %v7295_v63, 16 }
  0x5c   : > { %v445_v54 = vrot.slane %v444_v9, 4  ;;  %v619_v23 = vrot.slane %v617_v13, 4  ;;  %v606_v45 = vsel %vm7022_vm2, %v601_v15, %v605_v43  ;;  %v5278_v22 = vrot.slane %v1222_v7, 9  ;;  %v1223_v9 = vld [vmem:[%s6992_s9 + $0x14] sm:$0xe] }
  0x5d   : > { %v440_v10 = vsel %vm7022_vm2, %v435_v61, %v439_v47  ;;  %v610_v55 = vor.u32 %v609_v27, %v605_v43  ;;  %v5244_v51 = vcombine.low %v596_v0, %v606_v45  ;;  %v625_v56 = vrot.slane %v623_v36, 5 }
  0x5e   : > { %v450_v30 = vsel %vm7022_vm2, %v445_v54, %v449_v19  ;;  %v620_v41 = vor.u32 %v619_v23, %v615_v31  ;;  %v1251_v47 = vrot.slane %v6998_v5, 5  ;;  %v1254_v43 = vrot.slane %v7001_v6, 5  ;;  %v1224_v54 = vld [vmem:[%s6992_s9 + $0x28] sm:$0xe] }
  0x5f   : > { %v5237_v12 = vcombine.low %v440_v10, %v450_v30  ;;  %v611_v13 = vrot.slane %v610_v55, 4  ;;  %6176 = vmatprep.mubr.bf16.mxu1 %v5244_v51  ;;  %v1257_v7 = vrot.slane %v7027_v34, 5  ;;  %v5279_v45 = vrot.slane %v1223_v9, 9 }
  0x60   : > { %v621_v0 = vrot.slane %v620_v41, 4  ;;  %v1252_v61 = vsel %vm7314_vm5, %v5278_v22, %v1251_v47  ;;  %v1253_v19 = vrot.slane %v1251_v47, 4  ;;  %v1256_v27 = vrot.slane %v1254_v43, 4 }
  0x61   : > { %6161 = vmatmul.mubr.bf16.gmra.mxu0 %v5237_v12  ;;  %v616_v15 = vsel %vm7022_vm2, %v611_v13, %v615_v31  ;;  %v1259_v36 = vrot.slane %v1257_v7, 4  ;;  %v1264_v10 = vrot.slane %v7062_v11, 5  ;;  %v1267_v22 = vrot.slane %v7068_v16, 5 }
  0x62   : > { %v626_v23 = vsel %vm7022_vm2, %v621_v0, %v625_v56  ;;  %v1255_v51 = vsel %vm7314_vm5, %v1253_v19, %v1254_v43  ;;  %v1258_v31 = vsel %vm7314_vm5, %v1256_v27, %v1257_v7  ;;  %v1270_v47 = vrot.slane %v7093_v48, 5  ;;  %v6685_v43 = vld [vmem:[%s9670_s1 + $0x130] sm:$0xff]   ;;  %v1225_v7 = vld [vmem:[%s6992_s9 + $0x3c] sm:$0xe] }
  0x63   : > { %v5245_v55 = vcombine.low %v616_v15, %v626_v23  ;;  %v5302_v30 = vcombine.low %v1252_v61, %v1255_v51  ;;  %v1261_v41 = vsel %vm7314_vm5, %v1259_v36, %v1260_v62  ;;  %v1265_v56 = vsel %vm7314_vm5, %v5279_v45, %v1264_v10 }
  0x64   : > { %v1266_v9 = vrot.slane %v1264_v10, 4  ;;  %v5303_v12 = vcombine.low %v1258_v31, %v1261_v41  ;;  %v1269_v13 = vrot.slane %v1267_v22, 4  ;;  %v1273_v62 = vrot.slane %v7098_v53, 5  ;;  %v6689_v31 = vld [vmem:[%s9670_s1 + $0x128] sm:$0xff]  }
  0x65   : > { %6177 = vmatmul.mubr.bf16.gmra.mxu1 %v5245_v55  ;;  %6244 = vmatprep.mubr.bf16.mxu0 %v5302_v30  ;;  %v5280_v0 = vrot.slane %v1224_v54, 9  ;;  %v1272_v61 = vrot.slane %v1270_v47, 4  ;;  %v1277_v19 = vrot.slane %v7140_v42, 5  ;;  %v5255_v27 = vcombine.low %v7001_v6, %v7027_v34  ;;  %v6684_v6 = vld [vmem:[%s9670_s1 + $0xf0] sm:$0xff]  }
  0x66   : > { %6196 = vmatprep.mubr.bf16.mxu1 %v5254_v18  ;;  %v1268_v35 = vsel %vm7314_vm5, %v1266_v9, %v1267_v22  ;;  %v5256_v23 = vcombine.low %v7056_v3, %v7062_v11  ;;  %v1280_v4 = vrot.slane %v7144_v52, 5  ;;  %v1283_v5 = vrot.slane %v7174_v21, 5 }
  0x67   : > { %v5304_v15 = vcombine.low %v1265_v56, %v1268_v35  ;;  %v1271_v18 = vsel %vm7314_vm5, %v1269_v13, %v1270_v47  ;;  %v1274_v53 = vsel %vm7314_vm5, %v1272_v61, %v1273_v62  ;;  %v1279_v54 = vrot.slane %v1277_v19, 4  ;;  %v1227_v35 = vld [vmem:[%s6992_s9 + $0x64] sm:$0xe]  ;;  %v7410_v61 = vld [vmem:[%s6992_s9 + $0x58] sm:$0xf] }
  0x68   : > { %v1286_v36 = vrot.slane %v7185_v37, 5  ;;  %v1278_v34 = vsel %vm7314_vm5, %v5280_v0, %v1277_v19  ;;  %v1282_v3 = vrot.slane %v1280_v4, 4  ;;  %v1285_v11 = vrot.slane %v1283_v5, 4 }
  0x69   : > { %6245 = vmatmul.mubr.bf16.vlgmr.msra.gmra.mxu0 %v5303_v12  ;;  %v5281_v45 = vrot.slane %v1225_v7, 9  ;;  %v1281_v10 = vsel %vm7314_vm5, %v1279_v54, %v1280_v4  ;;  %v1290_v37 = vrot.slane %v7225_v39, 5  ;;  %v5257_v55 = vcombine.low %v7068_v16, %v7093_v48  ;;  %v1226_v12 = vld [vmem:[%s6992_s9 + $0x50] sm:$0xe]  ;;  %v7406_v7 = vld [vmem:[%s6992_s9 + $0x54] sm:$0xf] }
  0x6a   : > { %6325 = vmatpush3.bf16.msra.mxu0 %v7267_v38  ;;  %6248 = vmatprep.mubr.bf16.mxu0 %v5304_v15  ;;  %v1293_v38 = vrot.slane %v7232_v49, 5  ;;  %v5258_v51 = vcombine.low %v7131_v32, %v7140_v42  ;;  %v1296_v22 = vrot.slane %v7276_v57, 5  ;;  %v5305_v30 = vcombine.low %v1271_v18, %v1274_v53  ;;  %v6692_v54 = vld [vmem:[%s9670_s1 + $0xe0] sm:$0xff]  }
  0x6b   : > { %6326 = vmatprep.subr.bf16.mxu0 %v6685_v43  ;;  %v5306_v41 = vcombine.low %v1278_v34, %v1281_v10  ;;  %v1292_v56 = vrot.slane %v1290_v37, 4  ;;  %v7386_v16 = vsel %vm7314_vm5, %v1282_v3, %v1283_v5  ;;  %v7390_v48 = vsel %vm7314_vm5, %v1285_v11, %v1286_v36  ;;  %v7433_v36 = vld [vmem:[%s6992_s9 + $0x50] sm:$0xf]  ;;  %v1228_v3 = vld [vmem:[%s6992_s9 + $0x78] sm:$0xe] }
  0x6c   : > { %v1295_v9 = vrot.slane %v1293_v38, 4  ;;  %v7394_v13 = vsel %vm7314_vm5, %v5281_v45, %v1290_v37  ;;  %v1298_v47 = vrot.slane %v1296_v22, 4  ;;  %v1299_v0 = vrot.slane %v7279_v58, 5  ;;  %v6693_v58 = vld [vmem:[%s9670_s1 + $0x120] sm:$0xff]   ;;  %v6697_v37 = vld [vmem:[%s9670_s1 + $0x118] sm:$0xff]  }
  0x6d   : > { %6197 = vmatmul.mubr.bf16.vlgmr.msra.gmra.mxu1 %v5255_v27  ;;  %v7402_v62 = vsel %vm7314_vm5, %v1292_v56, %v1293_v38  ;;  %v1303_v15 = vrot.slane %v7406_v7, 5  ;;  %v5259_v19 = vcombine.low %v7144_v52, %v7174_v21  ;;  %v5260_v27 = vcombine.low %v7216_v28, %v7225_v39  ;;  %v7570_v52 = vld [vmem:[%s6992_s9 + $0x20] sm:$0xf] }
  0x6e   : > { %6277 = vmatpush3.bf16.msra.mxu1 %v7260_v26  ;;  %6200 = vmatprep.mubr.bf16.mxu1 %v5256_v23  ;;  %v6688_v26 = vld [vmem:[%s9670_s1 + $0xe8] sm:$0xff]   ;;  %v5282_v23 = vrot.slane %v1226_v12, 9  ;;  %v1309_v4 = vrot.slane %v7035_v44, 5  ;;  %v5307_v5 = vcombine.low %v7386_v16, %v7390_v48  ;;  %v7427_v53 = vsel %vm7314_vm5, %v1295_v9, %v1296_v22  ;;  %v7452_v22 = vld [vmem:[%s6992_s9 + $0x5c] sm:$0xf] }
  0x6f   : > { %6278 = vmatprep.subr.bf16.mxu1 %v6684_v6  ;;  %6327 = vmatpush3.bf16.msra.mxu0 %v6685_v43  ;;  %v1306_v43 = vrot.slane %v7410_v61, 5  ;;  %v5308_v11 = vcombine.low %v7394_v13, %v7402_v62  ;;  %v1305_v45 = vrot.slane %v1303_v15, 4  ;;  %v5283_v38 = vrot.slane %v1227_v35, 9  ;;  %v7470_v48 = vld [vmem:[%s6992_s9 + $0x60] sm:$0x1]  ;;  %v6696_v62 = vld [vmem:[%s9670_s1 + $0xd8] sm:$0xff]  }
  0x70   : > { %6328 = vmatprep.subr.bf16.mxu0 %v6689_v31  ;;  %v1319_v56 = vrot.slane %v7087_v40, 5  ;;  %v7460_v9 = vsel %vm7314_vm5, %v5282_v23, %v1303_v15  ;;  %v1322_v16 = vrot.slane %v7110_v1, 5  ;;  %v5284_v23 = vrot.slane %v1228_v3, 9  ;;  %v7567_v12 = vld [vmem:[%s6992_s9 + $0x1c] sm:$0xf]  ;;  %v6704_v44 = vld [vmem:[%s9670_s1 + $0xc8] sm:$0xff]  }
  0x71   : > { %6249 = vmatmul.mubr.bf16.gmra.mxu0 %v5305_v30  ;;  %v7442_v10 = vrot.slane %v1306_v43, 4  ;;  %v1329_v42 = vrot.slane %v7163_v8, 5  ;;  %v1338_v15 = vrot.slane %v7209_v20, 5  ;;  %v1342_v20 = vrot.slane %v7241_v59, 5 }
  0x72   : > { %6279 = vmatpush3.bf16.msra.mxu1 %v6684_v6  ;;  %6252 = vmatprep.mubr.bf16.mxu0 %v5306_v41  ;;  %v7449_v6 = vsel %vm7314_vm5, %v1298_v47, %v1299_v0  ;;  %v1316_v41 = vrot.slane %v7081_v33, 5  ;;  %v1312_v33 = vrot.slane %v7470_v48, 5  ;;  %v1321_v35 = vrot.slane %v1319_v56, 4 }
  0x73   : > { %6280 = vmatprep.subr.bf16.mxu1 %v6688_v26  ;;  %6329 = vmatpush3.bf16.msra.mxu0 %v6689_v31  ;;  %v7464_v31 = vrot.slane %v1309_v4, 4  ;;  %v1325_v0 = vrot.slane %v7121_v24, 5  ;;  %v1344_v39 = vrot.slane %v1342_v20, 4  ;;  %v7626_v24 = vld [vmem:[%s6992_s9 + $0x30] sm:$0xf] }
  0x74   : > { %6330 = vmatprep.subr.bf16.mxu0 %v6693_v58  ;;  %v7475_v13 = vsel %vm7314_vm5, %v5283_v38, %v1316_v41  ;;  %v1318_v47 = vrot.slane %v1316_v41, 4  ;;  %v7492_v32 = vsel %vm7314_vm5, %v1321_v35, %v1322_v16  ;;  %v1335_v41 = vrot.slane %v7203_v2, 5 }
  0x75   : > { %6201 = vmatmul.mubr.bf16.gmra.mxu1 %v5257_v55  ;;  %v1324_v55 = vrot.slane %v1322_v16, 4  ;;  %v7516_v35 = vsel %vm7314_vm5, %v5284_v23, %v1329_v42  ;;  %v5400_v16 = vld [vmem:[%s6992_s9 + $0x14] sm:$0xf]  ;;  %v6705_v23 = vld [vmem:[%s9670_s1 + $0x108] sm:$0xff]   ;;  %v7589_v28 = vsel %vm7314_vm5, %v7464_v31, %v1312_v33  ;;  %v6709_v31 = vld [vmem:[%s9670_s1 + $0x100] sm:$0xff]  }
  0x76   : > { %6204 = vmatprep.mubr.bf16.mxu1 %v5258_v51  ;;  %6281 = vmatpush3.bf16.msra.mxu1 %v6688_v26  ;;  %v7488_v38 = vsel %vm7314_vm5, %v1318_v47, %v1319_v56  ;;  %v1332_v51 = vrot.slane %v7167_v14, 5  ;;  %v1229_v56 = vld [vmem:[%s6992_s9 + $0x8c] sm:$0xe]  ;;  %v6700_v47 = vld [vmem:[%s9670_s1 + $0xd0] sm:$0xff]   ;;  %v1337_v3 = vrot.slane %v1335_v41, 4 }
  0x77   : > { %6282 = vmatprep.subr.bf16.mxu1 %v6692_v54  ;;  %6331 = vmatpush3.bf16.msra.mxu0 %v6693_v58  ;;  %v7500_v26 = vsel %vm7314_vm5, %v1324_v55, %v1325_v0  ;;  %v6701_v58 = vld [vmem:[%s9670_s1 + $0x110] sm:$0xff]   ;;  %v1331_v55 = vrot.slane %v1329_v42, 4  ;;  %v1345_v42 = vrot.slane %v7255_v25, 5 }
  0x78   : > { %6332 = vmatprep.subr.bf16.mxu0 %v6697_v37  ;;  %v1334_v0 = vrot.slane %v1332_v51, 4 }
  0x79   : > { %6253 = vmatmul.mubr.bf16.gmra.mxu0 %v5307_v5  ;;  %v1307_v5 = vsel %vm7314_vm5, %v1305_v45, %v1306_v43  ;;  %v5285_v43 = vrot.slane %v1229_v56, 9  ;;  %v7559_v56 = vld [vmem:[%s6992_s9 + $0x68] sm:$0xf]  ;;  %v7613_v45 = vld [vmem:[%s6992_s9 + $0x2c] sm:$0xf] }
  0x7a   : > { %6256 = vmatprep.mubr.bf16.mxu0 %v5308_v11  ;;  %6283 = vmatpush3.bf16.msra.mxu1 %v6692_v54  ;;  %v7528_v54 = vsel %vm7314_vm5, %v1331_v55, %v1332_v51  ;;  %v7532_v11 = vsel %vm7314_vm5, %v1334_v0, %v1335_v41  ;;  %v7548_v41 = vld [vmem:[%s6992_s9 + $0x18] sm:$0xf]  ;;  %v1348_v51 = vrot.slane %v7285_v17, 5  ;;  %v5310_v21 = vcombine.low %v7460_v9, %v1307_v5  ;;  %v5405_v0 = vld [vmem:[%s6992_s9 + $0x28] sm:$0xf] }
  0x7b   : > { %6284 = vmatprep.subr.bf16.mxu1 %v6696_v62  ;;  %6333 = vmatpush3.bf16.msra.mxu0 %v6697_v37  ;;  %v7539_v37 = vsel %vm7314_vm5, %v1337_v3, %v1338_v15  ;;  %v5309_v15 = vcombine.low %v7427_v53, %v7449_v6  ;;  %v7556_v3 = vld [vmem:[%s6992_s9 + $0x64] sm:$0xf]  ;;  %v2106_v53 = vshrl.u32 %v5400_v16, 16  ;;  %v2109_v6 = vshll.u32 %v5400_v16, 16 }
  0x7c   : > { %6334 = vmatprep.subr.bf16.mxu0 %v6701_v58  ;;  %v1347_v9 = vrot.slane %v1345_v42, 4  ;;  %v6708_v16 = vld [vmem:[%s9670_s1 + $0xc0] sm:$0xff]   ;;  %v2139_v55 = vshrl.u32 %v7570_v52, 16 }
  0x7d   : > { %6205 = vmatmul.mubr.bf16.gmra.mxu1 %v5259_v19  ;;  %v7581_v19 = vsel %vm7314_vm5, %v7442_v10, %v1309_v4  ;;  %v2119_v4 = vshrl.u32 %v7548_v41, 16  ;;  %v7598_v10 = vsel %vm7314_vm5, %v5285_v43, %v1342_v20  ;;  %v2108_v48 = vrot.slane %v2106_v53, 4 }
  0x7e   : > { %6208 = vmatprep.mubr.bf16.mxu1 %v5260_v27  ;;  %6285 = vmatpush3.bf16.msra.mxu1 %v6696_v62  ;;  %v2115_v27 = vshll.u32 %v7548_v41, 16  ;;  %v2111_v33 = vrot.slane %v2109_v6, 5  ;;  %v7604_v62 = vld [vmem:[%s6992_s9 + $0x24] sm:$0x1]  ;;  %v2125_v20 = vshll.u32 %v7567_v12, 16  ;;  %v1351_v53 = vrot.slane %v7295_v63, 5 }
  0x7f   : > { %6286 = vmatprep.subr.bf16.mxu1 %v6700_v47  ;;  %6335 = vmatpush3.bf16.msra.mxu0 %v6701_v58  ;;  %v1350_v58 = vrot.slane %v1348_v51, 4  ;;  %v2121_v43 = vrot.slane %v2119_v4, 4  ;;  %v2129_v6 = vshrl.u32 %v7567_v12, 16  ;;  %v2141_v18 = vrot.slane %v2139_v55, 4 }
  0x80   : > { %6336 = vmatprep.subr.bf16.mxu0 %v6705_v23  ;;  %v7609_v5 = vrot.slane %v2115_v27, 5  ;;  %v7621_v27 = vsel %vm7314_vm5, %v1344_v39, %v1345_v42  ;;  %v2112_v4 = vor.u32 %v2111_v33, %v2108_v48  ;;  %v7623_v30 = vrot.slane %v2125_v20, 5  ;;  %v7665_v20 = vld [vmem:[%s6992_s9 + $0x38] sm:$0x1] }
  0x81   : > { %6257 = vmatmul.mubr.bf16.gmra.mxu0 %v5309_v15  ;;  %v2135_v15 = vshll.u32 %v7570_v52, 16  ;;  %v9689_v42 = vcombine.low %v7232_v49, %v7276_v57  ;;  %v5311_v39 = vcombine.low %v7581_v19, %v7589_v28  ;;  %v7643_v48 = vsel %vm7314_vm5, %v1347_v9, %v1348_v51  ;;  %v7654_v51 = vld [vmem:[%s6992_s9 + $0x34] sm:$0xf] }
  0x82   : > { %6260 = vmatprep.mubr.bf16.mxu0 %v5310_v21  ;;  %6287 = vmatpush3.bf16.msra.mxu1 %v6700_v47  ;;  %v2150_v47 = vshrl.u32 %v5405_v0, 16  ;;  %v2122_v63 = vor.u32 %v2121_v43, %v7609_v5  ;;  %v2131_v21 = vrot.slane %v2129_v6, 4  ;;  %v2145_v33 = vshll.u32 %v7604_v62, 16  ;;  %v5410_v6 = vld [vmem:[%s6992_s9 + $0x3c] sm:$0xf] }
  0x83   : > { %6288 = vmatprep.subr.bf16.mxu1 %v6704_v44  ;;  %6337 = vmatpush3.bf16.msra.mxu0 %v6705_v23  ;;  %v7629_v34 = vrot.slane %v2135_v15, 5  ;;  %v7634_v23 = vld [vmem:[%s9670_s1 + $0x1b8] sm:$0xff]   ;;  %v2153_v55 = vshll.u32 %v5405_v0, 16  ;;  %v9690_v43 = vcombine.low %v7433_v36, %v7406_v7  ;;  %v2159_v28 = vshll.u32 %v7613_v45, 16 }
  0x84   : > { %6338 = vmatprep.subr.bf16.mxu0 %v6709_v31  ;;  %v2132_v57 = vor.u32 %v2131_v21, %v7623_v30  ;;  %v2152_v19 = vrot.slane %v2150_v47, 4  ;;  %v7660_v7 = vld [vmem:[%s9670_s1 + $0x178] sm:$0xff]   ;;  %v2169_v9 = vshll.u32 %v7626_v24, 16  ;;  %v7670_v15 = vsel %vm7314_vm5, %v1350_v58, %v1351_v53 }
  0x85   : > { %6209 = vmatmul.mubr.bf16.gmra.mxu1 %v9689_v42  ;;  %v2142_v0 = vor.u32 %v2141_v18, %v7629_v34  ;;  %v2155_v36 = vrot.slane %v2153_v55, 5  ;;  %v2123_v18 = vrot.slane %v2122_v63, 4  ;;  %v7673_v47 = vrot.slane %v2159_v28, 5  ;;  %v7684_v28 = vld [vmem:[%s6992_s9 + $0x40] sm:$0xf] }
  0x86   : > { %6212 = vmatprep.mubr.bf16.mxu1 %v9690_v43  ;;  %6289 = vmatpush3.bf16.msra.mxu1 %v6704_v44  ;;  %v2163_v44 = vshrl.u32 %v7613_v45, 16  ;;  %v2147_v21 = vrot.slane %v2145_v33, 5  ;;  %v7675_v55 = vrot.slane %v2169_v9, 5  ;;  %v2173_v43 = vshrl.u32 %v7626_v24, 16 }
  0x87   : > { %6290 = vmatprep.subr.bf16.mxu1 %v6708_v16  ;;  %6339 = vmatpush3.bf16.msra.mxu0 %v6709_v31  ;;  %v2113_v31 = vrot.slane %v2112_v4, 4  ;;  %v9691_v49 = vcombine.low %v7475_v13, %v7488_v38  ;;  %v2133_v58 = vrot.slane %v2132_v57, 4  ;;  %v2156_v53 = vor.u32 %v2155_v36, %v2152_v19  ;;  %v7691_v13 = vld [vmem:[%s6992_s9 + $0x44] sm:$0xf] }
  0x88   : > { %6420 = vmatprep.subr.bf16.mxu0 %v7634_v23  ;;  %v2165_v42 = vrot.slane %v2163_v44, 4  ;;  %v2179_v4 = vshll.u32 %v7654_v51, 16  ;;  %v2183_v63 = vshrl.u32 %v7654_v51, 16  ;;  %v2143_v33 = vrot.slane %v2142_v0, 4 }
  0x89   : > { %6261 = vmatmul.mubr.bf16.gmra.mxu0 %v5311_v39  ;;  %v2175_v9 = vrot.slane %v2173_v43, 4  ;;  %v2194_v57 = vshrl.u32 %v5410_v6, 16  ;;  %v9692_v19 = vcombine.low %v7410_v61, %v7452_v22  ;;  %v2118_v0 = vsel %vm7022_vm2, %v2113_v31, %v7609_v5 }
  0x8a   : > { %6264 = vmatprep.mubr.bf16.mxu0 %v9691_v49  ;;  %6291 = vmatpush3.bf16.msra.mxu1 %v6708_v16  ;;  %v2166_v44 = vor.u32 %v2165_v42, %v7673_v47  ;;  %v2181_v38 = vrot.slane %v2179_v4, 5  ;;  %v2185_v16 = vrot.slane %v2183_v63, 4  ;;  %v2189_v49 = vshll.u32 %v7665_v20, 16 }
  0x8b   : > { %6372 = vmatprep.subr.bf16.mxu1 %v7660_v7  ;;  %v2128_v36 = vsel %vm7022_vm2, %v2123_v18, %v7623_v30  ;;  %v2176_v42 = vor.u32 %v2175_v9, %v7675_v55  ;;  %v2197_v43 = vshll.u32 %v5410_v6, 16  ;;  %v9693_v4 = vcombine.low %v7556_v3, %v7559_v56  ;;  %v7713_v18 = vld [vmem:[%s6992_s9 + $0x48] sm:$0xf] }
  0x8c   : > { %v2138_v61 = vsel %vm7022_vm2, %v2133_v58, %v7629_v34  ;;  %v2157_v22 = vrot.slane %v2156_v53, 4  ;;  %v2186_v63 = vor.u32 %v2185_v16, %v2181_v38  ;;  %v2203_v5 = vshll.u32 %v7684_v28, 16  ;;  %v5415_v58 = vld [vmem:[%s6992_s9 + $0x50] sm:$0xf] }
  0x8d   : > { %6213 = vmatmul.mubr.bf16.gmra.mxu1 %v9692_v19  ;;  %v2167_v31 = vrot.slane %v2166_v44, 4  ;;  %v2196_v19 = vrot.slane %v2194_v57, 4  ;;  %v2199_v39 = vrot.slane %v2197_v43, 5  ;;  %v2207_v30 = vshrl.u32 %v7684_v28, 16 }
  0x8e   : > { %6216 = vmatprep.mubr.bf16.mxu1 %v9693_v4  ;;  %v2148_v6 = vsel %vm7022_vm2, %v2143_v33, %v2147_v21  ;;  %v2191_v3 = vrot.slane %v2189_v49, 5  ;;  %v7717_v56 = vrot.slane %v2203_v5, 5  ;;  %v2213_v34 = vshll.u32 %v7691_v13, 16 }
  0x8f   : > { %v9694_v53 = vcombine.low %v7492_v32, %v7500_v26  ;;  %v2177_v44 = vrot.slane %v2176_v42, 4  ;;  %v2187_v9 = vrot.slane %v2186_v63, 4  ;;  %v2209_v16 = vrot.slane %v2207_v30, 4  ;;  %v7752_v63 = vld [vmem:[%s6992_s9 + $0x58] sm:$0xf] }
  0x90   : > { %v2217_v57 = vshrl.u32 %v7691_v13, 16  ;;  %v9695_v21 = vcombine.low %v7516_v35, %v7528_v54  ;;  %v7728_v33 = vcombine.low %v2118_v0, %v2128_v36  ;;  %v2162_v49 = vsel %vm7022_vm2, %v2157_v22, %v7673_v47  ;;  %v7741_v35 = vld [vmem:[%s6992_s9 + $0x4c] sm:$0x1]  ;;  %v7744_v0 = vld [vmem:[%s6992_s9 + $0x54] sm:$0xf] }
  0x91   : > { %6265 = vmatmul.mubr.bf16.gmra.mxu0 %v9694_v53  ;;  %v2223_v32 = vshll.u32 %v7713_v18, 16  ;;  %v2227_v26 = vshrl.u32 %v7713_v18, 16  ;;  %v2172_v42 = vsel %vm7022_vm2, %v2167_v31, %v7675_v55  ;;  %v2200_v43 = vor.u32 %v2199_v39, %v2196_v19  ;;  %v7762_v30 = vld [vmem:[%s6992_s9 + $0x5c] sm:$0xf] }
  0x92   : > { %6268 = vmatprep.mubr.bf16.mxu0 %v9695_v21  ;;  %v7738_v4 = vrot.slane %v2213_v34, 5  ;;  %v2219_v54 = vrot.slane %v2217_v57, 4  ;;  %v7746_v36 = vcombine.low %v2138_v61, %v2148_v6  ;;  %v2210_v47 = vor.u32 %v2209_v16, %v7717_v56 }
  0x93   : > { %v7749_v22 = vrot.slane %v2223_v32, 5  ;;  %v2238_v5 = vshrl.u32 %v5415_v58, 16  ;;  %v9696_v55 = vcombine.low %v7087_v40, %v7110_v1  ;;  %v2182_v39 = vsel %vm7022_vm2, %v2177_v44, %v2181_v38 }
  0x94   : > { %v2192_v31 = vsel %vm7022_vm2, %v2187_v9, %v2191_v3  ;;  %v2229_v19 = vrot.slane %v2227_v26, 4  ;;  %v2241_v61 = vshll.u32 %v5415_v58, 16  ;;  %v9697_v6 = vcombine.low %v7155_v60, %v7163_v8  ;;  %v7783_v26 = vld [vmem:[%s6992_s9 + $0x60] sm:$0x1] }
  0x95   : > { %6217 = vmatmul.mubr.bf16.gmra.mxu1 %v9696_v55  ;;  %v7767_v34 = vcombine.low %v2162_v49, %v2172_v42  ;;  %v2233_v40 = vshll.u32 %v7741_v35, 16  ;;  %v2240_v1 = vrot.slane %v2238_v5, 4  ;;  %v2247_v38 = vshll.u32 %v7744_v0, 16 }
  0x96   : > { %6220 = vmatprep.mubr.bf16.mxu1 %v9697_v6  ;;  %v2201_v53 = vrot.slane %v2200_v43, 4  ;;  %v2220_v3 = vor.u32 %v2219_v54, %v7738_v4  ;;  %v2243_v44 = vrot.slane %v2241_v61, 5  ;;  %v2251_v58 = vshrl.u32 %v7744_v0, 16  ;;  %v5420_v43 = vld [vmem:[%s6992_s9 + $0x64] sm:$0xf] }
  0x97   : > { %v7773_v9 = vcombine.low %v2182_v39, %v2192_v31  ;;  %v2211_v60 = vrot.slane %v2210_v47, 4  ;;  %v7775_v8 = vrot.slane %v2247_v38, 5  ;;  %v2257_v16 = vshll.u32 %v7752_v63, 16 }
  0x98   : > { %v9698_v57 = vcombine.low %v7532_v11, %v7539_v37  ;;  %v2230_v21 = vor.u32 %v2229_v19, %v7749_v22  ;;  %v2244_v49 = vor.u32 %v2243_v44, %v2240_v1  ;;  %v2253_v32 = vrot.slane %v2251_v58, 4  ;;  %v7793_v37 = vld [vmem:[%s6992_s9 + $0x68] sm:$0xf] }
  0x99   : > { %v2261_v42 = vshrl.u32 %v7752_v63, 16  ;;  %v9699_v54 = vcombine.low %v7598_v10, %v7621_v27  ;;  %v2235_v47 = vrot.slane %v2233_v40, 5  ;;  %v2259_v5 = vrot.slane %v2257_v16, 5  ;;  %v7803_v40 = vld [vmem:[%s6992_s9 + $0x6c] sm:$0xf] }
  0x9a   : > { %6269 = vmatmul.mubr.bf16.gmra.mxu0 %v9698_v57  ;;  %v2267_v55 = vshll.u32 %v7762_v30, 16  ;;  %v2271_v11 = vshrl.u32 %v7762_v30, 16  ;;  %v2206_v39 = vsel %vm7022_vm2, %v2201_v53, %v7717_v56  ;;  %v2221_v31 = vrot.slane %v2220_v3, 4 }
  0x9b   : > { %6272 = vmatprep.mubr.bf16.mxu0 %v9699_v54  ;;  %v2254_v19 = vor.u32 %v2253_v32, %v7775_v8  ;;  %v2263_v61 = vrot.slane %v2261_v42, 4  ;;  %v2277_v27 = vshll.u32 %v7783_v26, 16  ;;  %v2282_v1 = vshrl.u32 %v5420_v43, 16 }
  0x9c   : > { %v7799_v6 = vrot.slane %v2267_v55, 5  ;;  %v2273_v10 = vrot.slane %v2271_v11, 4  ;;  %v9700_v38 = vcombine.low %v7167_v14, %v7203_v2  ;;  %v2231_v44 = vrot.slane %v2230_v21, 4  ;;  %v7817_v14 = vld [vmem:[%s6992_s9 + $0x70] sm:$0xf] }
  0x9d   : > { %v2245_v56 = vrot.slane %v2244_v49, 4  ;;  %v2264_v53 = vor.u32 %v2263_v61, %v2259_v5  ;;  %v2285_v3 = vshll.u32 %v5420_v43, 16  ;;  %v9701_v58 = vcombine.low %v7235_v50, %v7241_v59  ;;  %v5425_v59 = vld [vmem:[%s6992_s9 + $0x78] sm:$0xf] }
  0x9e   : > { %6221 = vmatmul.mubr.bf16.gmra.mxu1 %v9700_v38  ;;  %v2216_v16 = vsel %vm7022_vm2, %v2211_v60, %v7738_v4  ;;  %v2255_v57 = vrot.slane %v2254_v19, 4  ;;  %v2274_v32 = vor.u32 %v2273_v10, %v7799_v6  ;;  %v2291_v42 = vshll.u32 %v7793_v37, 16  ;;  %v6710_v61 = vld [vmem:[%s6992_s9 + $0x14] sm:$0xff]  }
  0x9f   : > { %6224 = vmatprep.mubr.bf16.mxu1 %v9701_v58  ;;  %v2226_v2 = vsel %vm7022_vm2, %v2221_v31, %v7749_v22  ;;  %v2284_v21 = vrot.slane %v2282_v1, 4  ;;  %v2287_v49 = vrot.slane %v2285_v3, 5  ;;  %v2295_v50 = vshrl.u32 %v7793_v37, 16 }
  0xa0   : > { %v2265_v43 = vrot.slane %v2264_v53, 4  ;;  %v2279_v54 = vrot.slane %v2277_v27, 5  ;;  %v7824_v4 = vrot.slane %v2291_v42, 5  ;;  %v2301_v60 = vshll.u32 %v7803_v40, 16 }
  0xa1   : > { %v9702_v55 = vcombine.low %v7643_v48, %v7670_v15  ;;  %v2236_v22 = vsel %vm7022_vm2, %v2231_v44, %v2235_v47  ;;  %v2250_v11 = vsel %vm7022_vm2, %v2245_v56, %v7775_v8  ;;  %v2297_v31 = vrot.slane %v2295_v50, 4  ;;  %v7847_v8 = vld [vmem:[%s6992_s9 + $0x74] sm:$0x1]  ;;  %v7850_v56 = vld [vmem:[%s6992_s9 + $0x7c] sm:$0xf] }
  0xa2   : > { %v2305_v19 = vshrl.u32 %v7803_v40, 16  ;;  %v2260_v10 = vsel %vm7022_vm2, %v2255_v57, %v2259_v5  ;;  %v2275_v27 = vrot.slane %v2274_v32, 4  ;;  %v2311_v48 = vshll.u32 %v7817_v14, 16  ;;  %v7866_v32 = vld [vmem:[%s6992_s9 + $0x80] sm:$0xf] }
  0xa3   : > { %6273 = vmatmul.mubr.bf16.gmra.mxu0 %v9702_v55  ;;  %v2315_v15 = vshrl.u32 %v7817_v14, 16  ;;  %v7842_v47 = vcombine.low %v2206_v39, %v2216_v16  ;;  %v2288_v1 = vor.u32 %v2287_v49, %v2284_v21  ;;  %v7844_v38 = vrot.slane %v2301_v60, 5  ;;  %9704 = vst [vmem:[#allocation5_spill] sm:$0xff] %v7866_v32  ;;  %v7876_v50 = vld [vmem:[%s6992_s9 + $0x84] sm:$0xf] }
  0xa4   : > { %6340 = vmatprep.mubr.bf16.mxu0 %v7728_v33  ;;  %v2307_v44 = vrot.slane %v2305_v19, 4  ;;  %v2298_v33 = vor.u32 %v2297_v31, %v7824_v4  ;;  %v7853_v5 = vrot.slane %v2311_v48, 5  ;;  %v2326_v3 = vshrl.u32 %v5425_v59, 16  ;;  %9705 = vst [vmem:[#allocation6_spill] sm:$0xff] %v7876_v50 }
  0xa5   : > { %v2317_v53 = vrot.slane %v2315_v15, 4  ;;  %v9703_v39 = vcombine.low %v7255_v25, %v7285_v17  ;;  %v7858_v58 = vcombine.low %v2226_v2, %v2236_v22  ;;  %v7860_v16 = vcombine.low %v2250_v11, %v2260_v10  ;;  %v6717_v25 = vld [vmem:[%s9670_s1 + $0x1b0] sm:$0xff]   ;;  %v7883_v22 = vld [vmem:[%s6992_s9 + $0x88] sm:$0x1]  ;;  %v5430_v11 = vld [vmem:[%s6992_s9 + $0x8c] sm:$0xf] }
  0xa6   : > { %v2270_v57 = vsel %vm7022_vm2, %v2265_v43, %v7799_v6  ;;  %v2329_v42 = vshll.u32 %v5425_v59, 16  ;;  %v2280_v17 = vsel %vm7022_vm2, %v2275_v27, %v2279_v54  ;;  %v2321_v2 = vshll.u32 %v7847_v8, 16  ;;  %v6711_v6 = vld [vmem:[%s6992_s9 + $0x1c] sm:$0xff]   ;;  %9706 = vst [vmem:[#allocation7_spill] sm:$0xff] %v7883_v22  ;;  %v6714_v54 = vld [vmem:[%s6992_s9 + $0x28] sm:$0xff]  }
  0xa7   : > { %6225 = vmatmul.mubr.bf16.gmra.mxu1 %v9703_v39  ;;  %v2328_v21 = vrot.slane %v2326_v3, 4  ;;  %v2335_v49 = vshll.u32 %v7850_v56, 16  ;;  %v2308_v43 = vor.u32 %v2307_v44, %v7844_v38  ;;  %v2318_v59 = vor.u32 %v2317_v53, %v7853_v5  ;;  %v7899_v53 = vld [vmem:[%s6992_s9 + $0x90] sm:$0xf] }
  0xa8   : > { %6292 = vmatprep.mubr.bf16.mxu1 %v6710_v61  ;;  %v2331_v60 = vrot.slane %v2329_v42, 5  ;;  %v2339_v55 = vshrl.u32 %v7850_v56, 16  ;;  %v7887_v31 = vrot.slane %v2288_v1, 4  ;;  %v7889_v19 = vrot.slane %v2298_v33, 4  ;;  %9707 = vst [vmem:[#allocation8_spill] sm:$0xff] %v7899_v53  ;;  %v6716_v39 = vld [vmem:[%s9670_s1 + $0x170] sm:$0xff]  }
  0xa9   : > { %v7891_v61 = vrot.slane %v2335_v49, 5  ;;  %v2345_v10 = vshll.u32 %v7866_v32, 16  ;;  %v7895_v27 = vcombine.low %v2270_v57, %v2280_v17  ;;  %v2349_v44 = vshrl.u32 %v7866_v32, 16  ;;  %v6721_v17 = vld [vmem:[%s9670_s1 + $0x1a8] sm:$0xff]   ;;  %v7973_v32 = vld [vmem:[%s6992_s9 + $0xa4] sm:$0xf] }
  0xaa   : > { %v2332_v48 = vor.u32 %v2331_v60, %v2328_v21  ;;  %v2341_v15 = vrot.slane %v2339_v55, 4  ;;  %v7903_v1 = vrot.slane %v2321_v2, 5  ;;  %v2355_v3 = vshll.u32 %v7876_v50, 16  ;;  %9709 = vst [vmem:[#allocation10_spill] sm:$0xff] %v7973_v32 }
  0xab   : > { %6341 = vmatmul.mubr.bf16.vlgmr.msra.gmra.mxu0 %v7746_v36  ;;  %v7905_v33 = vrot.slane %v2345_v10, 5  ;;  %v2359_v36 = vshrl.u32 %v7876_v50, 16  ;;  %v7912_v57 = vrot.slane %v2308_v43, 4  ;;  %v7914_v42 = vrot.slane %v2318_v59, 4  ;;  %v7932_v10 = vld [vmem:[%s6992_s9 + $0x94] sm:$0xf] }
  0xac   : > { %6421 = vmatpush3.bf16.msra.mxu0 %v7634_v23  ;;  %6344 = vmatprep.mubr.bf16.mxu0 %v7767_v34  ;;  %v2342_v23 = vor.u32 %v2341_v15, %v7891_v61  ;;  %v2351_v34 = vrot.slane %v2349_v44, 4  ;;  %v7920_v2 = vrot.slane %v2355_v3, 5  ;;  %v2365_v49 = vshll.u32 %v7883_v22, 16  ;;  %v7948_v3 = vld [vmem:[%s6992_s9 + $0x98] sm:$0xf] }
  0xad   : > { %6422 = vmatprep.subr.bf16.mxu0 %v6717_v25  ;;  %v2361_v21 = vrot.slane %v2359_v36, 4  ;;  %v2370_v60 = vshrl.u32 %v5430_v11, 16  ;;  %v2294_v43 = vsel %vm7022_vm2, %v7887_v31, %v7824_v4  ;;  %v2304_v59 = vsel %vm7022_vm2, %v7889_v19, %v7844_v38  ;;  %v6715_v19 = vld [vmem:[%s6992_s9 + $0x30] sm:$0xff]   ;;  %v7951_v36 = vld [vmem:[%s6992_s9 + $0x9c] sm:$0x1] }
  0xae   : > { %v2333_v55 = vrot.slane %v2332_v48, 4  ;;  %v2373_v15 = vshll.u32 %v5430_v11, 16  ;;  %v2343_v4 = vrot.slane %v2342_v23, 4  ;;  %v2352_v31 = vor.u32 %v2351_v34, %v7905_v33  ;;  %9708 = vst [vmem:[#allocation9_spill] sm:$0xff] %v7951_v36  ;;  %v6718_v23 = vld [vmem:[%s6992_s9 + $0x3c] sm:$0xff]  }
  0xaf   : > { %6293 = vmatmul.mubr.bf16.vlgmr.msra.gmra.mxu1 %v6711_v6  ;;  %v6720_v6 = vld [vmem:[%s9670_s1 + $0x168] sm:$0xff]   ;;  %v2372_v44 = vrot.slane %v2370_v60, 4  ;;  %v2379_v38 = vshll.u32 %v7899_v53, 16  ;;  %v2362_v11 = vor.u32 %v2361_v21, %v7920_v2  ;;  %v2383_v48 = vshrl.u32 %v7899_v53, 16  ;;  %v5435_v60 = vld [vmem:[%s6992_s9 + $0xa0] sm:$0xf] }
  0xb0   : > { %6373 = vmatpush3.bf16.msra.mxu1 %v7660_v7  ;;  %6296 = vmatprep.mubr.bf16.mxu1 %v6714_v54  ;;  %v2314_v7 = vsel %vm7022_vm2, %v7912_v57, %v7853_v5  ;;  %v2375_v54 = vrot.slane %v2373_v15, 5  ;;  %v2324_v5 = vsel %vm7022_vm2, %v7914_v42, %v7903_v1  ;;  %v7961_v57 = vrot.slane %v2365_v49, 5  ;;  %v6724_v1 = vld [vmem:[%s9670_s1 + $0x160] sm:$0xff]  }
  0xb1   : > { %6374 = vmatprep.subr.bf16.mxu1 %v6716_v39  ;;  %6423 = vmatpush3.bf16.msra.mxu0 %v6717_v25  ;;  %v6725_v25 = vld [vmem:[%s9670_s1 + $0x1a0] sm:$0xff]   ;;  %v7963_v34 = vrot.slane %v2379_v38, 5  ;;  %v2389_v21 = vshll.u32 %v7932_v10, 16  ;;  %v2338_v15 = vsel %vm7022_vm2, %v2333_v55, %v7891_v61  ;;  %v2385_v22 = vrot.slane %v2383_v48, 4 }
  0xb2   : > { %6424 = vmatprep.subr.bf16.mxu0 %v6721_v17  ;;  %v2376_v53 = vor.u32 %v2375_v54, %v2372_v44  ;;  %v2393_v50 = vshrl.u32 %v7932_v10, 16  ;;  %v7982_v42 = vrot.slane %v2352_v31, 4  ;;  %v2399_v61 = vshll.u32 %v7948_v3, 16 }
  0xb3   : > { %6345 = vmatmul.mubr.bf16.gmra.mxu0 %v7773_v9  ;;  %v2348_v9 = vsel %vm7022_vm2, %v2343_v4, %v7905_v33  ;;  %v2403_v49 = vshrl.u32 %v7948_v3, 16  ;;  %v2386_v55 = vor.u32 %v2385_v22, %v7963_v34  ;;  %v7992_v44 = vrot.slane %v2389_v21, 5  ;;  %v7995_v33 = vld [vmem:[%s6992_s9 + $0xa8] sm:$0xf] }
  0xb4   : > { %6375 = vmatpush3.bf16.msra.mxu1 %v6716_v39  ;;  %6348 = vmatprep.mubr.bf16.mxu0 %v7842_v47  ;;  %v6729_v47 = vld [vmem:[%s9670_s1 + $0x198] sm:$0xff]   ;;  %v7989_v39 = vrot.slane %v2362_v11, 4  ;;  %v2395_v38 = vrot.slane %v2393_v50, 4  ;;  %9710 = vst [vmem:[#allocation11_spill] sm:$0xff] %v7995_v33  ;;  %v7997_v4 = vrot.slane %v2376_v53, 4  ;;  %v7999_v31 = vrot.slane %v2399_v61, 5 }
  0xb5   : > { %6376 = vmatprep.subr.bf16.mxu1 %v6720_v6  ;;  %6425 = vmatpush3.bf16.msra.mxu0 %v6721_v17  ;;  %v2409_v17 = vshll.u32 %v7951_v36, 16  ;;  %v2414_v54 = vshrl.u32 %v5435_v60, 16  ;;  %v8002_v11 = vcombine.low %v2294_v43, %v2304_v59  ;;  %v8004_v48 = vcombine.low %v2314_v7, %v2324_v5  ;;  %v8014_v43 = vld [vmem:[%s6992_s9 + $0xac] sm:$0xf]  ;;  %v6719_v59 = vld [vmem:[%s6992_s9 + $0x44] sm:$0xff]   ;;  %v6728_v7 = vld [vmem:[%s9670_s1 + $0x158] sm:$0xff]  }
  0xb6   : > { %6426 = vmatprep.subr.bf16.mxu0 %v6725_v25  ;;  %v2405_v22 = vrot.slane %v2403_v49, 4  ;;  %v2417_v21 = vshll.u32 %v5435_v60, 16  ;;  %v8006_v50 = vcombine.low %v2338_v15, %v2348_v9  ;;  %v2358_v53 = vsel %vm7022_vm2, %v7982_v42, %v7920_v2  ;;  %9711 = vst [vmem:[#allocation12_spill] sm:$0xff] %v8014_v43  ;;  %v8023_v2 = vld [vmem:[%s6992_s9 + $0xb0] sm:$0x1] }
  0xb7   : > { %6297 = vmatmul.mubr.bf16.gmra.mxu1 %v6715_v19  ;;  %v2416_v61 = vrot.slane %v2414_v54, 4  ;;  %v2423_v19 = vshll.u32 %v7973_v32, 16  ;;  %v2427_v60 = vshrl.u32 %v7973_v32, 16  ;;  %v5480_v15 = vld [vmem:[%s6992_s9 + $0x14] sm:$0xe]  ;;  %v8033_v42 = vrot.slane %v2409_v17, 5 }
  0xb8   : > { %6300 = vmatprep.mubr.bf16.mxu1 %v6718_v23  ;;  %6377 = vmatpush3.bf16.msra.mxu1 %v6720_v6  ;;  %v2387_v6 = vrot.slane %v2386_v55, 4  ;;  %v2396_v23 = vor.u32 %v2395_v38, %v7992_v44  ;;  %v2419_v5 = vrot.slane %v2417_v21, 5  ;;  %v6733_v9 = vld [vmem:[%s9670_s1 + $0x190] sm:$0xff]   ;;  %v2433_v55 = vshll.u32 %v7995_v33, 16 }
  0xb9   : > { %6378 = vmatprep.subr.bf16.mxu1 %v6724_v1  ;;  %6427 = vmatpush3.bf16.msra.mxu0 %v6725_v25  ;;  %v2368_v25 = vsel %vm7022_vm2, %v7989_v39, %v7961_v57  ;;  %v8035_v49 = vrot.slane %v2423_v19, 5  ;;  %v2382_v38 = vsel %vm7022_vm2, %v7997_v4, %v7963_v34  ;;  %v2406_v54 = vor.u32 %v2405_v22, %v7999_v31  ;;  %v6722_v21 = vld [vmem:[%s6992_s9 + $0x50] sm:$0xff]  }
  0xba   : > { %6428 = vmatprep.subr.bf16.mxu0 %v6729_v47  ;;  %v2429_v57 = vrot.slane %v2427_v60, 4  ;;  %v2437_v39 = vshrl.u32 %v7995_v33, 16  ;;  %v6732_v17 = vld [vmem:[%s9670_s1 + $0x150] sm:$0xff]   ;;  %v2420_v19 = vor.u32 %v2419_v5, %v2416_v61  ;;  %v8053_v34 = vrot.slane %v2433_v55, 5 }
  0xbb   : > { %6349 = vmatmul.mubr.bf16.gmra.mxu0 %v7858_v58  ;;  %v6737_v58 = vld [vmem:[%s9670_s1 + $0x188] sm:$0xff]   ;;  %v2443_v4 = vshll.u32 %v8014_v43, 16  ;;  %v2447_v22 = vshrl.u32 %v8014_v43, 16  ;;  %v2453_v5 = vshll.u32 %v8023_v2, 16  ;;  %v5488_v55 = vrot.slane %v5480_v15, 9 }
  0xbc   : > { %6352 = vmatprep.mubr.bf16.mxu0 %v7860_v16  ;;  %6379 = vmatpush3.bf16.msra.mxu1 %v6724_v1  ;;  %v2392_v16 = vsel %vm7022_vm2, %v2387_v6, %v7992_v44  ;;  %v8060_v1 = vrot.slane %v2396_v23, 4  ;;  %v2430_v60 = vor.u32 %v2429_v57, %v8035_v49  ;;  %v2439_v33 = vrot.slane %v2437_v39, 4  ;;  %v5481_v43 = vld [vmem:[%s6992_s9 + $0x28] sm:$0xe] }
  0xbd   : > { %6380 = vmatprep.subr.bf16.mxu1 %v6728_v7  ;;  %6429 = vmatpush3.bf16.msra.mxu0 %v6729_v47  ;;  %v8063_v32 = vrot.slane %v2443_v4, 5  ;;  %v2449_v61 = vrot.slane %v2447_v22, 4  ;;  %v8067_v47 = vcombine.low %v2358_v53, %v2368_v25  ;;  %v8069_v36 = vrot.slane %v2406_v54, 4  ;;  %v6736_v44 = vld [vmem:[%s9670_s1 + $0x148] sm:$0xff]   ;;  %v6741_v53 = vld [vmem:[%s9670_s1 + $0x180] sm:$0xff]   ;;  %v6723_v54 = vld [vmem:[%s6992_s9 + $0x58] sm:$0xff]  }
  0xbe   : > { %6430 = vmatprep.subr.bf16.mxu0 %v6733_v9  ;;  %v2440_v6 = vor.u32 %v2439_v33, %v8053_v34  ;;  %v2829_v23 = vrot.slane %v7548_v41, 5  ;;  %v8076_v57 = vrot.slane %v2420_v19, 4  ;;  %v2835_v25 = vrot.slane %v7570_v52, 5  ;;  %v5482_v22 = vld [vmem:[%s6992_s9 + $0x3c] sm:$0xe] }
  0xbf   : > { %6301 = vmatmul.mubr.bf16.gmra.mxu1 %v6719_v59  ;;  %v2450_v15 = vor.u32 %v2449_v61, %v8063_v32  ;;  %v2832_v59 = vrot.slane %v7567_v12, 5  ;;  %v8085_v33 = vcombine.low %v2382_v38, %v2392_v16  ;;  %v8087_v41 = vrot.slane %v2430_v60, 4  ;;  %v6740_v38 = vld [vmem:[%s9670_s1 + $0x140] sm:$0xff]  }
  0xc0   : > { %6304 = vmatprep.mubr.bf16.mxu1 %v6722_v21  ;;  %6381 = vmatpush3.bf16.msra.mxu1 %v6728_v7  ;;  %v8091_v7 = vsel %vm7314_vm5, %v5488_v55, %v2829_v23  ;;  %v2831_v39 = vrot.slane %v2829_v23, 4  ;;  %v6726_v21 = vld [vmem:[%s6992_s9 + $0x64] sm:$0xff]   ;;  %v8094_v19 = vrot.slane %v2440_v6, 4  ;;  %v8096_v4 = vrot.slane %v2453_v5, 5  ;;  %v8124_v6 = vld [vmem:[%s9670_s1 + $0x238] sm:$0xff]  }
  0xc1   : > { %6382 = vmatprep.subr.bf16.mxu1 %v6732_v17  ;;  %6431 = vmatpush3.bf16.msra.mxu0 %v6733_v9  ;;  %v2834_v12 = vrot.slane %v2832_v59, 4  ;;  %v2837_v52 = vrot.slane %v2835_v25, 4  ;;  %v2402_v9 = vsel %vm7022_vm2, %v8060_v1, %v7999_v31  ;;  %v2838_v60 = vrot.slane %v7604_v62, 5 }
  0xc2   : > { %6432 = vmatprep.subr.bf16.mxu0 %v6737_v58  ;;  %v8109_v16 = vsel %vm7314_vm5, %v2831_v39, %v2832_v59  ;;  %v5489_v61 = vrot.slane %v5481_v43, 9  ;;  %v2842_v62 = vrot.slane %v7613_v45, 5  ;;  %v2848_v23 = vrot.slane %v7654_v51, 5 }
  0xc3   : > { %6353 = vmatmul.mubr.bf16.gmra.mxu0 %v7895_v27  ;;  %v8113_v27 = vrot.slane %v2450_v15, 4  ;;  %v5512_v5 = vcombine.low %v8091_v7, %v8109_v16  ;;  %v8119_v55 = vsel %vm7314_vm5, %v2834_v12, %v2835_v25  ;;  %v8133_v43 = vsel %vm7314_vm5, %v2837_v52, %v2838_v60  ;;  %v6753_v7 = vld [vmem:[%s9670_s1 + $0x228] sm:$0xff]  }
  0xc4   : > { %6356 = vmatprep.mubr.bf16.mxu0 %v8002_v11  ;;  %6383 = vmatpush3.bf16.msra.mxu1 %v6732_v17  ;;  %v2412_v11 = vsel %vm7022_vm2, %v8069_v36, %v8033_v42  ;;  %v2845_v17 = vrot.slane %v7626_v24, 5  ;;  %v5513_v45 = vcombine.low %v8119_v55, %v8133_v43  ;;  %v8141_v15 = vsel %vm7314_vm5, %v5489_v61, %v2842_v62  ;;  %v5483_v24 = vld [vmem:[%s6992_s9 + $0x50] sm:$0xe]  ;;  %v8371_v16 = vld [vmem:[%s6992_s9 + $0x2c] sm:$0xf] }
  0xc5   : > { %6384 = vmatprep.subr.bf16.mxu1 %v6736_v44  ;;  %6433 = vmatpush3.bf16.msra.mxu0 %v6737_v58  ;;  %v2844_v59 = vrot.slane %v2842_v62, 4  ;;  %v2851_v25 = vrot.slane %v7665_v20, 5  ;;  %v2850_v39 = vrot.slane %v2848_v23, 4  ;;  %v5490_v12 = vrot.slane %v5482_v22, 9  ;;  %v6727_v62 = vld [vmem:[%s6992_s9 + $0x6c] sm:$0xff]  }
  0xc6   : > { %6434 = vmatprep.subr.bf16.mxu0 %v6741_v53  ;;  %v2847_v58 = vrot.slane %v2845_v17, 4  ;;  %v2855_v52 = vrot.slane %v7684_v28, 5  ;;  %v2858_v60 = vrot.slane %v7691_v13, 5  ;;  %v2861_v61 = vrot.slane %v7713_v18, 5  ;;  %v8156_v28 = vld [vmem:[%s9670_s1 + $0x1f8] sm:$0xff]  }
  0xc7   : > { %6305 = vmatmul.mubr.bf16.gmra.mxu1 %v6723_v54  ;;  %v8148_v51 = vsel %vm7314_vm5, %v2844_v59, %v2845_v17  ;;  %v2864_v20 = vrot.slane %v7741_v35, 5  ;;  %v8166_v13 = vsel %vm7314_vm5, %v2850_v39, %v2851_v25  ;;  %v2868_v59 = vrot.slane %v7744_v0, 5 }
  0xc8   : > { %6308 = vmatprep.mubr.bf16.mxu1 %v6726_v21  ;;  %6385 = vmatpush3.bf16.msra.mxu1 %v6736_v44  ;;  %v5514_v44 = vcombine.low %v8141_v15, %v8148_v51  ;;  %v8162_v54 = vsel %vm7314_vm5, %v2847_v58, %v2848_v23  ;;  %v2857_v18 = vrot.slane %v2855_v52, 4  ;;  %v2860_v21 = vrot.slane %v2858_v60, 4  ;;  %v6730_v58 = vld [vmem:[%s6992_s9 + $0x78] sm:$0xff]   ;;  %v6757_v15 = vld [vmem:[%s9670_s1 + $0x220] sm:$0xff]  }
  0xc9   : > { %6386 = vmatprep.subr.bf16.mxu1 %v6740_v38  ;;  %6435 = vmatpush3.bf16.msra.mxu0 %v6741_v53  ;;  %v5515_v35 = vcombine.low %v8162_v54, %v8166_v13  ;;  %v8173_v53 = vsel %vm7314_vm5, %v5490_v12, %v2855_v52  ;;  %v2863_v22 = vrot.slane %v2861_v61, 4  ;;  %v5491_v23 = vrot.slane %v5483_v24, 9  ;;  %v5484_v24 = vld [vmem:[%s6992_s9 + $0x64] sm:$0xe]  ;;  %v6760_v54 = vld [vmem:[%s9670_s1 + $0x1d8] sm:$0xff]  }
  0xca   : > { %6516 = vmatprep.subr.bf16.mxu0 %v8124_v6  ;;  %v8179_v17 = vsel %vm7314_vm5, %v2857_v18, %v2858_v60  ;;  %v2871_v25 = vrot.slane %v7752_v63, 5  ;;  %v2874_v52 = vrot.slane %v7762_v30, 5  ;;  %v5492_v18 = vrot.slane %v5484_v24, 9 }
  0xcb   : > { %6357 = vmatmul.mubr.bf16.gmra.mxu0 %v8004_v48  ;;  %v5516_v39 = vcombine.low %v8173_v53, %v8179_v17  ;;  %v8189_v48 = vsel %vm7314_vm5, %v2860_v21, %v2861_v61  ;;  %v8193_v12 = vsel %vm7314_vm5, %v2863_v22, %v2864_v20  ;;  %v8201_v63 = vsel %vm7314_vm5, %v5491_v23, %v2868_v59 }
  0xcc   : > { %6360 = vmatprep.mubr.bf16.mxu0 %v8006_v50  ;;  %6387 = vmatpush3.bf16.msra.mxu1 %v6740_v38  ;;  %v5517_v0 = vcombine.low %v8189_v48, %v8193_v12  ;;  %v2870_v50 = vrot.slane %v2868_v59, 4  ;;  %v2873_v38 = vrot.slane %v2871_v25, 4  ;;  %v2876_v60 = vrot.slane %v2874_v52, 4 }
  0xcd   : > { %6468 = vmatprep.subr.bf16.mxu1 %v8156_v28  ;;  %v2877_v61 = vrot.slane %v7783_v26, 5  ;;  %v2881_v20 = vrot.slane %v7793_v37, 5  ;;  %v2884_v22 = vrot.slane %v7803_v40, 5  ;;  %v2887_v23 = vrot.slane %v7817_v14, 5 }
  0xce   : > { %v8208_v30 = vsel %vm7314_vm5, %v2870_v50, %v2871_v25  ;;  %v8212_v21 = vsel %vm7314_vm5, %v2873_v38, %v2874_v52  ;;  %v2890_v14 = vrot.slane %v7847_v8, 5  ;;  %v5485_v38 = vld [vmem:[%s6992_s9 + $0x78] sm:$0xe]  ;;  %v2894_v24 = vrot.slane %v7850_v56, 5 }
  0xcf   : > { %6309 = vmatmul.mubr.bf16.gmra.mxu1 %v6727_v62  ;;  %v8220_v37 = vsel %vm7314_vm5, %v2876_v60, %v2877_v61  ;;  %v8224_v62 = vsel %vm7314_vm5, %v5492_v18, %v2881_v20  ;;  %v2883_v59 = vrot.slane %v2881_v20, 4  ;;  %v2886_v25 = vrot.slane %v2884_v22, 4  ;;  %v9712_v60 = vld [vmem:[#allocation5_spill] sm:$0xff] }
  0xd0   : > { %6312 = vmatprep.mubr.bf16.mxu1 %v6730_v58  ;;  %v2889_v52 = vrot.slane %v2887_v23, 4  ;;  %v2426_v58 = vsel %vm7022_vm2, %v8076_v57, %v8035_v49  ;;  %v2897_v61 = vrot.slane %v9712_v60, 5  ;;  %v6731_v18 = vld [vmem:[%s6992_s9 + $0x80] sm:$0xff]   ;;  %v5493_v57 = vrot.slane %v5485_v38, 9  ;;  %v9713_v60 = vld [vmem:[#allocation6_spill] sm:$0xff] }
  0xd1   : > { %v8235_v50 = vsel %vm7314_vm5, %v2883_v59, %v2884_v22  ;;  %v8246_v20 = vsel %vm7314_vm5, %v2886_v25, %v2887_v23  ;;  %v6734_v22 = vld [vmem:[%s6992_s9 + $0x8c] sm:$0xff]   ;;  %v2900_v8 = vrot.slane %v9713_v60, 5  ;;  %v2436_v23 = vsel %vm7022_vm2, %v8087_v41, %v8053_v34 }
  0xd2   : > { %v8250_v49 = vsel %vm7314_vm5, %v2889_v52, %v2890_v14  ;;  %v2899_v59 = vrot.slane %v2897_v61, 4  ;;  %v8263_v25 = vsel %vm7314_vm5, %v5493_v57, %v2894_v24  ;;  %v9714_v52 = vld [vmem:[#allocation7_spill] sm:$0xff]  ;;  %v2910_v26 = vrot.slane %v7932_v10, 5  ;;  %v9717_v57 = vld [vmem:[#allocation10_spill] sm:$0xff] }
  0xd3   : > { %6361 = vmatmul.mubr.bf16.gmra.mxu0 %v8067_v47  ;;  %v2896_v47 = vrot.slane %v2894_v24, 4  ;;  %v2903_v14 = vrot.slane %v9714_v52, 5  ;;  %v2902_v40 = vrot.slane %v2900_v8, 4  ;;  %v5469_v34 = vcombine.low %v2402_v9, %v2412_v11  ;;  %v5486_v24 = vld [vmem:[%s6992_s9 + $0x8c] sm:$0xe]  ;;  %v9716_v11 = vld [vmem:[#allocation9_spill] sm:$0xff] }
  0xd4   : > { %6364 = vmatprep.mubr.bf16.mxu0 %v8085_v33  ;;  %v9715_v33 = vld [vmem:[#allocation8_spill] sm:$0xff]  ;;  %v8273_v60 = vsel %vm7314_vm5, %v2899_v59, %v2900_v8  ;;  %v2913_v10 = vrot.slane %v7948_v3, 5  ;;  %v5494_v42 = vrot.slane %v5486_v24, 9  ;;  %v2912_v8 = vrot.slane %v2910_v26, 4  ;;  %v5487_v24 = vld [vmem:[%s6992_s9 + $0xa0] sm:$0xe] }
  0xd5   : > { %v2907_v38 = vrot.slane %v9715_v33, 5  ;;  %v8269_v56 = vsel %vm7314_vm5, %v2896_v47, %v2897_v61  ;;  %v8292_v36 = vsel %vm7314_vm5, %v2902_v40, %v2903_v14  ;;  %v2916_v3 = vrot.slane %v9716_v11, 5  ;;  %v6735_v47 = vld [vmem:[%s6992_s9 + $0x94] sm:$0xff]   ;;  %v6738_v14 = vld [vmem:[%s6992_s9 + $0xa0] sm:$0xff]  }
  0xd6   : > { %v2915_v9 = vrot.slane %v2913_v10, 4  ;;  %v8307_v40 = vsel %vm7314_vm5, %v2912_v8, %v2913_v10  ;;  %v2446_v33 = vsel %vm7022_vm2, %v8094_v19, %v8063_v32  ;;  %v5495_v10 = vrot.slane %v5487_v24, 9 }
  0xd7   : > { %6313 = vmatmul.mubr.bf16.gmra.mxu1 %v6731_v18  ;;  %v2909_v61 = vrot.slane %v2907_v38, 4  ;;  %v5470_v18 = vcombine.low %v2426_v58, %v2436_v23  ;;  %v8303_v58 = vsel %vm7314_vm5, %v5494_v42, %v2907_v38  ;;  %v9718_v23 = vld [vmem:[#allocation11_spill] sm:$0xff]  ;;  %v2456_v38 = vsel %vm7022_vm2, %v8113_v27, %v8096_v4 }
  0xd8   : > { %6316 = vmatprep.mubr.bf16.mxu1 %v6734_v22  ;;  %v2920_v22 = vrot.slane %v9717_v57, 5  ;;  %v8315_v59 = vsel %vm7314_vm5, %v2915_v9, %v2916_v3  ;;  %v2923_v52 = vrot.slane %v9718_v23, 5  ;;  %v2929_v9 = vrot.slane %v8023_v2, 5  ;;  %v6742_v2 = vld [vmem:[%s6992_s9 + $0x28] sm:$0xff]   ;;  %v6743_v23 = vld [vmem:[%s6992_s9 + $0x30] sm:$0xff]  }
  0xd9   : > { %v8298_v1 = vsel %vm7314_vm5, %v2909_v61, %v2910_v26  ;;  %v5471_v19 = vcombine.low %v2446_v33, %v2456_v38  ;;  %v5610_v33 = vld [vmem:[%s6992_s9 + $0x28] sm:$0xf]  ;;  %v6748_v38 = vld [vmem:[%s9670_s1 + $0x1f0] sm:$0xff]   ;;  %v3697_v55 = vshrl.u32 %v8371_v16, 16 }
  0xda   : > { %v2922_v61 = vrot.slane %v2920_v22, 4  ;;  %v2925_v42 = vrot.slane %v2923_v52, 4  ;;  %v8338_v4 = vsel %vm7314_vm5, %v5495_v10, %v2920_v22  ;;  %v6739_v22 = vld [vmem:[%s6992_s9 + $0xa8] sm:$0xff]   ;;  %v3684_v24 = vshrl.u32 %v5610_v33, 16  ;;  %v6750_v10 = vld [vmem:[%s6992_s9 + $0x50] sm:$0xff]  }
  0xdb   : > { %6365 = vmatmul.mubr.bf16.gmra.mxu0 %v5469_v34 }
  0xdc   : > { %6368 = vmatprep.mubr.bf16.mxu0 %v5470_v18  ;;  %v9719_v18 = vld [vmem:[#allocation12_spill] sm:$0xff]  ;;  %v8334_v32 = vsel %vm7314_vm5, %v2922_v61, %v2923_v52  ;;  %v3687_v61 = vshll.u32 %v5610_v33, 16  ;;  %v3686_v51 = vrot.slane %v3684_v24, 4  ;;  %v5690_v24 = vld [vmem:[%s6992_s9 + $0x28] sm:$0xe] }
  0xdd   : > { %v2926_v8 = vrot.slane %v9719_v18, 5  ;;  %v6746_v52 = vld [vmem:[%s6992_s9 + $0x3c] sm:$0xff]   ;;  %v6752_v18 = vld [vmem:[%s9670_s1 + $0x1e8] sm:$0xff]  }
  0xde   : > { %v6751_v33 = vld [vmem:[%s6992_s9 + $0x58] sm:$0xff]  }
  0xdf   : > { %6317 = vmatmul.mubr.bf16.gmra.mxu1 %v6735_v47  ;;  %v8342_v27 = vsel %vm7314_vm5, %v2925_v42, %v2926_v8  ;;  %v2928_v11 = vrot.slane %v2926_v8, 4  ;;  %v8386_v42 = vld [vmem:[%s6992_s9 + $0x34] sm:$0xf]  ;;  %v3693_v8 = vshll.u32 %v8371_v16, 16 }
  0xe0   : > { %6320 = vmatprep.mubr.bf16.mxu1 %v6738_v14  ;;  %v6749_v14 = vld [vmem:[%s9670_s1 + $0x230] sm:$0xff]  }
  0xe1   : > { %v8349_v57 = vsel %vm7314_vm5, %v2928_v11, %v2929_v9  ;;  %v3717_v9 = vshrl.u32 %v8386_v42, 16  ;;  %v8403_v11 = vrot.slane %v3693_v8, 5  ;;  %v8424_v8 = vld [vmem:[%s6992_s9 + $0x40] sm:$0xf] }
  0xe3   : > { %6369 = vmatmul.mubr.bf16.gmra.mxu0 %v5471_v19  ;;  %v6756_v19 = vld [vmem:[%s9670_s1 + $0x1e0] sm:$0xff]  }
  0xe4   : > { %6436 = vmatprep.mubr.bf16.mxu0 %v6742_v2  ;;  %v3699_v2 = vrot.slane %v3697_v55, 4  ;;  %v5698_v55 = vrot.slane %v5690_v24, 9  ;;  %v5614_v24 = vld [vmem:[%s6992_s9 + $0x38] sm:$0x1] }
  0xe5   : > { %v4416_v12 = vrot.slane %v5614_v24, 5 }
  0xe6   : > { %v3700_v13 = vor.u32 %v3699_v2, %v8403_v11 }
  0xe7   : > { %6321 = vmatmul.mubr.bf16.gmra.mxu1 %v6739_v22 }
  0xe8   : > { %6388 = vmatprep.mubr.bf16.mxu1 %v5512_v5  ;;  %v8374_v5 = vld [vmem:[%s6992_s9 + $0x30] sm:$0xf] }
  0xe9   : > { %v3703_v43 = vshll.u32 %v8374_v5, 16  ;;  %v4410_v53 = vrot.slane %v8374_v5, 5 }
  0xeb   : > { %6437 = vmatmul.mubr.bf16.vlgmr.msra.gmra.mxu0 %v6743_v23  ;;  %v8405_v22 = vrot.slane %v3703_v43, 5  ;;  %v4413_v43 = vrot.slane %v8386_v42, 5 }
  0xec   : > { %6517 = vmatpush3.bf16.msra.mxu0 %v8124_v6  ;;  %6440 = vmatprep.mubr.bf16.mxu0 %v6746_v52  ;;  %v6747_v6 = vld [vmem:[%s6992_s9 + $0x44] sm:$0xff]   ;;  %v6761_v52 = vld [vmem:[%s9670_s1 + $0x218] sm:$0xff]  }
  0xed   : > { %6518 = vmatprep.subr.bf16.mxu0 %v6749_v14 }
  0xef   : > { %6389 = vmatmul.mubr.bf16.vlgmr.msra.gmra.mxu1 %v5513_v45  ;;  %v3707_v45 = vshrl.u32 %v8374_v5, 16 }
  0xf0   : > { %6469 = vmatpush3.bf16.msra.mxu1 %v8156_v28  ;;  %6392 = vmatprep.mubr.bf16.mxu1 %v5514_v44  ;;  %v3689_v28 = vrot.slane %v3687_v61, 5  ;;  %v3713_v44 = vshll.u32 %v8386_v42, 16  ;;  %v3719_v61 = vrot.slane %v3717_v9, 4  ;;  %v6764_v42 = vld [vmem:[%s9670_s1 + $0x1d0] sm:$0xff]  }
  0xf1   : > { %6470 = vmatprep.subr.bf16.mxu1 %v6748_v38  ;;  %6519 = vmatpush3.bf16.msra.mxu0 %v6749_v14  ;;  %v3709_v23 = vrot.slane %v3707_v45, 4  ;;  %v8443_v45 = vld [vmem:[%s6992_s9 + $0x44] sm:$0xf] }
  0xf2   : > { %6520 = vmatprep.subr.bf16.mxu0 %v6753_v7  ;;  %v3690_v14 = vor.u32 %v3689_v28, %v3686_v51  ;;  %v3737_v51 = vshll.u32 %v8424_v8, 16  ;;  %v3741_v28 = vshrl.u32 %v8424_v8, 16  ;;  %v3751_v3 = vshrl.u32 %v8443_v45, 16 }
  0xf3   : > { %6441 = vmatmul.mubr.bf16.gmra.mxu0 %v6747_v6  ;;  %v4407_v6 = vrot.slane %v8371_v16, 5  ;;  %v6765_v16 = vld [vmem:[%s9670_s1 + $0x210] sm:$0xff]  }
  0xf4   : > { %6471 = vmatpush3.bf16.msra.mxu1 %v6748_v38  ;;  %6444 = vmatprep.mubr.bf16.mxu0 %v6750_v10  ;;  %v6754_v38 = vld [vmem:[%s6992_s9 + $0x64] sm:$0xff]   ;;  %v5615_v10 = vld [vmem:[%s6992_s9 + $0x3c] sm:$0xf]  ;;  %v8477_v31 = vrot.slane %v3737_v51, 5  ;;  %v3743_v41 = vrot.slane %v3741_v28, 4 }
  0xf5   : > { %6472 = vmatprep.subr.bf16.mxu1 %v6752_v18  ;;  %6521 = vmatpush3.bf16.msra.mxu0 %v6753_v7  ;;  %v8415_v7 = vrot.slane %v3713_v44, 5  ;;  %v3731_v5 = vshll.u32 %v5615_v10, 16  ;;  %v5691_v28 = vld [vmem:[%s6992_s9 + $0x3c] sm:$0xe] }
  0xf6   : > { %6522 = vmatprep.subr.bf16.mxu0 %v6757_v15 }
  0xf7   : > { %6393 = vmatmul.mubr.bf16.gmra.mxu1 %v5515_v35  ;;  %v3710_v35 = vor.u32 %v3709_v23, %v8405_v22  ;;  %v8432_v17 = vpop.f32.mrf.mxu0  ;;  %v3720_v2 = vor.u32 %v3719_v61, %v8415_v7  ;;  %v4409_v23 = vrot.slane %v4407_v6, 4  ;;  %v6769_v61 = vld [vmem:[%s9670_s1 + $0x208] sm:$0xff]   ;;  %v3733_v26 = vrot.slane %v3731_v5, 5  ;;  %v5620_v5 = vld [vmem:[%s6992_s9 + $0x50] sm:$0xf] }
  0xf8   : > { %6396 = vmatprep.mubr.bf16.mxu1 %v5516_v39  ;;  %6473 = vmatpush3.bf16.msra.mxu1 %v6752_v18  ;;  %v8434_v39 = vpop.f32.mrf.mxu1  ;;  %v8439_v18 = vrot.slane %v3690_v14, 4  ;;  %v3701_v14 = vrot.slane %v3700_v13, 4  ;;  %v8471_v13 = vsel %vm7314_vm5, %v5698_v55, %v4407_v6  ;;  %v6758_v6 = vld [vmem:[%s6992_s9 + $0x78] sm:$0xff]  }
  0xf9   : > { %6474 = vmatprep.subr.bf16.mxu1 %v6756_v19  ;;  %6523 = vmatpush3.bf16.msra.mxu0 %v6757_v15  ;;  %9720 = vst [vmem:[#allocation5_spill] sm:$0xff] %v8434_v39  ;;  %v3728_v15 = vshrl.u32 %v5615_v10, 16  ;;  %v8447_v44 = vpop.f32.mrf.mxu0  ;;  %v6755_v10 = vld [vmem:[%s6992_s9 + $0x6c] sm:$0xff]   ;;  %v8492_v48 = vsel %vm7314_vm5, %v4409_v23, %v4410_v53  ;;  %v4420_v23 = vrot.slane %v8424_v8, 5  ;;  %v8553_v8 = vld [vmem:[%s6992_s9 + $0x58] sm:$0xf] }
  0xfa   : > { %6524 = vmatprep.subr.bf16.mxu0 %v6761_v52  ;;  %v8449_v9 = vpop.f32.mrf.mxu1 }
  0xfb   : > { %6445 = vmatmul.mubr.bf16.gmra.mxu0 %v6751_v33  ;;  %9721 = vst [vmem:[#allocation6_spill] sm:$0xff] %v8449_v9  ;;  %v8455_v33 = vrot.slane %v3710_v35, 4  ;;  %v8460_v47 = vpop.f32.mrf.mxu0  ;;  %v4415_v35 = vrot.slane %v4413_v43, 4  ;;  %v3730_v34 = vrot.slane %v3728_v15, 4  ;;  %v8480_v9 = vld [vmem:[%s6992_s9 + $0x48] sm:$0xf] }
  0xfc   : > { %6448 = vmatprep.mubr.bf16.mxu0 %v6754_v38  ;;  %6475 = vmatpush3.bf16.msra.mxu1 %v6756_v19  ;;  %v4412_v38 = vrot.slane %v4410_v53, 4  ;;  %v3747_v19 = vshll.u32 %v8443_v45, 16  ;;  %9722 = vst [vmem:[#allocation7_spill] sm:$0xff] %v8460_v47  ;;  %v3723_v15 = vshll.u32 %v5614_v24, 16  ;;  %v3757_v24 = vshll.u32 %v8480_v9, 16 }
  0xfd   : > { %6476 = vmatprep.subr.bf16.mxu1 %v6760_v54  ;;  %6525 = vmatpush3.bf16.msra.mxu0 %v6761_v52  ;;  %v3696_v52 = vsel %vm7022_vm2, %v8439_v18, %v8403_v11  ;;  %v9723_v11 = vcombine.low %v8201_v63, %v8208_v30  ;;  %v8486_v18 = vpop.f32.mrf.mxu1  ;;  %v8488_v55 = vpop.f32.mrf.mxu0  ;;  %v6768_v63 = vld [vmem:[%s9670_s1 + $0x1c8] sm:$0xff]   ;;  %v6773_v30 = vld [vmem:[%s9670_s1 + $0x200] sm:$0xff]   ;;  %v3744_v53 = vor.u32 %v3743_v41, %v8477_v31 }
  0xfe   : > { %6526 = vmatprep.subr.bf16.mxu0 %v6765_v16  ;;  %9724 = vst [vmem:[#allocation8_spill] sm:$0xff] %v8486_v18  ;;  %9725 = vst [vmem:[#allocation9_spill] sm:$0xff] %v8488_v55  ;;  %v8514_v51 = vrot.slane %v3747_v19, 5  ;;  %v3772_v18 = vshrl.u32 %v5620_v5, 16  ;;  %v3725_v39 = vrot.slane %v3723_v15, 5  ;;  %v6772_v41 = vld [vmem:[%s9670_s1 + $0x1c0] sm:$0xff]   ;;  %v9729_v55 = vcombine.low %v8224_v62, %v8235_v50 }
  0xff   : > { %6397 = vmatmul.mubr.bf16.gmra.mxu1 %v5517_v0  ;;  %v8494_v0 = vrot.slane %v3720_v2, 4  ;;  %v3753_v2 = vrot.slane %v3751_v3, 4  ;;  %v4422_v15 = vrot.slane %v4420_v23, 4  ;;  %v4426_v62 = vrot.slane %v8480_v9, 5 }
 0x100   : > { %6400 = vmatprep.mubr.bf16.mxu1 %v9723_v11  ;;  %6477 = vmatpush3.bf16.msra.mxu1 %v6760_v54  ;;  %v3706_v54 = vsel %vm7022_vm2, %v3701_v14, %v8405_v22  ;;  %v3761_v22 = vshrl.u32 %v8480_v9, 16  ;;  %v8521_v14 = vld [vmem:[%s6992_s9 + $0x54] sm:$0xf]  ;;  %v3734_v11 = vor.u32 %v3733_v26, %v3730_v34  ;;  %v8537_v26 = vsel %vm7314_vm5, %v4415_v35, %v4416_v12 }
 0x101   : > { %6478 = vmatprep.subr.bf16.mxu1 %v6764_v42  ;;  %6527 = vmatpush3.bf16.msra.mxu0 %v6765_v16  ;;  %v8512_v16 = vsel %vm7314_vm5, %v4412_v38, %v4413_v43  ;;  %v3775_v43 = vshll.u32 %v5620_v5, 16  ;;  %v8524_v38 = vpop.f32.mrf.mxu1  ;;  %v8528_v3 = vcombine.low %v3696_v52, %v3706_v54  ;;  %v4423_v34 = vrot.slane %v8443_v45, 5  ;;  %v8545_v5 = vld [vmem:[%s6992_s9 + $0x4c] sm:$0x1] }
 0x102   : > { %6528 = vmatprep.subr.bf16.mxu0 %v6769_v61  ;;  %9726 = vst [vmem:[#allocation10_spill] sm:$0xff] %v8524_v38  ;;  %v8526_v19 = vpop.f32.mrf.mxu0  ;;  %v3785_v52 = vshrl.u32 %v8521_v14, 16  ;;  %v8547_v54 = vrot.slane %v3757_v24, 5  ;;  %v9728_v35 = vcombine.low %v8212_v21, %v8220_v37  ;;  %v3735_v45 = vrot.slane %v3734_v11, 4 }
 0x103   : > { %6449 = vmatmul.mubr.bf16.gmra.mxu0 %v6755_v10  ;;  %9727 = vst [vmem:[#allocation11_spill] sm:$0xff] %v8526_v19  ;;  %v5699_v10 = vrot.slane %v5691_v28, 9  ;;  %v3763_v28 = vrot.slane %v3761_v22, 4  ;;  %v3745_v12 = vrot.slane %v3744_v53, 4  ;;  %v3774_v38 = vrot.slane %v3772_v18, 4 }
 0x104   : > { %6452 = vmatprep.mubr.bf16.mxu0 %v6758_v6  ;;  %6479 = vmatpush3.bf16.msra.mxu1 %v6764_v42  ;;  %v3781_v42 = vshll.u32 %v8521_v14, 16  ;;  %v6759_v6 = vld [vmem:[%s6992_s9 + $0x80] sm:$0xff]   ;;  %v3777_v19 = vrot.slane %v3775_v43, 5  ;;  %v8561_v24 = vpop.f32.mrf.mxu0  ;;  %v3726_v37 = vsel %vm7022_vm2, %v8494_v0, %v3725_v39  ;;  %v4425_v50 = vrot.slane %v4423_v34, 4  ;;  %v8577_v22 = vld [vmem:[%s6992_s9 + $0x5c] sm:$0xf] }
 0x105   : > { %6480 = vmatprep.subr.bf16.mxu1 %v6768_v63  ;;  %6529 = vmatpush3.bf16.msra.mxu0 %v6769_v61  ;;  %v3754_v61 = vor.u32 %v3753_v2, %v8514_v51  ;;  %v6762_v2 = vld [vmem:[%s6992_s9 + $0x8c] sm:$0xff]   ;;  %v8559_v47 = vpop.f32.mrf.mxu1  ;;  %9731 = vst [vmem:[#allocation13_spill] sm:$0xff] %v8561_v24  ;;  %v8570_v18 = vsel %vm7314_vm5, %v5699_v10, %v4420_v23  ;;  %v3791_v0 = vshll.u32 %v8553_v8, 16  ;;  %v3795_v9 = vshrl.u32 %v8553_v8, 16 }
 0x106   : > { %6530 = vmatprep.subr.bf16.mxu0 %v6773_v30  ;;  %9730 = vst [vmem:[#allocation12_spill] sm:$0xff] %v8559_v47  ;;  %v8574_v53 = vrot.slane %v3781_v42, 5  ;;  %v8581_v11 = vsel %vm7314_vm5, %v4422_v15, %v4423_v34  ;;  %v3764_v39 = vor.u32 %v3763_v28, %v8547_v54  ;;  %v3750_v23 = vsel %vm7022_vm2, %v3745_v12, %v8514_v51  ;;  %v8596_v42 = vpop.f32.mrf.mxu0 }
 0x107   : > { %6401 = vmatmul.mubr.bf16.gmra.mxu1 %v9728_v35  ;;  %v8592_v43 = vrot.slane %v3754_v61, 4  ;;  %v3778_v10 = vor.u32 %v3777_v19, %v3774_v38  ;;  %v8594_v34 = vpop.f32.mrf.mxu1  ;;  %9733 = vst [vmem:[#allocation15_spill] sm:$0xff] %v8596_v42  ;;  %v3805_v15 = vshrl.u32 %v8577_v22, 16  ;;  %v9734_v51 = vsel %vm7022_vm2, %v8455_v33, %v8415_v7  ;;  %v5625_v7 = vld [vmem:[%s6992_s9 + $0x64] sm:$0xf] }
 0x108   : > { %6404 = vmatprep.mubr.bf16.mxu1 %v9729_v55  ;;  %6481 = vmatpush3.bf16.msra.mxu1 %v6768_v63  ;;  %v3767_v55 = vshll.u32 %v8545_v5, 16  ;;  %v3787_v63 = vrot.slane %v3785_v52, 4  ;;  %9732 = vst [vmem:[#allocation14_spill] sm:$0xff] %v8594_v34  ;;  %v4428_v52 = vrot.slane %v4426_v62, 4  ;;  %v8606_v38 = vcombine.low %v9734_v51, %v3726_v37 }
 0x109   : > { %6482 = vmatprep.subr.bf16.mxu1 %v6772_v41  ;;  %6531 = vmatpush3.bf16.msra.mxu0 %v6773_v30  ;;  %v3740_v30 = vsel %vm7022_vm2, %v3735_v45, %v8477_v31  ;;  %v3801_v31 = vshll.u32 %v8577_v22, 16  ;;  %v8614_v28 = vrot.slane %v3764_v39, 4  ;;  %v8616_v35 = vrot.slane %v3791_v0, 5  ;;  %v8635_v39 = vld [vmem:[%s6992_s9 + $0x60] sm:$0x1]  ;;  %v8642_v0 = vpop.f32.mrf.mxu0 }
 0x10a   : > { %v3788_v61 = vor.u32 %v3787_v63, %v8574_v53  ;;  %v3797_v45 = vrot.slane %v3795_v9, 4  ;;  %v4433_v12 = vrot.slane %v8521_v14, 5  ;;  %v9735_v33 = vcombine.low %v8246_v20, %v8250_v49  ;;  %v8640_v49 = vpop.f32.mrf.mxu1  ;;  %9738 = vst [vmem:[#allocation17_spill] sm:$0xff] %v8642_v0  ;;  %v6766_v9 = vld [vmem:[%s6992_s9 + $0xa0] sm:$0xff]  }
 0x10b   : > { %6453 = vmatmul.mubr.bf16.gmra.mxu0 %v6759_v6  ;;  %v4429_v6 = vrot.slane %v8545_v5, 5  ;;  %v5692_v5 = vld [vmem:[%s6992_s9 + $0x50] sm:$0xe]  ;;  %v8624_v37 = vcombine.low %v3740_v30, %v3750_v23  ;;  %v8632_v63 = vsel %vm7314_vm5, %v4425_v50, %v4426_v62  ;;  %v3779_v14 = vrot.slane %v3778_v10, 4  ;;  %9737 = vst [vmem:[#allocation16_spill] sm:$0xff] %v8640_v49  ;;  %v6767_v49 = vld [vmem:[%s6992_s9 + $0xa8] sm:$0xff]  }
 0x10c   : > { %6456 = vmatprep.mubr.bf16.mxu0 %v6762_v2  ;;  %6483 = vmatpush3.bf16.msra.mxu1 %v6772_v41  ;;  %v8610_v41 = vrot.slane %v3767_v55, 5  ;;  %v6763_v2 = vld [vmem:[%s6992_s9 + $0x94] sm:$0xff]   ;;  %v3760_v55 = vsel %vm7022_vm2, %v8592_v43, %v8547_v54  ;;  %v9736_v20 = vcombine.low %v8263_v25, %v8269_v56  ;;  %v5700_v54 = vrot.slane %v5692_v5, 9  ;;  %v8652_v50 = vld [vmem:[%s6992_s9 + $0x68] sm:$0xf] }
 0x10d   : > { %v8647_v30 = vsel %vm7314_vm5, %v4428_v52, %v4429_v6  ;;  %v8649_v23 = vrot.slane %v3801_v31, 5  ;;  %v3807_v62 = vrot.slane %v3805_v15, 4  ;;  %v3789_v43 = vrot.slane %v3788_v61, 4  ;;  %v8656_v56 = vld [vmem:[%s6992_s9 + $0x6c] sm:$0xf] }
 0x10e   : > { %v4436_v10 = vrot.slane %v8553_v8, 5  ;;  %v3816_v25 = vshrl.u32 %v5625_v7, 16  ;;  %v3819_v51 = vshll.u32 %v5625_v7, 16  ;;  %v3798_v52 = vor.u32 %v3797_v45, %v8616_v35  ;;  %v8670_v7 = vpop.f32.mrf.mxu1 }
 0x10f   : > { %6405 = vmatmul.mubr.bf16.gmra.mxu1 %v9735_v33  ;;  %v3770_v33 = vsel %vm7022_vm2, %v8614_v28, %v8610_v41  ;;  %v4435_v6 = vrot.slane %v4433_v12, 4  ;;  %v4439_v31 = vrot.slane %v8577_v22, 5  ;;  %v3784_v8 = vsel %vm7022_vm2, %v3779_v14, %v8574_v53  ;;  %9739 = vst [vmem:[#allocation18_spill] sm:$0xff] %v8670_v7 }
 0x110   : > { %6408 = vmatprep.mubr.bf16.mxu1 %v9736_v20  ;;  %v3811_v15 = vshll.u32 %v8635_v39, 16  ;;  %v3825_v61 = vshll.u32 %v8652_v50, 16  ;;  %v3829_v5 = vshrl.u32 %v8652_v50, 16  ;;  %v8676_v22 = vsel %vm7314_vm5, %v5700_v54, %v4433_v12 }
 0x111   : > { %v8672_v41 = vpop.f32.mrf.mxu0  ;;  %v3808_v28 = vor.u32 %v3807_v62, %v8649_v23  ;;  %v3835_v53 = vshll.u32 %v8656_v56, 16  ;;  %v3839_v45 = vshrl.u32 %v8656_v56, 16  ;;  %v3794_v14 = vsel %vm7022_vm2, %v3789_v43, %v8616_v35 }
 0x112   : > { %9740 = vst [vmem:[#allocation19_spill] sm:$0xff] %v8672_v41  ;;  %v4438_v20 = vrot.slane %v4436_v10, 4  ;;  %v3821_v19 = vrot.slane %v3819_v51, 5  ;;  %v8687_v21 = vrot.slane %v3798_v52, 4  ;;  %v8691_v12 = vsel %vm7314_vm5, %v4435_v6, %v4436_v10 }
 0x113   : > { %6457 = vmatmul.mubr.bf16.gmra.mxu0 %v6763_v2  ;;  %v8682_v2 = vld [vmem:[%s6992_s9 + $0x70] sm:$0xf]  ;;  %9741 = vst [vmem:[#allocation20_spill] sm:$0xff] %v8691_v12  ;;  %v4441_v54 = vrot.slane %v4439_v31, 4  ;;  %v4442_v62 = vrot.slane %v8635_v39, 5  ;;  %v9742_v7 = vcombine.low %v8273_v60, %v8292_v36  ;;  %v8698_v34 = vpop.f32.mrf.mxu0  ;;  %v8700_v35 = vrot.slane %v3825_v61, 5 }
 0x114   : > { %6460 = vmatprep.mubr.bf16.mxu0 %v6766_v9  ;;  %v3818_v9 = vrot.slane %v3816_v25, 4  ;;  %9743 = vst [vmem:[#allocation21_spill] sm:$0xff] %v8698_v34  ;;  %v3831_v43 = vrot.slane %v3829_v5, 4  ;;  %v3845_v25 = vshll.u32 %v8682_v2, 16  ;;  %v3849_v51 = vshrl.u32 %v8682_v2, 16  ;;  %v6770_v60 = vld [vmem:[%s6992_s9 + $0xb4] sm:$0xff]  }
 0x115   : > { %v9744_v10 = vcombine.low %v8303_v58, %v8298_v1  ;;  %v8710_v36 = vrot.slane %v3808_v28, 4  ;;  %v8712_v52 = vrot.slane %v3811_v15, 5  ;;  %v8714_v6 = vrot.slane %v3835_v53, 5  ;;  %v5693_v58 = vld [vmem:[%s6992_s9 + $0x64] sm:$0xe]  ;;  %v8743_v53 = vpop.f32.mrf.mxu0 }
 0x116   : > { %v8707_v39 = vpop.f32.mrf.mxu1  ;;  %v3841_v61 = vrot.slane %v3839_v45, 4  ;;  %v8716_v5 = vcombine.low %v3760_v55, %v3770_v33  ;;  %v8720_v47 = vcombine.low %v3784_v8, %v3794_v14  ;;  %v3822_v1 = vor.u32 %v3821_v19, %v3818_v9  ;;  %v5630_v8 = vld [vmem:[%s6992_s9 + $0x78] sm:$0xf]  ;;  %v8739_v19 = vld [vmem:[%s6992_s9 + $0x7c] sm:$0xf]  ;;  %9749 = vst [vmem:[#allocation26_spill] sm:$0xff] %v8743_v53 }
 0x117   : > { %6409 = vmatmul.mubr.bf16.gmra.mxu1 %v9742_v7  ;;  %9745 = vst [vmem:[#allocation22_spill] sm:$0xff] %v8707_v39  ;;  %v8731_v55 = vsel %vm7314_vm5, %v4438_v20, %v4439_v31  ;;  %v8735_v33 = vsel %vm7314_vm5, %v4441_v54, %v4442_v62  ;;  %v3832_v45 = vor.u32 %v3831_v43, %v8700_v35  ;;  %v4446_v14 = vrot.slane %v8652_v50, 5  ;;  %v8750_v9 = vld [vmem:[%s6992_s9 + $0x80] sm:$0xf]  ;;  %v5629_v43 = vld [vmem:[%s6992_s9 + $0x74] sm:$0x1] }
 0x118   : > { %6412 = vmatprep.mubr.bf16.mxu1 %v9744_v10  ;;  %9746 = vst [vmem:[#allocation23_spill] sm:$0xff] %v8716_v5  ;;  %9747 = vst [vmem:[#allocation24_spill] sm:$0xff] %v8720_v47  ;;  %v8741_v28 = vpop.f32.mrf.mxu1  ;;  %v8747_v31 = vrot.slane %v3845_v25, 5  ;;  %v3851_v20 = vrot.slane %v3849_v51, 4  ;;  %v3842_v54 = vor.u32 %v3841_v61, %v8714_v6  ;;  %v5701_v62 = vrot.slane %v5693_v58, 9  ;;  %v8774_v58 = vpop.f32.mrf.mxu0 }
 0x119   : > { %9748 = vst [vmem:[#allocation25_spill] sm:$0xff] %v8741_v28  ;;  %v4449_v10 = vrot.slane %v8656_v56, 5  ;;  %v8759_v7 = vrot.slane %v3822_v1, 4  ;;  %v4452_v50 = vrot.slane %v8682_v2, 5  ;;  %v3860_v25 = vshrl.u32 %v5630_v8, 16  ;;  %9752 = vst [vmem:[#allocation28_spill] sm:$0xff] %v8774_v58 }
 0x11a   : > { %v3863_v51 = vshll.u32 %v5630_v8, 16  ;;  %v8763_v15 = vld [vmem:[%s6992_s9 + $0x84] sm:$0xf]  ;;  %v3873_v28 = vshrl.u32 %v8739_v19, 16  ;;  %v3883_v61 = vshrl.u32 %v8750_v9, 16  ;;  %v9750_v56 = vcombine.low %v8307_v40, %v8315_v59  ;;  %v8772_v1 = vpop.f32.mrf.mxu1  ;;  %v6771_v2 = vld [vmem:[%s6992_s9 + $0xbc] sm:$0xff]  }
 0x11b   : > { %6461 = vmatmul.mubr.bf16.gmra.mxu0 %v6767_v49  ;;  %v3879_v49 = vshll.u32 %v8750_v9, 16  ;;  %9751 = vst [vmem:[#allocation27_spill] sm:$0xff] %v8772_v1  ;;  %v3833_v8 = vrot.slane %v3832_v45, 4  ;;  %v4448_v39 = vrot.slane %v4446_v14, 4  ;;  %v3852_v53 = vor.u32 %v3851_v20, %v8747_v31 }
 0x11c   : > { %6464 = vmatprep.mubr.bf16.mxu0 %v6770_v60  ;;  %v3869_v60 = vshll.u32 %v8739_v19, 16  ;;  %v3855_v34 = vshll.u32 %v5629_v43, 16  ;;  %v9753_v41 = vcombine.low %v8338_v4, %v8334_v32  ;;  %v3843_v0 = vrot.slane %v3842_v54, 4  ;;  %v8787_v12 = vpop.f32.mrf.mxu1 }
 0x11d   : > { %v4451_v42 = vrot.slane %v4449_v10, 4  ;;  %v3889_v24 = vshll.u32 %v8763_v15, 16  ;;  %v3893_v40 = vshrl.u32 %v8763_v15, 16  ;;  %v4454_v59 = vrot.slane %v4452_v50, 4 }
 0x11e   : > { %v3862_v1 = vrot.slane %v3860_v25, 4  ;;  %v3865_v58 = vrot.slane %v3863_v51, 5  ;;  %v8783_v45 = vrot.slane %v3869_v60, 5  ;;  %v3875_v47 = vrot.slane %v3873_v28, 4  ;;  %v5694_v51 = vld [vmem:[%s6992_s9 + $0x78] sm:$0xe] }
 0x11f   : > { %6413 = vmatmul.mubr.bf16.gmra.mxu1 %v9750_v56  ;;  %v4455_v56 = vrot.slane %v5629_v43, 5  ;;  %v8785_v20 = vrot.slane %v3879_v49, 5  ;;  %v3885_v5 = vrot.slane %v3883_v61, 4  ;;  %v3857_v54 = vrot.slane %v3855_v34, 5 }
 0x120   : > { %6416 = vmatprep.mubr.bf16.mxu1 %v9753_v41  ;;  %v3853_v41 = vrot.slane %v3852_v53, 4  ;;  %v4459_v43 = vrot.slane %v8739_v19, 5  ;;  %v9754_v25 = vcombine.low %v8471_v13, %v8492_v48  ;;  %v3828_v28 = vsel %vm7022_vm2, %v8759_v7, %v8700_v35 }
 0x121   : > { %v8789_v32 = vpop.f32.mrf.mxu0  ;;  %v8803_v49 = vsel %vm7314_vm5, %v5701_v62, %v4446_v14  ;;  %v8806_v60 = vrot.slane %v3889_v24, 5  ;;  %v3895_v34 = vrot.slane %v3893_v40, 4  ;;  %v3838_v13 = vsel %vm7022_vm2, %v3833_v8, %v8714_v6  ;;  %v8825_v24 = vld [vmem:[%s6992_s9 + $0x88] sm:$0x1] }
 0x122   : > { %v8815_v48 = vsel %vm7314_vm5, %v4448_v39, %v4449_v10  ;;  %v3848_v35 = vsel %vm7022_vm2, %v3843_v0, %v8747_v31  ;;  %v8822_v7 = vsel %vm7314_vm5, %v4451_v42, %v4452_v50  ;;  %v8829_v19 = vsel %vm7314_vm5, %v4454_v59, %v4455_v56  ;;  %v5635_v10 = vld [vmem:[%s6992_s9 + $0x8c] sm:$0xf] }
 0x123   : > { %6465 = vmatmul.mubr.bf16.gmra.mxu0 %v6771_v2  ;;  %v8808_v53 = vpop.f32.mrf.mxu0  ;;  %v3866_v14 = vor.u32 %v3865_v58, %v3862_v1  ;;  %v3876_v6 = vor.u32 %v3875_v47, %v8783_v45  ;;  %v3886_v39 = vor.u32 %v3885_v5, %v8785_v20  ;;  %v9755_v0 = vcombine.low %v8342_v27, %v8349_v57 }
 0x124   : > { %6532 = vmatprep.mubr.bf16.mxu0 %v9754_v25  ;;  %v3858_v31 = vsel %vm7022_vm2, %v3853_v41, %v3857_v54  ;;  %v5702_v50 = vrot.slane %v5694_v51, 9  ;;  %v4461_v61 = vrot.slane %v4459_v43, 4  ;;  %v4462_v1 = vrot.slane %v8750_v9, 5  ;;  %v8875_v54 = vld [vmem:[%s6992_s9 + $0x94] sm:$0xf] }
 0x125   : > { %v8834_v62 = vpop.f32.mrf.mxu1  ;;  %v8839_v42 = vpop.f32.mrf.mxu0  ;;  %v9756_v47 = vsel %vm7022_vm2, %v8710_v36, %v8712_v52  ;;  %v9757_v27 = vsel %vm7022_vm2, %v8687_v21, %v8649_v23  ;;  %v8857_v5 = vcombine.low %v3828_v28, %v3838_v13  ;;  %v3896_v58 = vor.u32 %v3895_v34, %v8806_v60  ;;  %v8870_v21 = vld [vmem:[%s6992_s9 + $0x90] sm:$0xf] }
 0x126   : > { %v8855_v57 = vcombine.low %v9757_v27, %v9756_v47  ;;  %v3899_v9 = vshll.u32 %v8825_v24, 16  ;;  %v3904_v23 = vshrl.u32 %v5635_v10, 16  ;;  %v3907_v8 = vshll.u32 %v5635_v10, 16 }
 0x127   : > { %6417 = vmatmul.mubr.bf16.gmra.mxu1 %v9755_v0  ;;  %v8863_v2 = vpop.f32.mrf.mxu0  ;;  %v8872_v40 = vcombine.low %v3848_v35, %v3858_v31  ;;  %v3867_v59 = vrot.slane %v3866_v14, 4  ;;  %v3877_v56 = vrot.slane %v3876_v6, 4  ;;  %v3887_v41 = vrot.slane %v3886_v39, 4  ;;  %v8897_v0 = vld [vmem:[%s6992_s9 + $0x98] sm:$0xf] }
 0x128   : > { %6484 = vmatprep.mubr.bf16.mxu1 %v8528_v3  ;;  %v8861_v3 = vpop.f32.mrf.mxu1  ;;  %v9758_v51 = vcombine.low %v8512_v16, %v8537_v26  ;;  %v8884_v34 = vsel %vm7314_vm5, %v5702_v50, %v4459_v43  ;;  %v8888_v13 = vsel %vm7314_vm5, %v4461_v61, %v4462_v1  ;;  %v4464_v35 = vrot.slane %v4462_v1, 4 }
 0x129   : > { %v6246_v28 = vpop.f32.mrf.mxu0  ;;  %v4465_v14 = vrot.slane %v8763_v15, 5  ;;  %v9759_v6 = vcombine.low %v8570_v18, %v8581_v11  ;;  %v3897_v39 = vrot.slane %v3896_v58, 4  ;;  %v3901_v10 = vrot.slane %v3899_v9, 5 }
 0x12a   : > { %v8877_v25 = vpop.f32.mrf.mxu1  ;;  %v3913_v16 = vshll.u32 %v8870_v21, 16  ;;  %v3917_v26 = vshrl.u32 %v8870_v21, 16  ;;  %v3906_v50 = vrot.slane %v3904_v23, 4  ;;  %v3909_v61 = vrot.slane %v3907_v8, 5 }
 0x12b   : > { %6533 = vmatmul.mubr.bf16.vlgmr.msra.gmra.mxu0 %v9758_v51  ;;  %v1516_v31 = vpop.f32.mrf.mxu0  ;;  %v3923_v1 = vshll.u32 %v8875_v54, 16  ;;  %v3927_v15 = vshrl.u32 %v8875_v54, 16  ;;  %v3872_v18 = vsel %vm7022_vm2, %v3867_v59, %v8783_v45  ;;  %v3882_v11 = vsel %vm7022_vm2, %v3877_v56, %v8785_v20 }
 0x12c   : > { %6536 = vmatprep.mubr.bf16.mxu0 %v9759_v6  ;;  %v8899_v43 = vpop.f32.mrf.mxu1  ;;  %v3892_v27 = vsel %vm7022_vm2, %v3887_v41, %v8806_v60  ;;  %v4467_v23 = vrot.slane %v4465_v14, 4  ;;  %v4468_v8 = vrot.slane %v8825_v24, 5  ;;  %v3933_v45 = vshll.u32 %v8897_v0, 16  ;;  %v5695_v41 = vld [vmem:[%s6992_s9 + $0x8c] sm:$0xe] }
 0x12d   : > { %v6247_v9 = vpop.f32.mrf.mxu0  ;;  %v3937_v59 = vshrl.u32 %v8897_v0, 16  ;;  %v3902_v56 = vsel %vm7022_vm2, %v3897_v39, %v3901_v10  ;;  %v8922_v51 = vrot.slane %v3913_v16, 5  ;;  %v3919_v60 = vrot.slane %v3917_v26, 4 }
 0x12e   : > { %v6198_v58 = vpop.f32.mrf.mxu1  ;;  %v3910_v47 = vor.u32 %v3909_v61, %v3906_v50  ;;  %v8925_v24 = vrot.slane %v3923_v1, 5  ;;  %v3929_v52 = vrot.slane %v3927_v15, 4  ;;  %v4472_v36 = vrot.slane %v8870_v21, 5  ;;  %v9761_v15 = vld [vmem:[#allocation7_spill] sm:$0xff] }
 0x12f   : > { %6485 = vmatmul.mubr.bf16.vlgmr.msra.gmra.mxu1 %v8606_v38  ;;  %v1104_v20 = vadd.f32 %v6198_v58, %v8432_v17  ;;  %v1519_v6 = vpop.f32.mrf.mxu0  ;;  %v8935_v39 = vsel %vm7314_vm5, %v4464_v35, %v4465_v14  ;;  %v9760_v26 = vcombine.low %v8632_v63, %v8647_v30  ;;  %v5703_v50 = vrot.slane %v5695_v41, 9  ;;  %v9762_v14 = vld [vmem:[#allocation20_spill] sm:$0xff] }
 0x130   : > { %6488 = vmatprep.mubr.bf16.mxu1 %v8624_v37  ;;  %v1095_v38 = vpop.f32.mrf.mxu1  ;;  %v8931_v37 = vcombine.low %v3872_v18, %v3882_v11  ;;  %v4475_v21 = vrot.slane %v8875_v54, 5  ;;  %v8944_v61 = vrot.slane %v3933_v45, 5  ;;  %v9763_v18 = vcombine.low %v8676_v22, %v9762_v14  ;;  %v9765_v22 = vld [vmem:[#allocation9_spill] sm:$0xff] }
 0x131   : > { %v8928_v4 = vadd.f32 %v6246_v28, %v1104_v20  ;;  %v1096_v17 = vadd.f32 %v1095_v38, %v8447_v44  ;;  %v6250_v16 = vpop.f32.mrf.mxu0  ;;  %v8942_v28 = vld [vmem:[%s6992_s9 + $0x9c] sm:$0x1]  ;;  %v3939_v44 = vrot.slane %v3937_v59, 4  ;;  %v8952_v11 = vcombine.low %v3892_v27, %v3902_v56  ;;  %v5640_v20 = vld [vmem:[%s6992_s9 + $0xa0] sm:$0xf]  ;;  %v9766_v38 = vld [vmem:[#allocation23_spill] sm:$0xff] }
 0x132   : > { %v6199_v10 = vpop.f32.mrf.mxu1  ;;  %v8956_v63 = vsel %vm7314_vm5, %v4467_v23, %v4468_v8  ;;  %v8958_v58 = vrot.slane %v3910_v47, 4  ;;  %v3920_v45 = vor.u32 %v3919_v60, %v8922_v51  ;;  %v4474_v59 = vrot.slane %v4472_v36, 4 }
 0x133   : > { %6537 = vmatmul.mubr.bf16.gmra.mxu0 %v9760_v26  ;;  %v8946_v1 = vadd.f32 %v1516_v31, %v1096_v17  ;;  %v1107_v35 = vadd.f32 %v6199_v10, %v9761_v15  ;;  %v1532_v54 = vpop.f32.mrf.mxu0  ;;  %v3930_v31 = vor.u32 %v3929_v52, %v8925_v24  ;;  %v3943_v56 = vshll.u32 %v8942_v28, 16  ;;  %v9768_v26 = vld [vmem:[#allocation11_spill] sm:$0xff] }
 0x134   : > { %6540 = vmatprep.mubr.bf16.mxu0 %v9763_v18  ;;  %v1098_v30 = vpop.f32.mrf.mxu1  ;;  %v4478_v23 = vrot.slane %v8897_v0, 5  ;;  %v8973_v52 = vsel %vm7314_vm5, %v5703_v50, %v4472_v36  ;;  %v4477_v17 = vrot.slane %v4475_v21, 4  ;;  %v9769_v0 = vld [vmem:[#allocation24_spill] sm:$0xff]  ;;  %v3948_v14 = vshrl.u32 %v5640_v20, 16 }
 0x135   : > { %v8963_v41 = vadd.f32 %v6247_v9, %v1107_v35  ;;  %v1099_v27 = vadd.f32 %v1098_v30, %v9765_v22  ;;  %v6251_v47 = vpop.f32.mrf.mxu0  ;;  %v3940_v9 = vor.u32 %v3939_v44, %v8944_v61  ;;  %v8981_v35 = vld [vmem:[%s6992_s9 + $0xa4] sm:$0xf]  ;;  %v3951_v18 = vshll.u32 %v5640_v20, 16  ;;  %v8995_v20 = vld [vmem:[%s6992_s9 + $0xa8] sm:$0xf] }
 0x136   : > { %v6202_v8 = vpop.f32.mrf.mxu1  ;;  %v3916_v36 = vsel %vm7022_vm2, %v8958_v58, %v8922_v51  ;;  %v3921_v50 = vrot.slane %v3920_v45, 4  ;;  %v3931_v44 = vrot.slane %v3930_v31, 4  ;;  %v4481_v58 = vrot.slane %v8942_v28, 5  ;;  %v9772_v31 = vld [vmem:[#allocation15_spill] sm:$0xff] }
 0x137   : > { %9764 = vst [vmem:[#allocation7_spill] sm:$0xff] %v8963_v41  ;;  %6489 = vmatmul.mubr.bf16.gmra.mxu1 %v9766_v38  ;;  %v8976_v10 = vadd.f32 %v1519_v6, %v1099_v27  ;;  %v1120_v15 = vadd.f32 %v6202_v8, %v9768_v26  ;;  %v1535_v22 = vpop.f32.mrf.mxu0  ;;  %v8989_v6 = vsel %vm7314_vm5, %v4474_v59, %v4475_v21  ;;  %v9770_v8 = vld [vmem:[#allocation13_spill] sm:$0xff]  ;;  %v3945_v26 = vrot.slane %v3943_v56, 5 }
 0x138   : > { %6492 = vmatprep.mubr.bf16.mxu1 %v9769_v0  ;;  %v1111_v30 = vpop.f32.mrf.mxu1  ;;  %v4480_v0 = vrot.slane %v4478_v23, 4  ;;  %v9771_v41 = vcombine.low %v8731_v55, %v8735_v33  ;;  %v3941_v51 = vrot.slane %v3940_v9, 4  ;;  %v3957_v21 = vshll.u32 %v8981_v35, 16 }
 0x139   : > { %9767 = vst [vmem:[#allocation20_spill] sm:$0xff] %v8976_v10  ;;  %v8991_v27 = vadd.f32 %v6250_v16, %v1120_v15  ;;  %v1112_v38 = vadd.f32 %v1111_v30, %v9770_v8  ;;  %v6254_v10 = vpop.f32.mrf.mxu0  ;;  %v3961_v16 = vshrl.u32 %v8981_v35, 16  ;;  %v9773_v56 = vcombine.low %v8803_v49, %v8815_v48  ;;  %v9774_v8 = vld [vmem:[#allocation17_spill] sm:$0xff] }
 0x13a   : > { %v6203_v60 = vpop.f32.mrf.mxu1  ;;  %v3950_v15 = vrot.slane %v3948_v14, 4  ;;  %v3953_v30 = vrot.slane %v3951_v18, 5  ;;  %v3926_v28 = vsel %vm7022_vm2, %v3921_v50, %v8925_v24  ;;  %v3971_v9 = vshrl.u32 %v8995_v20, 16  ;;  %v5696_v24 = vld [vmem:[%s6992_s9 + $0xa0] sm:$0xe] }
 0x13b   : > { %6541 = vmatmul.mubr.bf16.gmra.mxu0 %v9771_v41  ;;  %v9003_v45 = vadd.f32 %v1532_v54, %v1112_v38  ;;  %v1123_v59 = vadd.f32 %v6203_v60, %v9772_v31  ;;  %v1548_v33 = vpop.f32.mrf.mxu0  ;;  %v3967_v54 = vshll.u32 %v8995_v20, 16  ;;  %v3936_v48 = vsel %vm7022_vm2, %v3931_v44, %v8944_v61  ;;  %v9775_v44 = vld [vmem:[#allocation19_spill] sm:$0xff] }
 0x13c   : > { %6544 = vmatprep.mubr.bf16.mxu0 %v9773_v56  ;;  %v1114_v55 = vpop.f32.mrf.mxu1  ;;  %v9024_v14 = vsel %vm7314_vm5, %v4477_v17, %v4478_v23  ;;  %v9032_v38 = vsel %vm7314_vm5, %v4480_v0, %v4481_v58  ;;  %v9034_v31 = vrot.slane %v3957_v21, 5  ;;  %v3954_v17 = vor.u32 %v3953_v30, %v3950_v15  ;;  %v9042_v56 = vld [vmem:[%s6992_s9 + $0xac] sm:$0xf] }
 0x13d   : > { %v9016_v60 = vadd.f32 %v6251_v47, %v1123_v59  ;;  %v1115_v49 = vadd.f32 %v1114_v55, %v9774_v8  ;;  %v6255_v50 = vpop.f32.mrf.mxu0  ;;  %v3946_v47 = vsel %vm7022_vm2, %v3941_v51, %v3945_v26  ;;  %v3963_v59 = vrot.slane %v3961_v16, 4  ;;  %v9776_v16 = vld [vmem:[#allocation21_spill] sm:$0xff] }
 0x13e   : > { %v6206_v18 = vpop.f32.mrf.mxu1  ;;  %v9044_v55 = vcombine.low %v3916_v36, %v3926_v28  ;;  %v9046_v0 = vrot.slane %v3967_v54, 5  ;;  %v3973_v58 = vrot.slane %v3971_v9, 4  ;;  %v9777_v36 = vcombine.low %v8822_v7, %v8829_v19 }
 0x13f   : > { %6493 = vmatmul.mubr.bf16.gmra.mxu1 %v8855_v57  ;;  %v9036_v61 = vadd.f32 %v1535_v22, %v1115_v49  ;;  %v1136_v23 = vadd.f32 %v6206_v18, %v9775_v44  ;;  %v4485_v57 = vrot.slane %v8981_v35, 5  ;;  %v1551_v51 = vpop.f32.mrf.mxu0  ;;  %v5704_v22 = vrot.slane %v5696_v24, 9  ;;  %v5645_v35 = vld [vmem:[%s6992_s9 + $0xb4] sm:$0xf]  ;;  %v9778_v18 = vld [vmem:[#allocation26_spill] sm:$0xff] }
 0x140   : > { %6496 = vmatprep.mubr.bf16.mxu1 %v8857_v5  ;;  %v1127_v26 = vpop.f32.mrf.mxu1  ;;  %v9051_v49 = vcombine.low %v3936_v48, %v3946_v47  ;;  %v3964_v28 = vor.u32 %v3963_v59, %v9034_v31  ;;  %v3977_v54 = vshll.u32 %v9042_v56, 16  ;;  %v3981_v9 = vshrl.u32 %v9042_v56, 16  ;;  %v9064_v48 = vld [vmem:[%s6992_s9 + $0xb8] sm:$0xf] }
 0x141   : > { %v9048_v21 = vadd.f32 %v6254_v10, %v1136_v23  ;;  %v1128_v8 = vadd.f32 %v1127_v26, %v9776_v16  ;;  %v6258_v30 = vpop.f32.mrf.mxu0  ;;  %v4488_v10 = vrot.slane %v8995_v20, 5  ;;  %v9779_v44 = vcombine.low %v8884_v34, %v8888_v13  ;;  %v9080_v16 = vld [vmem:[%s6992_s9 + $0xb0] sm:$0x1] }
 0x142   : > { %v6207_v15 = vpop.f32.mrf.mxu1  ;;  %v9072_v7 = vrot.slane %v3954_v17, 4  ;;  %v4487_v19 = vrot.slane %v4485_v57, 4  ;;  %v3974_v20 = vor.u32 %v3973_v58, %v9046_v0  ;;  %v9077_v26 = vsel %vm7314_vm5, %v5704_v22, %v4485_v57 }
 0x143   : > { %6545 = vmatmul.mubr.bf16.gmra.mxu0 %v9777_v36  ;;  %v9066_v24 = vadd.f32 %v1548_v33, %v1128_v8  ;;  %v1139_v47 = vadd.f32 %v6207_v15, %v9778_v18  ;;  %v1564_v23 = vpop.f32.mrf.mxu0  ;;  %v3992_v33 = vshrl.u32 %v5645_v35, 16  ;;  %v3995_v8 = vshll.u32 %v5645_v35, 16  ;;  %v9780_v36 = vld [vmem:[#allocation28_spill] sm:$0xff] }
 0x144   : > { %6548 = vmatprep.mubr.bf16.mxu0 %v9779_v44  ;;  %v1130_v59 = vpop.f32.mrf.mxu1  ;;  %v4001_v13 = vshll.u32 %v9064_v48, 16  ;;  %v4005_v17 = vshrl.u32 %v9064_v48, 16  ;;  %v9088_v44 = vrot.slane %v3964_v28, 4  ;;  %v4490_v57 = vrot.slane %v4488_v10, 4 }
 0x145   : > { %v9082_v15 = vadd.f32 %v6255_v50, %v1139_v47  ;;  %v1131_v34 = vadd.f32 %v1130_v59, %v9780_v36  ;;  %v6259_v58 = vpop.f32.mrf.mxu0  ;;  %v9090_v22 = vrot.slane %v3977_v54, 5  ;;  %v3983_v5 = vrot.slane %v3981_v9, 4 }
 0x146   : > { %v6210_v18 = vpop.f32.mrf.mxu1  ;;  %v9098_v47 = vsel %vm7314_vm5, %v4487_v19, %v4488_v10  ;;  %v3960_v54 = vsel %vm7022_vm2, %v9072_v7, %v9034_v31  ;;  %v3994_v9 = vrot.slane %v3992_v33, 4  ;;  %v3997_v36 = vrot.slane %v3995_v8, 5  ;;  %v9110_v10 = vld [vmem:[%s6992_s9 + $0xbc] sm:$0xf] }
 0x147   : > { %6497 = vmatmul.mubr.bf16.gmra.mxu1 %v8872_v40  ;;  %v9092_v35 = vadd.f32 %v1551_v51, %v1131_v34  ;;  %v1152_v50 = vadd.f32 %v6210_v18, %v8789_v32  ;;  %v3987_v40 = vshll.u32 %v9080_v16, 16  ;;  %v1567_v28 = vpop.f32.mrf.mxu0  ;;  %v4491_v51 = vrot.slane %v9042_v56, 5 }
 0x148   : > { %6500 = vmatprep.mubr.bf16.mxu1 %v8931_v37  ;;  %v1143_v59 = vpop.f32.mrf.mxu1  ;;  %v9112_v19 = vrot.slane %v4001_v13, 5  ;;  %v4007_v34 = vrot.slane %v4005_v17, 4  ;;  %v9781_v31 = vcombine.low %v8935_v39, %v8956_v63  ;;  %v3970_v56 = vsel %vm7022_vm2, %v9088_v44, %v9046_v0  ;;  %v5697_v13 = vld [vmem:[%s6992_s9 + $0xb4] sm:$0xe] }
 0x149   : > { %v9106_v32 = vadd.f32 %v6258_v30, %v1152_v50  ;;  %v1144_v37 = vadd.f32 %v1143_v59, %v8808_v53  ;;  %v6262_v41 = vpop.f32.mrf.mxu0  ;;  %v9121_v30 = vrot.slane %v3974_v20, 4  ;;  %v5734_v53 = vcombine.low %v9077_v26, %v9098_v47  ;;  %v9137_v20 = vld [vmem:[%s6992_s9 + $0xc0] sm:$0xf] }
 0x14a   : > { %v6211_v18 = vpop.f32.mrf.mxu1  ;;  %v3984_v7 = vor.u32 %v3983_v5, %v9090_v22  ;;  %v9782_v39 = vcombine.low %v8973_v52, %v8989_v6  ;;  %v9132_v63 = vrot.slane %v3987_v40, 5  ;;  %v4498_v0 = vrot.slane %v9064_v48, 5 }
 0x14b   : > { %6549 = vmatmul.mubr.bf16.gmra.mxu0 %v9781_v31  ;;  %v9126_v33 = vadd.f32 %v1564_v23, %v1144_v37  ;;  %v1155_v8 = vadd.f32 %v6211_v18, %v8839_v42  ;;  %v1580_v44 = vpop.f32.mrf.mxu0  ;;  %v4493_v26 = vrot.slane %v4491_v51, 4  ;;  %v4494_v5 = vrot.slane %v9080_v16, 5 }
 0x14c   : > { %6552 = vmatprep.mubr.bf16.mxu0 %v9782_v39  ;;  %v1146_v17 = vpop.f32.mrf.mxu1  ;;  %v4011_v23 = vshll.u32 %v9110_v10, 16  ;;  %v4015_v42 = vshrl.u32 %v9110_v10, 16  ;;  %v3998_v6 = vor.u32 %v3997_v36, %v3994_v9  ;;  %v4008_v47 = vor.u32 %v4007_v34, %v9112_v19  ;;  %v9785_v39 = vld [vmem:[#allocation5_spill] sm:$0xff] }
 0x14d   : > { %v9142_v50 = vadd.f32 %v6259_v58, %v1155_v8  ;;  %v1147_v52 = vadd.f32 %v1146_v17, %v8863_v2  ;;  %v6263_v48 = vpop.f32.mrf.mxu0  ;;  %v3985_v59 = vrot.slane %v3984_v7, 4  ;;  %v5705_v37 = vrot.slane %v5697_v13, 9  ;;  %v9786_v17 = vld [vmem:[#allocation6_spill] sm:$0xff] }
 0x14e   : > { %v6214_v40 = vpop.f32.mrf.mxu1  ;;  %v4021_v18 = vshll.u32 %v9137_v20, 16  ;;  %v4025_v16 = vshrl.u32 %v9137_v20, 16  ;;  %v4500_v2 = vrot.slane %v4498_v0, 4  ;;  %v4501_v9 = vrot.slane %v9110_v10, 5 }
 0x14f   : > { %9783 = vst [vmem:[#allocation9_spill] sm:$0xff] %v9142_v50  ;;  %6501 = vmatmul.mubr.bf16.gmra.mxu1 %v8952_v11  ;;  %v9149_v31 = vadd.f32 %v1567_v28, %v1147_v52  ;;  %v1168_v58 = vadd.f32 %v6214_v40, %v9785_v39  ;;  %v1583_v34 = vpop.f32.mrf.mxu0  ;;  %v4492_v11 = vsel %vm7314_vm5, %v4490_v57, %v4491_v51  ;;  %v4013_v8 = vrot.slane %v4011_v23, 5 }
 0x150   : > { %6504 = vmatprep.mubr.bf16.mxu1 %v9044_v55  ;;  %v1159_v36 = vpop.f32.mrf.mxu1  ;;  %v4495_v7 = vsel %vm7314_vm5, %v4493_v26, %v4494_v5  ;;  %v4017_v13 = vrot.slane %v4015_v42, 4  ;;  %v3999_v40 = vrot.slane %v3998_v6, 4  ;;  %v4009_v55 = vrot.slane %v4008_v47, 4  ;;  %v5649_v6 = vld [vmem:[%s6992_s9 + $0xc4] sm:$0x1]  ;;  %s9618_s9 = scalar_lea.sflag [#allocation3], %s202_s27 }
 0x151   : > { %9784 = vst [vmem:[#allocation23_spill] sm:$0xff] %v9149_v31  ;;  %v9158_v28 = vadd.f32 %v6262_v41, %v1168_v58  ;;  %v1160_v52 = vadd.f32 %v1159_v36, %v9786_v17  ;;  %v6266_v31 = vpop.f32.mrf.mxu0  ;;  %v9787_v10 = vcombine.low %v9024_v14, %v9032_v38  ;;  %v5678_v50 = vcombine.low %v3960_v54, %v3970_v56  ;;  %v9788_v41 = vld [vmem:[#allocation8_spill] sm:$0xff] }
 0x152   : > { %v6215_v39 = vpop.f32.mrf.mxu1  ;;  %v4499_v57 = vsel %vm7314_vm5, %v5705_v37, %v4498_v0  ;;  %v9166_v51 = vrot.slane %v4021_v18, 5  ;;  %v4027_v26 = vrot.slane %v4025_v16, 4  ;;  %v4502_v42 = vsel %vm7314_vm5, %v4500_v2, %v4501_v9  ;;  %v9789_v37 = vld [vmem:[#allocation10_spill] sm:$0xff]  ;;  %v9790_v36 = vld [vmem:[#allocation12_spill] sm:$0xff] }
 0x153   : > { %6553 = vmatmul.mubr.bf16.gmra.mxu0 %v9787_v10  ;;  %v9168_v5 = vadd.f32 %v1580_v44, %v1160_v52  ;;  %v1171_v23 = vadd.f32 %v6215_v39, %v9788_v41  ;;  %v4504_v47 = vrot.slane %v9137_v20, 5  ;;  %v1596_v38 = vpop.f32.mrf.mxu0  ;;  %v3980_v54 = vsel %vm7022_vm2, %v9121_v30, %v9090_v22  ;;  %v9792_v41 = vld [vmem:[#allocation16_spill] sm:$0xff] }
 0x154   : > { %6556 = vmatprep.mubr.bf16.mxu0 %v5734_v53  ;;  %v1162_v14 = vpop.f32.mrf.mxu1  ;;  %v3990_v56 = vsel %vm7022_vm2, %v3985_v59, %v9132_v63  ;;  %v5735_v0 = vcombine.low %v4492_v11, %v4495_v7  ;;  %v4018_v44 = vor.u32 %v4017_v13, %v4013_v8  ;;  %v4004_v20 = vsel %vm7022_vm2, %v3999_v40, %v9112_v19 }
 0x155   : > { %v9182_v53 = vadd.f32 %v6263_v48, %v1171_v23  ;;  %v1163_v18 = vadd.f32 %v1162_v14, %v9789_v37  ;;  %v4014_v16 = vsel %vm7022_vm2, %v4009_v55, %v4013_v8  ;;  %v6267_v22 = vpop.f32.mrf.mxu0  ;;  %v4503_v30 = vrot.slane %v4501_v9, 4  ;;  %v9791_v8 = vld [vmem:[#allocation14_spill] sm:$0xff] }
 0x156   : > { %v6218_v58 = vpop.f32.mrf.mxu1  ;;  %v5736_v2 = vcombine.low %v4499_v57, %v4502_v42  ;;  %v4028_v63 = vor.u32 %v4027_v26, %v9166_v51  ;;  %v4031_v59 = vshll.u32 %v5649_v6, 16  ;;  %v4506_v7 = vrot.slane %v4504_v47, 4 }
 0x157   : > { %6505 = vmatmul.mubr.bf16.gmra.mxu1 %v9051_v49  ;;  %v9192_v48 = vadd.f32 %v1583_v34, %v1163_v18  ;;  %v1184_v11 = vadd.f32 %v6218_v58, %v9790_v36  ;;  %v4507_v13 = vrot.slane %v5649_v6, 5  ;;  %v1599_v17 = vpop.f32.mrf.mxu0  ;;  %v5679_v49 = vcombine.low %v3980_v54, %v3990_v56  ;;  %v9793_v54 = vld [vmem:[#allocation18_spill] sm:$0xff] }
 0x158   : > { %6508 = vmatprep.mubr.bf16.mxu1 %v5678_v50  ;;  %v1175_v19 = vpop.f32.mrf.mxu1  ;;  %v4019_v39 = vrot.slane %v4018_v44, 4  ;;  %v5680_v10 = vcombine.low %v4004_v20, %v4014_v16  ;;  %v4029_v57 = vrot.slane %v4028_v63, 4  ;;  %v4033_v34 = vrot.slane %v4031_v59, 5  ;;  %v9794_v18 = vld [vmem:[#allocation22_spill] sm:$0xff] }
 0x159   : > { %v9195_v52 = vadd.f32 %v6266_v31, %v1184_v11  ;;  %v1176_v40 = vadd.f32 %v1175_v19, %v9791_v8  ;;  %v4505_v23 = vsel %vm7314_vm5, %v4503_v30, %v4504_v47  ;;  %v4508_v31 = vsel %vm7314_vm5, %v4506_v7, %v4507_v13  ;;  %v9795_v30 = vld [vmem:[#allocation25_spill] sm:$0xff]  ;;  %v9796_v7 = vld [vmem:[#allocation27_spill] sm:$0xff] }
 0x15a   : > { %v6219_v55 = vpop.f32.mrf.mxu1  ;;  %v6270_v9 = vpop.f32.mrf.mxu0  ;;  %v4024_v46 = vsel %vm7022_vm2, %v4019_v39, %v9166_v51  ;;  %v4034_v47 = vsel %vm7022_vm2, %v4029_v57, %v4033_v34 }
 0x15b   : > { %6557 = vmatmul.mubr.bf16.gmra.mxu0 %v5735_v0  ;;  %v9198_v26 = vadd.f32 %v1596_v38, %v1176_v40  ;;  %v1187_v50 = vadd.f32 %v6219_v55, %v9792_v41  ;;  %v5737_v38 = vcombine.low %v4505_v23, %v4508_v31  ;;  %v5681_v36 = vcombine.low %v4024_v46, %v4034_v47  ;;  %v9797_v47 = vld [vmem:[#allocation7_spill] sm:$0xff] }
 0x15c   : > { %6560 = vmatprep.mubr.bf16.mxu0 %v5736_v2  ;;  %v1178_v42 = vpop.f32.mrf.mxu1  ;;  %v1612_v6 = vpop.f32.mrf.mxu0 }
 0x15d   : > { %v9205_v14 = vadd.f32 %v6267_v22, %v1187_v50  ;;  %v1179_v56 = vadd.f32 %v1178_v42, %v9793_v54 }
 0x15e   : > { %v6222_v0 = vpop.f32.mrf.mxu1  ;;  %v6271_v44 = vpop.f32.mrf.mxu0 }
 0x15f   : > { %6509 = vmatmul.mubr.bf16.gmra.mxu1 %v5679_v49  ;;  %v9208_v37 = vadd.f32 %v1599_v17, %v1179_v56  ;;  %v1200_v20 = vadd.f32 %v6222_v0, %v9794_v18 }
 0x160   : > { %6512 = vmatprep.mubr.bf16.mxu1 %v5680_v10  ;;  %v1191_v16 = vpop.f32.mrf.mxu1  ;;  %v1615_v58 = vpop.f32.mrf.mxu0 }
 0x161   : > { %v9216_v22 = vadd.f32 %v6270_v9, %v1200_v20  ;;  %v1192_v2 = vadd.f32 %v1191_v16, %v9795_v30 }
 0x162   : > { %v6223_v63 = vpop.f32.mrf.mxu1 }
 0x163   : > { %v6274_v59 = vpop.f32.mrf.mxu0  ;;  %6561 = vmatmul.mubr.bf16.gmra.mxu0 %v5737_v38  ;;  %v9219_v11 = vadd.f32 %v1612_v6, %v1192_v2  ;;  %v1203_v13 = vadd.f32 %v6223_v63, %v9796_v7  ;;  %v9798_v2 = vld [vmem:[#allocation20_spill] sm:$0xff] }
 0x164   : > { %v1194_v19 = vpop.f32.mrf.mxu1 }
 0x165   : > { %v1628_v17 = vpop.f32.mrf.mxu0  ;;  %v9222_v51 = vadd.f32 %v6271_v44, %v1203_v13  ;;  %v1195_v29 = vadd.f32 %v1194_v19, %v8787_v12 }
 0x167   : > { %v6226_v8 = vpop.f32.mrf.mxu1  ;;  %6513 = vmatmul.mubr.bf16.gmra.mxu1 %v5681_v36  ;;  %v6275_v40 = vpop.f32.mrf.mxu0  ;;  %v9225_v49 = vadd.f32 %v1615_v58, %v1195_v29 }
 0x168   : > { %v1216_v55 = vadd.f32 %v6226_v8, %v8834_v62 }
 0x169   : > { %v1207_v9 = vpop.f32.mrf.mxu1  ;;  %v1631_v39 = vpop.f32.mrf.mxu0 }
 0x16a   : > { %v9228_v10 = vadd.f32 %v6274_v59, %v1216_v55  ;;  %v1208_v57 = vadd.f32 %v1207_v9, %v8861_v3 }
 0x16b   : > { %v6227_v34 = vpop.f32.mrf.mxu1  ;;  %v6342_v41 = vpop.f32.mrf.mxu0 }
 0x16c   : > { %v9231_v50 = vadd.f32 %v1628_v17, %v1208_v57  ;;  %v1219_v23 = vadd.f32 %v6227_v34, %v8877_v25 }
 0x16d   : > { %v1210_v12 = vpop.f32.mrf.mxu1  ;;  %v2620_v31 = vpop.f32.mrf.mxu0 }
 0x16e   : > { %v9234_v42 = vadd.f32 %v6275_v40, %v1219_v23  ;;  %v1211_v6 = vadd.f32 %v1210_v12, %v8899_v43 }
 0x16f   : > { %v6294_v54 = vpop.f32.mrf.mxu1  ;;  %v6343_v62 = vpop.f32.mrf.mxu0 }
 0x170   : > { %v9237_v56 = vadd.f32 %v1631_v39, %v1211_v6  ;;  %v2035_v0 = vadd.f32 %v6294_v54, %v8928_v4 }
 0x171   : > { %v1906_v44 = vpop.f32.mrf.mxu1  ;;  %v2623_v3 = vpop.f32.mrf.mxu0 }
 0x172   : > { %v9240_v38 = vadd.f32 %v6342_v41, %v2035_v0  ;;  %v2033_v18 = vadd.f32 %v1906_v44, %v8946_v1 }
 0x173   : > { %v6295_v20 = vpop.f32.mrf.mxu1  ;;  %v6346_v25 = vpop.f32.mrf.mxu0 }
 0x174   : > { %v9243_v46 = vadd.f32 %v2620_v31, %v2033_v18  ;;  %v2036_v16 = vadd.f32 %v6295_v20, %v9797_v47 }
 0x175   : > { %v1909_v58 = vpop.f32.mrf.mxu1  ;;  %v2636_v43 = vpop.f32.mrf.mxu0 }
 0x176   : > { %v9246_v30 = vadd.f32 %v6343_v62, %v2036_v16  ;;  %v2034_v63 = vadd.f32 %v1909_v58, %v9798_v2 }
 0x177   : > { %v6298_v59 = vpop.f32.mrf.mxu1  ;;  %v6347_v4 = vpop.f32.mrf.mxu0 }
 0x178   : > { %v9249_v36 = vadd.f32 %v2623_v3, %v2034_v63  ;;  %v2039_v7 = vadd.f32 %v6298_v59, %v8991_v27 }
 0x179   : > { %v1922_v13 = vpop.f32.mrf.mxu1  ;;  %v2639_v1 = vpop.f32.mrf.mxu0 }
 0x17a   : > { %v9252_v19 = vadd.f32 %v6346_v25, %v2039_v7  ;;  %v2037_v17 = vadd.f32 %v1922_v13, %v9003_v45 }
 0x17b   : > { %v6299_v29 = vpop.f32.mrf.mxu1  ;;  %v6350_v8 = vpop.f32.mrf.mxu0 }
 0x17c   : > { %v9255_v40 = vadd.f32 %v2636_v43, %v2037_v17  ;;  %v2040_v55 = vadd.f32 %v6299_v29, %v9016_v60  ;;  %v9800_v17 = vld [vmem:[#allocation23_spill] sm:$0xff] }
 0x17d   : > { %v1925_v9 = vpop.f32.mrf.mxu1  ;;  %v2652_v39 = vpop.f32.mrf.mxu0 }
 0x17e   : > { %v9258_v57 = vadd.f32 %v6347_v4, %v2040_v55  ;;  %v2038_v34 = vadd.f32 %v1925_v9, %v9036_v61  ;;  %v9799_v4 = vld [vmem:[#allocation9_spill] sm:$0xff] }
 0x17f   : > { %v6302_v41 = vpop.f32.mrf.mxu1  ;;  %v6351_v27 = vpop.f32.mrf.mxu0 }
 0x180   : > { %v9261_v23 = vadd.f32 %v2639_v1, %v2038_v34  ;;  %v2043_v12 = vadd.f32 %v6302_v41, %v9048_v21 }
 0x181   : > { %v1938_v31 = vpop.f32.mrf.mxu1  ;;  %v2655_v45 = vpop.f32.mrf.mxu0 }
 0x182   : > { %v9264_v6 = vadd.f32 %v6350_v8, %v2043_v12  ;;  %v2041_v54 = vadd.f32 %v1938_v31, %v9066_v24 }
 0x183   : > { %v6303_v62 = vpop.f32.mrf.mxu1  ;;  %v6354_v60 = vpop.f32.mrf.mxu0 }
 0x184   : > { %v9267_v0 = vadd.f32 %v2652_v39, %v2041_v54  ;;  %v2044_v44 = vadd.f32 %v6303_v62, %v9082_v15 }
 0x185   : > { %v1941_v3 = vpop.f32.mrf.mxu1  ;;  %v2668_v61 = vpop.f32.mrf.mxu0 }
 0x186   : > { %v9270_v18 = vadd.f32 %v6351_v27, %v2044_v44  ;;  %v2042_v20 = vadd.f32 %v1941_v3, %v9092_v35 }
 0x187   : > { %v6306_v25 = vpop.f32.mrf.mxu1  ;;  %v6355_v21 = vpop.f32.mrf.mxu0 }
 0x188   : > { %v9273_v47 = vadd.f32 %v2655_v45, %v2042_v20  ;;  %v2047_v16 = vadd.f32 %v6306_v25, %v9106_v32 }
 0x189   : > { %v1954_v58 = vpop.f32.mrf.mxu1  ;;  %v2671_v24 = vpop.f32.mrf.mxu0 }
 0x18a   : > { %v9276_v43 = vadd.f32 %v6354_v60, %v2047_v16  ;;  %v2045_v2 = vadd.f32 %v1954_v58, %v9126_v33 }
 0x18b   : > { %v6307_v63 = vpop.f32.mrf.mxu1  ;;  %v6358_v15 = vpop.f32.mrf.mxu0 }
 0x18c   : > { %v9279_v59 = vadd.f32 %v2668_v61, %v2045_v2  ;;  %v2048_v7 = vadd.f32 %v6307_v63, %v9799_v4 }
 0x18d   : > { %v1957_v13 = vpop.f32.mrf.mxu1  ;;  %v2684_v35 = vpop.f32.mrf.mxu0 }
 0x18e   : > { %v9282_v1 = vadd.f32 %v6355_v21, %v2048_v7  ;;  %v2046_v29 = vadd.f32 %v1957_v13, %v9800_v17 }
 0x18f   : > { %v6310_v8 = vpop.f32.mrf.mxu1  ;;  %v6359_v32 = vpop.f32.mrf.mxu0 }
 0x190   : > { %v9285_v55 = vadd.f32 %v2671_v24, %v2046_v29  ;;  %v2051_v9 = vadd.f32 %v6310_v8, %v9158_v28 }
 0x191   : > { %v1970_v39 = vpop.f32.mrf.mxu1  ;;  %v2687_v33 = vpop.f32.mrf.mxu0 }
 0x192   : > { %v9288_v34 = vadd.f32 %v6358_v15, %v2051_v9  ;;  %v2049_v41 = vadd.f32 %v1970_v39, %v9168_v5 }
 0x193   : > { %v6311_v27 = vpop.f32.mrf.mxu1  ;;  %v6362_v12 = vpop.f32.mrf.mxu0 }
 0x194   : > { %v9291_v31 = vadd.f32 %v2684_v35, %v2049_v41  ;;  %v2052_v45 = vadd.f32 %v6311_v27, %v9182_v53 }
 0x195   : > { %v1973_v54 = vpop.f32.mrf.mxu1  ;;  %v2700_v62 = vpop.f32.mrf.mxu0 }
 0x196   : > { %v9294_v60 = vadd.f32 %v6359_v32, %v2052_v45  ;;  %v2050_v44 = vadd.f32 %v1973_v54, %v9192_v48 }
 0x197   : > { %v6314_v3 = vpop.f32.mrf.mxu1  ;;  %v6363_v28 = vpop.f32.mrf.mxu0 }
 0x198   : > { %v9297_v61 = vadd.f32 %v2687_v33, %v2050_v44  ;;  %v2055_v20 = vadd.f32 %v6314_v3, %v9195_v52 }
 0x199   : > { %v1986_v25 = vpop.f32.mrf.mxu1  ;;  %v2703_v5 = vpop.f32.mrf.mxu0 }
 0x19a   : > { %v9300_v21 = vadd.f32 %v6362_v12, %v2055_v20  ;;  %v2053_v16 = vadd.f32 %v1986_v25, %v9198_v26 }
 0x19b   : > { %v6315_v58 = vpop.f32.mrf.mxu1  ;;  %v6366_v53 = vpop.f32.mrf.mxu0 }
 0x19c   : > { %v9303_v24 = vadd.f32 %v2700_v62, %v2053_v16  ;;  %v2056_v2 = vadd.f32 %v6315_v58, %v9205_v14 }
 0x19d   : > { %v1989_v63 = vpop.f32.mrf.mxu1  ;;  %v2716_v48 = vpop.f32.mrf.mxu0 }
 0x19e   : > { %v9306_v15 = vadd.f32 %v6363_v28, %v2056_v2  ;;  %v2054_v4 = vadd.f32 %v1989_v63, %v9208_v37 }
 0x19f   : > { %v6318_v7 = vpop.f32.mrf.mxu1  ;;  %v6367_v52 = vpop.f32.mrf.mxu0 }
 0x1a0   : > { %v9309_v13 = vadd.f32 %v2703_v5, %v2054_v4  ;;  %v2059_v35 = vadd.f32 %v6318_v7, %v9216_v22 }
 0x1a1   : > { %v2002_v17 = vpop.f32.mrf.mxu1  ;;  %v2719_v26 = vpop.f32.mrf.mxu0 }
 0x1a2   : > { %v9312_v29 = vadd.f32 %v6366_v53, %v2059_v35  ;;  %v2057_v8 = vadd.f32 %v2002_v17, %v9219_v11 }
 0x1a3   : > { %v6319_v32 = vpop.f32.mrf.mxu1  ;;  %v6370_v14 = vpop.f32.mrf.mxu0 }
 0x1a4   : > { %v9315_v9 = vadd.f32 %v2716_v48, %v2057_v8  ;;  %v2060_v39 = vadd.f32 %v6319_v32, %v9222_v51 }
 0x1a5   : > { %v2005_v33 = vpop.f32.mrf.mxu1  ;;  %v2732_v37 = vpop.f32.mrf.mxu0 }
 0x1a6   : > { %v9318_v41 = vadd.f32 %v6367_v52, %v2060_v39  ;;  %v2058_v27 = vadd.f32 %v2005_v33, %v9225_v49 }
 0x1a7   : > { %v6322_v12 = vpop.f32.mrf.mxu1  ;;  %v6371_v22 = vpop.f32.mrf.mxu0 }
 0x1a8   : > { %9801 = vst [vmem:[#allocation11_spill] sm:$0xff] %v9318_v41  ;;  %v9321_v45 = vadd.f32 %v2719_v26, %v2058_v27  ;;  %v2063_v54 = vadd.f32 %v6322_v12, %v9228_v10 }
 0x1a9   : > { %v2018_v62 = vpop.f32.mrf.mxu1  ;;  %v2735_v11 = vpop.f32.mrf.mxu0 }
 0x1aa   : > { %9802 = vst [vmem:[#allocation24_spill] sm:$0xff] %v9321_v45  ;;  %v9324_v44 = vadd.f32 %v6370_v14, %v2063_v54  ;;  %v2061_v3 = vadd.f32 %v2018_v62, %v9231_v50 }
 0x1ab   : > { %v6323_v28 = vpop.f32.mrf.mxu1  ;;  %v6438_v51 = vpop.f32.mrf.mxu0 }
 0x1ac   : > { %v9327_v20 = vadd.f32 %v2732_v37, %v2061_v3  ;;  %v2064_v25 = vadd.f32 %v6323_v28, %v9234_v42 }
 0x1ad   : > { %v2021_v5 = vpop.f32.mrf.mxu1  ;;  %v3484_v49 = vpop.f32.mrf.mxu0 }
 0x1ae   : > { %v9330_v16 = vadd.f32 %v6371_v22, %v2064_v25  ;;  %v2062_v58 = vadd.f32 %v2021_v5, %v9237_v56 }
 0x1af   : > { %v6390_v53 = vpop.f32.mrf.mxu1  ;;  %v9333_v10 = vpop.f32.mrf.mxu0 }
 0x1b0   : > { %9803 = vst [vmem:[#allocation13_spill] sm:$0xff] %v9330_v16  ;;  %v9335_v2 = vadd.f32 %v2735_v11, %v2062_v58  ;;  %v3223_v63 = vadd.f32 %v6390_v53, %v9240_v38 }
 0x1b1   : > { %v3094_v50 = vpop.f32.mrf.mxu1  ;;  %v9338_v48 = vpop.f32.mrf.mxu0 }
 0x1b2   : > { %9804 = vst [vmem:[#allocation15_spill] sm:$0xff] %v9335_v2  ;;  %v9340_v4 = vadd.f32 %v6438_v51, %v3223_v63  ;;  %v3221_v42 = vadd.f32 %v3094_v50, %v9243_v46 }
 0x1b3   : > { %v9343_v7 = vpop.f32.mrf.mxu1  ;;  %v6442_v52 = vpop.f32.mrf.mxu0 }
 0x1b4   : > { %v9345_v35 = vadd.f32 %v3484_v49, %v3221_v42 }
 0x1b5   : > { %v9347_v56 = vpop.f32.mrf.mxu1  ;;  %v3500_v17 = vpop.f32.mrf.mxu0 }
 0x1b7   : > { %v6394_v26 = vpop.f32.mrf.mxu1  ;;  %v9349_v8 = vpop.f32.mrf.mxu0 }
 0x1b8   : > { %v3227_v38 = vadd.f32 %v6394_v26, %v9252_v19 }
 0x1b9   : > { %v3110_v32 = vpop.f32.mrf.mxu1  ;;  %v9352_v14 = vpop.f32.mrf.mxu0 }
 0x1ba   : > { %v9354_v39 = vadd.f32 %v6442_v52, %v3227_v38  ;;  %v3225_v46 = vadd.f32 %v3110_v32, %v9255_v40 }
 0x1bb   : > { %v9357_v33 = vpop.f32.mrf.mxu1  ;;  %v6446_v37 = vpop.f32.mrf.mxu0 }
 0x1bc   : > { %v9359_v27 = vadd.f32 %v3500_v17, %v3225_v46 }
 0x1bd   : > { %v9361_v12 = vpop.f32.mrf.mxu1  ;;  %v3516_v22 = vpop.f32.mrf.mxu0 }
 0x1bf   : > { %v6398_v54 = vpop.f32.mrf.mxu1  ;;  %v9363_v62 = vpop.f32.mrf.mxu0 }
 0x1c0   : > { %v3231_v19 = vadd.f32 %v6398_v54, %v9264_v6 }
 0x1c1   : > { %v3126_v11 = vpop.f32.mrf.mxu1  ;;  %v9366_v3 = vpop.f32.mrf.mxu0 }
 0x1c2   : > { %v9368_v28 = vadd.f32 %v6446_v37, %v3231_v19  ;;  %v3229_v40 = vadd.f32 %v3126_v11, %v9267_v0 }
 0x1c3   : > { %v9371_v51 = vpop.f32.mrf.mxu1  ;;  %v6450_v25 = vpop.f32.mrf.mxu0 }
 0x1c4   : > { %v9373_v5 = vadd.f32 %v3516_v22, %v3229_v40 }
 0x1c5   : > { %v9375_v49 = vpop.f32.mrf.mxu1  ;;  %v3532_v58 = vpop.f32.mrf.mxu0 }
 0x1c7   : > { %v6402_v53 = vpop.f32.mrf.mxu1  ;;  %v9377_v63 = vpop.f32.mrf.mxu0 }
 0x1c8   : > { %v3235_v6 = vadd.f32 %v6402_v53, %v9276_v43 }
 0x1c9   : > { %v3142_v50 = vpop.f32.mrf.mxu1  ;;  %v9380_v42 = vpop.f32.mrf.mxu0 }
 0x1ca   : > { %v9382_v52 = vadd.f32 %v6450_v25, %v3235_v6  ;;  %v3233_v0 = vadd.f32 %v3142_v50, %v9279_v59 }
 0x1cb   : > { %v9385_v17 = vpop.f32.mrf.mxu1  ;;  %v6454_v26 = vpop.f32.mrf.mxu0 }
 0x1cc   : > { %v9387_v38 = vadd.f32 %v3532_v58, %v3233_v0 }
 0x1cd   : > { %v9389_v32 = vpop.f32.mrf.mxu1  ;;  %v3548_v46 = vpop.f32.mrf.mxu0 }
 0x1cf   : > { %v6406_v37 = vpop.f32.mrf.mxu1  ;;  %v9391_v22 = vpop.f32.mrf.mxu0 }
 0x1d0   : > { %v3239_v43 = vadd.f32 %v6406_v37, %v9288_v34 }
 0x1d1   : > { %v3158_v54 = vpop.f32.mrf.mxu1  ;;  %v9394_v19 = vpop.f32.mrf.mxu0 }
 0x1d2   : > { %v9396_v11 = vadd.f32 %v6454_v26, %v3239_v43  ;;  %v3237_v59 = vadd.f32 %v3158_v54, %v9291_v31 }
 0x1d3   : > { %v9399_v40 = vpop.f32.mrf.mxu1  ;;  %v6458_v25 = vpop.f32.mrf.mxu0 }
 0x1d4   : > { %v9401_v58 = vadd.f32 %v3548_v46, %v3237_v59 }
 0x1d5   : > { %v9403_v53 = vpop.f32.mrf.mxu1  ;;  %v3564_v6 = vpop.f32.mrf.mxu0 }
 0x1d7   : > { %v6410_v50 = vpop.f32.mrf.mxu1  ;;  %v9405_v0 = vpop.f32.mrf.mxu0 }
 0x1d8   : > { %9805 = vst [vmem:[#allocation17_spill] sm:$0xff] %v9405_v0  ;;  %v3243_v34 = vadd.f32 %v6410_v50, %v9300_v21 }
 0x1d9   : > { %v3174_v37 = vpop.f32.mrf.mxu1  ;;  %v9408_v2 = vpop.f32.mrf.mxu0 }
 0x1da   : > { %9806 = vst [vmem:[#allocation19_spill] sm:$0xff] %v9408_v2  ;;  %v9410_v26 = vadd.f32 %v6458_v25, %v3243_v34  ;;  %v3241_v31 = vadd.f32 %v3174_v37, %v9303_v24 }
 0x1db   : > { %v9413_v43 = vpop.f32.mrf.mxu1  ;;  %v6462_v54 = vpop.f32.mrf.mxu0 }
 0x1dc   : > { %v9415_v46 = vadd.f32 %v3564_v6, %v3241_v31 }
 0x1dd   : > { %v9417_v59 = vpop.f32.mrf.mxu1  ;;  %v3580_v16 = vpop.f32.mrf.mxu0 }
 0x1de   : > { %9807 = vst [vmem:[#allocation21_spill] sm:$0xff] %v9415_v46  ;;  %9808 = vst [vmem:[#allocation26_spill] sm:$0xff] %v9417_v59 }
 0x1df   : > { %v6414_v45 = vpop.f32.mrf.mxu1  ;;  %v9419_v41 = vpop.f32.mrf.mxu0 }
 0x1e0   : > { %9809 = vst [vmem:[#allocation28_spill] sm:$0xff] %v9419_v41  ;;  %v3247_v21 = vadd.f32 %v6414_v45, %v9312_v29 }
 0x1e1   : > { %v3190_v50 = vpop.f32.mrf.mxu1  ;;  %v9422_v0 = vpop.f32.mrf.mxu0 }
 0x1e2   : > { %9810 = vst [vmem:[#allocation5_spill] sm:$0xff] %v9422_v0  ;;  %v9424_v25 = vadd.f32 %v6462_v54, %v3247_v21  ;;  %v3245_v24 = vadd.f32 %v3190_v50, %v9315_v9 }
 0x1e3   : > { %v9427_v34 = vpop.f32.mrf.mxu1  ;;  %v6466_v37 = vpop.f32.mrf.mxu0 }
 0x1e4   : > { %v9429_v6 = vadd.f32 %v3580_v16, %v3245_v24 }
 0x1e5   : > { %v9431_v31 = vpop.f32.mrf.mxu1  ;;  %v3596_v2 = vpop.f32.mrf.mxu0 }
 0x1e6   : > { %9811 = vst [vmem:[#allocation6_spill] sm:$0xff] %v9429_v6 }
 0x1e7   : > { %v6418_v46 = vpop.f32.mrf.mxu1  ;;  %v9433_v59 = vpop.f32.mrf.mxu0 }
 0x1e8   : > { %9812 = vst [vmem:[#allocation8_spill] sm:$0xff] %v9433_v59  ;;  %v3251_v29 = vadd.f32 %v6418_v46, %v9324_v44  ;;  %v3224_v59 = vadd.f32 %v9343_v7, %v9246_v30  ;;  %v3222_v46 = vadd.f32 %v9347_v56, %v9249_v36 }
 0x1e9   : > { %v3206_v45 = vpop.f32.mrf.mxu1  ;;  %v9436_v41 = vpop.f32.mrf.mxu0 }
 0x1ea   : > { %9813 = vst [vmem:[#allocation10_spill] sm:$0xff] %v9436_v41  ;;  %v9438_v54 = vadd.f32 %v6466_v37, %v3251_v29  ;;  %v3249_v9 = vadd.f32 %v3206_v45, %v9327_v20  ;;  %v9455_v20 = vld [vmem:[%s9671_s2] ss:$0 sm:$0xff]  ;;  %v3614_v45 = vadd.f32 %v9333_v10, %v3224_v59  ;;  %v3228_v10 = vadd.f32 %v9357_v33, %v9258_v57 }
 0x1eb   : > { %v9441_v21 = vpop.f32.mrf.mxu1  ;;  %v6534_v50 = vpop.f32.mrf.mxu0 }
 0x1ec   : > { %9814 = vst [vmem:[#allocation12_spill] sm:$0xff] %v9438_v54  ;;  %v9443_v16 = vadd.f32 %v3596_v2, %v3249_v9 }
 0x1ed   : > { %v9445_v24 = vpop.f32.mrf.mxu1  ;;  %v4672_v0 = vpop.f32.mrf.mxu0 }
 0x1ee   : > { %9815 = vst [vmem:[#allocation14_spill] sm:$0xff] %v9443_v16  ;;  %9816 = vst [vmem:[#allocation16_spill] sm:$0xff] %v9445_v24  ;;  %v3612_v16 = vadd.f32 %v9338_v48, %v3222_v46 }
 0x1ef   : > { %v6486_v6 = vpop.f32.mrf.mxu1  ;;  %v6535_v44 = vpop.f32.mrf.mxu0 }
 0x1f0   : > { %v4327_v37 = vadd.f32 %v6486_v6, %v9340_v4  ;;  %v9464_v4 = vld [vmem:[%s9672_s3] ss:$0 sm:$0xff] }
 0x1f1   : > { %v4198_v2 = vpop.f32.mrf.mxu1  ;;  %v4675_v29 = vpop.f32.mrf.mxu0 }
 0x1f2   : > { %v4801_v9 = vadd.f32 %v6534_v50, %v4327_v37  ;;  %v4325_v30 = vadd.f32 %v4198_v2, %v9345_v35 }
 0x1f3   : > { %v6487_v7 = vpop.f32.mrf.mxu1  ;;  %v6538_v41 = vpop.f32.mrf.mxu0 }
 0x1f4   : > { %v4840_v36 = vmul.f32 %v9455_v20, %v4801_v9  ;;  %v4799_v56 = vadd.f32 %v4672_v0, %v4325_v30  ;;  %v4328_v6 = vadd.f32 %v6487_v7, %v3614_v45  ;;  %v3226_v0 = vadd.f32 %v9361_v12, %v9261_v23 }
 0x1f5   : > { %v4201_v24 = vpop.f32.mrf.mxu1  ;;  %v4688_v54 = vpop.f32.mrf.mxu0 }
 0x1f6   : > { %v4838_v35 = vmul.f32 %v9455_v20, %v4799_v56  ;;  %v4802_v59 = vadd.f32 %v6535_v44, %v4328_v6  ;;  %v4326_v50 = vadd.f32 %v4201_v24, %v3612_v16  ;;  %v4879_v48 = vadd.f32 %v9464_v4, %v4840_v36 }
 0x1f7   : > { %v6490_v46 = vpop.f32.mrf.mxu1  ;;  %v6539_v37 = vpop.f32.mrf.mxu0  ;;  %v3618_v44 = vadd.f32 %v9349_v8, %v3228_v10  ;;  %v3232_v8 = vadd.f32 %v9371_v51, %v9270_v18 }
 0x1f8   : > { %v4841_v2 = vmul.f32 %v9455_v20, %v4802_v59  ;;  %v4800_v9 = vadd.f32 %v4675_v29, %v4326_v50  ;;  %v4877_v45 = vadd.f32 %v9464_v4, %v4838_v35  ;;  %v4331_v57 = vadd.f32 %v6490_v46, %v9354_v39 }
 0x1f9   : > { %v4214_v33 = vpop.f32.mrf.mxu1  ;;  %v4691_v30 = vpop.f32.mrf.mxu0  ;;  %v4911_v29 = vmax.f32 %v4879_v48, 0.0  ;;  %v3616_v59 = vadd.f32 %v9352_v14, %v3226_v0  ;;  %v3622_v0 = vadd.f32 %v9363_v62, %v3232_v8 }
 0x1fa   : > { %v4880_v16 = vadd.f32 %v9464_v4, %v4841_v2  ;;  %v4839_v24 = vmul.f32 %v9455_v20, %v4800_v9  ;;  %v4329_v7 = vadd.f32 %v4214_v33, %v9359_v27  ;;  %v4805_v36 = vadd.f32 %v6538_v41, %v4331_v57 }
 0x1fb   : > { %v6491_v56 = vpop.f32.mrf.mxu1  ;;  %v6542_v23 = vpop.f32.mrf.mxu0  ;;  %v4909_v10 = vmax.f32 %v4877_v45, 0.0 }
 0x1fc   : > { %v4912_v12 = vmax.f32 %v4880_v16, 0.0  ;;  %v4878_v6 = vadd.f32 %v9464_v4, %v4839_v24  ;;  %v4803_v39 = vadd.f32 %v4688_v54, %v4329_v7  ;;  %v4332_v35 = vadd.f32 %v6491_v56, %v3618_v44 }
 0x1fd   : > { %v4844_v50 = vmul.f32 %v9455_v20, %v4805_v36  ;;  %v4217_v46 = vpop.f32.mrf.mxu1  ;;  %v4704_v2 = vpop.f32.mrf.mxu0 }
 0x1fe   : > { %v5829_v27 = vpack.c.bf16 %v4912_v12, %v4911_v29  ;;  %v4910_v48 = vmax.f32 %v4878_v6, 0.0  ;;  %v4842_v41 = vmul.f32 %v9455_v20, %v4803_v39  ;;  %v4806_v9 = vadd.f32 %v6539_v37, %v4332_v35 }
 0x1ff   : > { %v4883_v57 = vadd.f32 %v9464_v4, %v4844_v50  ;;  %v4330_v33 = vadd.f32 %v4217_v46, %v3616_v59  ;;  %v6494_v54 = vpop.f32.mrf.mxu1  ;;  %v6543_v44 = vpop.f32.mrf.mxu0  ;;  %v3230_v37 = vadd.f32 %v9375_v49, %v9273_v47 }
 0x200   : > { %5901 = vst [vmem:[%s9489_s5 + $0x8] sm:$0xff] %v5829_v27   ;;  %v5824_v18 = vpack.c.bf16 %v4910_v48, %v4909_v10  ;;  %v4845_v14 = vmul.f32 %v9455_v20, %v4806_v9  ;;  %v4335_v51 = vadd.f32 %v6494_v54, %v9368_v28  ;;  %v4881_v7 = vadd.f32 %v9464_v4, %v4842_v41 }
 0x201   : > { %v4804_v45 = vadd.f32 %v4691_v30, %v4330_v33  ;;  %v4230_v16 = vpop.f32.mrf.mxu1  ;;  %v4707_v24 = vpop.f32.mrf.mxu0  ;;  %v4915_v12 = vmax.f32 %v4883_v57, 0.0  ;;  %v3620_v30 = vadd.f32 %v9366_v3, %v3230_v37 }
 0x202   : > { %5825 = vst [vmem:[%s9489_s5] sm:$0xff] %v5824_v18   ;;  %v4884_v29 = vadd.f32 %v9464_v4, %v4845_v14  ;;  %v4809_v36 = vadd.f32 %v6542_v23, %v4335_v51  ;;  %v4333_v56 = vadd.f32 %v4230_v16, %v9373_v5  ;;  %v3236_v5 = vadd.f32 %v9385_v17, %v9282_v1 }
 0x203   : > { %v4843_v6 = vmul.f32 %v9455_v20, %v4804_v45  ;;  %v6495_v28 = vpop.f32.mrf.mxu1  ;;  %v6546_v39 = vpop.f32.mrf.mxu0  ;;  %v4913_v23 = vmax.f32 %v4881_v7, 0.0  ;;  %v3234_v1 = vadd.f32 %v9389_v32, %v9285_v55 }
 0x204   : > { %v4916_v62 = vmax.f32 %v4884_v29, 0.0  ;;  %v4848_v35 = vmul.f32 %v9455_v20, %v4809_v36  ;;  %v4807_v47 = vadd.f32 %v4704_v2, %v4333_v56  ;;  %v4336_v49 = vadd.f32 %v6495_v28, %v3622_v0 }
 0x205   : > { %v4882_v59 = vadd.f32 %v9464_v4, %v4843_v6  ;;  %v4233_v8 = vpop.f32.mrf.mxu1  ;;  %v4720_v10 = vpop.f32.mrf.mxu0  ;;  %v3626_v14 = vadd.f32 %v9377_v63, %v3236_v5  ;;  %v3624_v63 = vadd.f32 %v9380_v42, %v3234_v1  ;;  %v3240_v56 = vadd.f32 %v9399_v40, %v9294_v60 }
 0x206   : > { %v5839_v50 = vpack.c.bf16 %v4916_v62, %v4915_v12  ;;  %v4810_v46 = vadd.f32 %v6543_v44, %v4336_v49  ;;  %v4887_v48 = vadd.f32 %v9464_v4, %v4848_v35  ;;  %v4846_v41 = vmul.f32 %v9455_v20, %v4807_v47 }
 0x207   : > { %v4914_v27 = vmax.f32 %v4882_v59, 0.0  ;;  %v4334_v2 = vadd.f32 %v4233_v8, %v3620_v30  ;;  %v6498_v9 = vpop.f32.mrf.mxu1  ;;  %v6547_v57 = vpop.f32.mrf.mxu0  ;;  %v3630_v40 = vadd.f32 %v9391_v22, %v3240_v56 }
 0x208   : > { %5903 = vst [vmem:[%s9489_s5 + $0x18] sm:$0xff] %v5839_v50   ;;  %v4849_v3 = vmul.f32 %v9455_v20, %v4810_v46  ;;  %v4339_v33 = vadd.f32 %v6498_v9, %v9382_v52  ;;  %v4919_v45 = vmax.f32 %v4887_v48, 0.0  ;;  %v4885_v16 = vadd.f32 %v9464_v4, %v4846_v41 }
 0x209   : > { %v5834_v17 = vpack.c.bf16 %v4914_v27, %v4913_v23  ;;  %v4808_v54 = vadd.f32 %v4707_v24, %v4334_v2  ;;  %v4246_v44 = vpop.f32.mrf.mxu1  ;;  %v4723_v18 = vpop.f32.mrf.mxu0 }
 0x20a   : > { %v4888_v51 = vadd.f32 %v9464_v4, %v4849_v3  ;;  %v4813_v0 = vadd.f32 %v6546_v39, %v4339_v33  ;;  %v4337_v37 = vadd.f32 %v4246_v44, %v9387_v38  ;;  %v4917_v35 = vmax.f32 %v4885_v16, 0.0 }
 0x20b   : > { %5902 = vst [vmem:[%s9489_s5 + $0x10] sm:$0xff] %v5834_v17   ;;  %v4847_v52 = vmul.f32 %v9455_v20, %v4808_v54  ;;  %v6499_v7 = vpop.f32.mrf.mxu1  ;;  %v6550_v29 = vpop.f32.mrf.mxu0 }
 0x20c   : > { %v4920_v55 = vmax.f32 %v4888_v51, 0.0  ;;  %v4852_v32 = vmul.f32 %v9455_v20, %v4813_v0  ;;  %v4811_v24 = vadd.f32 %v4720_v10, %v4337_v37  ;;  %v4340_v36 = vadd.f32 %v6499_v7, %v3626_v14 }
 0x20d   : > { %v4886_v38 = vadd.f32 %v9464_v4, %v4847_v52  ;;  %v4249_v12 = vpop.f32.mrf.mxu1  ;;  %v4736_v6 = vpop.f32.mrf.mxu0  ;;  %v3238_v10 = vadd.f32 %v9403_v53, %v9297_v61 }
 0x20e   : > { %v5849_v28 = vpack.c.bf16 %v4920_v55, %v4919_v45  ;;  %v4850_v39 = vmul.f32 %v9455_v20, %v4811_v24  ;;  %v4814_v62 = vadd.f32 %v6547_v57, %v4340_v36  ;;  %v4891_v49 = vadd.f32 %v9464_v4, %v4852_v32  ;;  %v9817_v55 = vld [vmem:[#allocation26_spill] sm:$0xff] }
 0x20f   : > { %v4918_v47 = vmax.f32 %v4886_v38, 0.0  ;;  %v4338_v30 = vadd.f32 %v4249_v12, %v3624_v63  ;;  %v6502_v59 = vpop.f32.mrf.mxu1  ;;  %v6551_v8 = vpop.f32.mrf.mxu0  ;;  %v3628_v1 = vadd.f32 %v9394_v19, %v3238_v10  ;;  %v9818_v63 = vld [vmem:[#allocation17_spill] sm:$0xff] }
 0x210   : > { %5905 = vst [vmem:[%s9489_s5 + $0x28] sm:$0xff] %v5849_v28   ;;  %v4853_v42 = vmul.f32 %v9455_v20, %v4814_v62  ;;  %v4343_v60 = vadd.f32 %v6502_v59, %v9396_v11  ;;  %v4889_v27 = vadd.f32 %v9464_v4, %v4850_v39  ;;  %v4923_v9 = vmax.f32 %v4891_v49, 0.0 }
 0x211   : > { %v5844_v5 = vpack.c.bf16 %v4918_v47, %v4917_v35  ;;  %v4812_v23 = vadd.f32 %v4723_v18, %v4338_v30  ;;  %v4262_v50 = vpop.f32.mrf.mxu1  ;;  %v4739_v46 = vpop.f32.mrf.mxu0 }
 0x212   : > { %v4892_v48 = vadd.f32 %v9464_v4, %v4853_v42  ;;  %v4817_v41 = vadd.f32 %v6550_v29, %v4343_v60  ;;  %v4341_v2 = vadd.f32 %v4262_v50, %v9401_v58  ;;  %v3244_v58 = vadd.f32 %v9413_v43, %v9306_v15  ;;  %v9821_v60 = vld [vmem:[#allocation11_spill] sm:$0xff] }
 0x213   : > { %5904 = vst [vmem:[%s9489_s5 + $0x20] sm:$0xff] %v5844_v5   ;;  %v4851_v11 = vmul.f32 %v9455_v20, %v4812_v23  ;;  %v6503_v57 = vpop.f32.mrf.mxu1  ;;  %v6554_v22 = vpop.f32.mrf.mxu0  ;;  %v4921_v18 = vmax.f32 %v4889_v27, 0.0  ;;  %v3242_v15 = vadd.f32 %v9817_v55, %v9309_v13 }
 0x214   : > { %v4924_v3 = vmax.f32 %v4892_v48, 0.0  ;;  %v4856_v61 = vmul.f32 %v9455_v20, %v4817_v41  ;;  %v4815_v53 = vadd.f32 %v4736_v6, %v4341_v2  ;;  %v4344_v33 = vadd.f32 %v6503_v57, %v3630_v40  ;;  %v9819_v6 = vld [vmem:[#allocation21_spill] sm:$0xff] }
 0x215   : > { %v4890_v17 = vadd.f32 %v9464_v4, %v4851_v11  ;;  %v4265_v54 = vpop.f32.mrf.mxu1  ;;  %v4752_v44 = vpop.f32.mrf.mxu0  ;;  %v3634_v56 = vadd.f32 %v9818_v63, %v3244_v58  ;;  %v3248_v40 = vadd.f32 %v9427_v34, %v9821_v60 }
 0x216   : > { %v5859_v14 = vpack.c.bf16 %v4924_v3, %v4923_v9  ;;  %v4818_v51 = vadd.f32 %v6551_v8, %v4344_v33  ;;  %v4895_v37 = vadd.f32 %v9464_v4, %v4856_v61  ;;  %v4854_v45 = vmul.f32 %v9455_v20, %v4815_v53  ;;  %v9820_v8 = vld [vmem:[#allocation19_spill] sm:$0xff]  ;;  %v9822_v3 = vld [vmem:[#allocation28_spill] sm:$0xff] }
 0x217   : > { %v4922_v0 = vmax.f32 %v4890_v17, 0.0  ;;  %v4342_v16 = vadd.f32 %v4265_v54, %v3628_v1  ;;  %v6506_v52 = vpop.f32.mrf.mxu1  ;;  %v6555_v7 = vpop.f32.mrf.mxu0  ;;  %v3632_v42 = vadd.f32 %v9820_v8, %v3242_v15  ;;  %v3638_v61 = vadd.f32 %v9822_v3, %v3248_v40  ;;  %v9823_v53 = vld [vmem:[#allocation24_spill] sm:$0xff] }
 0x218   : > { %5907 = vst [vmem:[%s9489_s5 + $0x38] sm:$0xff] %v5859_v14   ;;  %v4857_v19 = vmul.f32 %v9455_v20, %v4818_v51  ;;  %v4347_v29 = vadd.f32 %v6506_v52, %v9410_v26  ;;  %v4927_v39 = vmax.f32 %v4895_v37, 0.0  ;;  %v4893_v62 = vadd.f32 %v9464_v4, %v4854_v45  ;;  %v9824_v51 = vld [vmem:[#allocation6_spill] sm:$0xff] }
 0x219   : > { %v5854_v43 = vpack.c.bf16 %v4922_v0, %v4921_v18  ;;  %v4816_v32 = vadd.f32 %v4739_v46, %v4342_v16  ;;  %v4278_v24 = vpop.f32.mrf.mxu1  ;;  %v4755_v36 = vpop.f32.mrf.mxu0  ;;  %v3246_v33 = vadd.f32 %v9431_v31, %v9823_v53 }
 0x21a   : > { %v4896_v38 = vadd.f32 %v9464_v4, %v4857_v19  ;;  %v4821_v12 = vadd.f32 %v6554_v22, %v4347_v29  ;;  %v4345_v28 = vadd.f32 %v4278_v24, %v9819_v6  ;;  %v4925_v48 = vmax.f32 %v4893_v62, 0.0  ;;  %v9825_v29 = vld [vmem:[#allocation5_spill] sm:$0xff] }
 0x21b   : > { %5906 = vst [vmem:[%s9489_s5 + $0x30] sm:$0xff] %v5854_v43   ;;  %v4855_v26 = vmul.f32 %v9455_v20, %v4816_v32  ;;  %v6507_v35 = vpop.f32.mrf.mxu1  ;;  %v6558_v47 = vpop.f32.mrf.mxu0  ;;  %v3636_v55 = vadd.f32 %v9825_v29, %v3246_v33  ;;  %v9826_v32 = vld [vmem:[#allocation13_spill] sm:$0xff] }
 0x21c   : > { %v4928_v13 = vmax.f32 %v4896_v38, 0.0  ;;  %v4860_v49 = vmul.f32 %v9455_v20, %v4821_v12  ;;  %v4819_v30 = vadd.f32 %v4752_v44, %v4345_v28  ;;  %v4348_v59 = vadd.f32 %v6507_v35, %v3634_v56 }
 0x21d   : > { %v4894_v10 = vadd.f32 %v9464_v4, %v4855_v26  ;;  %v4281_v5 = vpop.f32.mrf.mxu1  ;;  %v4768_v23 = vpop.f32.mrf.mxu0  ;;  %v3252_v24 = vadd.f32 %v9441_v21, %v9826_v32  ;;  %v9827_v26 = vld [vmem:[#allocation12_spill] sm:$0xff] }
 0x21e   : > { %v5869_v50 = vpack.c.bf16 %v4928_v13, %v4927_v39  ;;  %v4858_v46 = vmul.f32 %v9455_v20, %v4819_v30  ;;  %v4822_v27 = vadd.f32 %v6555_v7, %v4348_v59  ;;  %v4899_v2 = vadd.f32 %v9464_v4, %v4860_v49  ;;  %v9828_v13 = vld [vmem:[#allocation15_spill] sm:$0xff]  ;;  %v9829_v49 = vld [vmem:[#allocation16_spill] sm:$0xff] }
 0x21f   : > { %v4926_v41 = vmax.f32 %v4894_v10, 0.0  ;;  %v4346_v9 = vadd.f32 %v4281_v5, %v3632_v42  ;;  %v6510_v11 = vpop.f32.mrf.mxu1  ;;  %v6559_v57 = vpop.f32.mrf.mxu0  ;;  %v3250_v21 = vadd.f32 %v9829_v49, %v9828_v13  ;;  %v9830_v42 = vld [vmem:[#allocation8_spill] sm:$0xff]  ;;  %v9831_v5 = vld [vmem:[#allocation14_spill] sm:$0xff] }
 0x220   : > { %5909 = vst [vmem:[%s9489_s5 + $0x48] sm:$0xff] %v5869_v50   ;;  %v4861_v22 = vmul.f32 %v9455_v20, %v4822_v27  ;;  %v4351_v34 = vadd.f32 %v6510_v11, %v9424_v25  ;;  %v4897_v58 = vadd.f32 %v9464_v4, %v4858_v46  ;;  %v4931_v37 = vmax.f32 %v4899_v2, 0.0 }
 0x221   : > { %v5864_v1 = vpack.c.bf16 %v4926_v41, %v4925_v48  ;;  %v4820_v17 = vadd.f32 %v4755_v36, %v4346_v9  ;;  %v4294_v54 = vpop.f32.mrf.mxu1  ;;  %v4771_v44 = vpop.f32.mrf.mxu0  ;;  %v3642_v60 = vadd.f32 %v9830_v42, %v3252_v24 }
 0x222   : > { %v4900_v18 = vadd.f32 %v9464_v4, %v4861_v22  ;;  %v4825_v14 = vadd.f32 %v6558_v47, %v4351_v34  ;;  %v4349_v0 = vadd.f32 %v4294_v54, %v9824_v51  ;;  %v4929_v36 = vmax.f32 %v4897_v58, 0.0  ;;  %v9832_v22 = vld [vmem:[#allocation10_spill] sm:$0xff] }
 0x223   : > { %5908 = vst [vmem:[%s9489_s5 + $0x40] sm:$0xff] %v5864_v1   ;;  %v4859_v25 = vmul.f32 %v9455_v20, %v4820_v17  ;;  %v6511_v45 = vpop.f32.mrf.mxu1  ;;  %v6562_v19 = vpop.f32.mrf.mxu0  ;;  %v3640_v34 = vadd.f32 %v9832_v22, %v3250_v21 }
 0x224   : > { %v4932_v16 = vmax.f32 %v4900_v18, 0.0  ;;  %v4864_v52 = vmul.f32 %v9455_v20, %v4825_v14  ;;  %v4823_v31 = vadd.f32 %v4768_v23, %v4349_v0  ;;  %v4352_v7 = vadd.f32 %v6511_v45, %v3638_v61 }
 0x225   : > { %v4898_v15 = vadd.f32 %v9464_v4, %v4859_v25  ;;  %v4297_v43 = vpop.f32.mrf.mxu1  ;;  %v4784_v47 = vpop.f32.mrf.mxu0 }
 0x226   : > { %v5879_v63 = vpack.c.bf16 %v4932_v16, %v4931_v37  ;;  %v4826_v56 = vadd.f32 %v6559_v57, %v4352_v7  ;;  %v4903_v12 = vadd.f32 %v9464_v4, %v4864_v52  ;;  %v4862_v6 = vmul.f32 %v9455_v20, %v4823_v31 }
 0x227   : > { %v4930_v38 = vmax.f32 %v4898_v15, 0.0  ;;  %v4350_v28 = vadd.f32 %v4297_v43, %v3636_v55  ;;  %v6514_v39 = vpop.f32.mrf.mxu1  ;;  %v6563_v57 = vpop.f32.mrf.mxu0 }
 0x228   : > { %5911 = vst [vmem:[%s9489_s5 + $0x58] sm:$0xff] %v5879_v63   ;;  %v4865_v62 = vmul.f32 %v9455_v20, %v4826_v56  ;;  %v4355_v35 = vadd.f32 %v6514_v39, %v9827_v26  ;;  %v4935_v50 = vmax.f32 %v4903_v12, 0.0  ;;  %v4901_v46 = vadd.f32 %v9464_v4, %v4862_v6 }
 0x229   : > { %v5874_v30 = vpack.c.bf16 %v4930_v38, %v4929_v36  ;;  %v4824_v59 = vadd.f32 %v4771_v44, %v4350_v28  ;;  %v4310_v8 = vpop.f32.mrf.mxu1  ;;  %v4787_v14 = vpop.f32.mrf.mxu0 }
 0x22a   : > { %v4904_v40 = vadd.f32 %v9464_v4, %v4865_v62  ;;  %v4829_v10 = vadd.f32 %v6562_v19, %v4355_v35  ;;  %v4353_v23 = vadd.f32 %v4310_v8, %v9831_v5  ;;  %v4933_v1 = vmax.f32 %v4901_v46, 0.0 }
 0x22b   : > { %5910 = vst [vmem:[%s9489_s5 + $0x50] sm:$0xff] %v5874_v30   ;;  %v4863_v27 = vmul.f32 %v9455_v20, %v4824_v59  ;;  %v6515_v48 = vpop.f32.mrf.mxu1 }
 0x22c   : > { %v4936_v41 = vmax.f32 %v4904_v40, 0.0  ;;  %v4868_v2 = vmul.f32 %v9455_v20, %v4829_v10  ;;  %v4827_v9 = vadd.f32 %v4784_v47, %v4353_v23  ;;  %v4356_v11 = vadd.f32 %v6515_v48, %v3642_v60 }
 0x22d   : > { %v4902_v3 = vadd.f32 %v9464_v4, %v4863_v27  ;;  %v4313_v61 = vpop.f32.mrf.mxu1 }
 0x22e   : > { %v5889_v53 = vpack.c.bf16 %v4936_v41, %v4935_v50  ;;  %v4830_v33 = vadd.f32 %v6563_v57, %v4356_v11  ;;  %v4866_v54 = vmul.f32 %v9455_v20, %v4827_v9  ;;  %v4354_v44 = vadd.f32 %v4313_v61, %v3640_v34 }
 0x22f   : > { %v4934_v17 = vmax.f32 %v4902_v3, 0.0  ;;  %v4907_v58 = vadd.f32 %v9464_v4, %v4868_v2 }
 0x230   : > { %5913 = vst [vmem:[%s9489_s5 + $0x68] sm:$0xff] %v5889_v53   ;;  %v4869_v18 = vmul.f32 %v9455_v20, %v4830_v33  ;;  %v4828_v0 = vadd.f32 %v4787_v14, %v4354_v44  ;;  %v4905_v25 = vadd.f32 %v9464_v4, %v4866_v54 }
 0x231   : > { %v5884_v51 = vpack.c.bf16 %v4934_v17, %v4933_v1  ;;  %v4939_v16 = vmax.f32 %v4907_v58, 0.0 }
 0x232   : > { %v4908_v37 = vadd.f32 %v9464_v4, %v4869_v18  ;;  %v4867_v45 = vmul.f32 %v9455_v20, %v4828_v0  ;;  %v4937_v19 = vmax.f32 %v4905_v25, 0.0 }
 0x233   : > { %5912 = vst [vmem:[%s9489_s5 + $0x60] sm:$0xff] %v5884_v51  }
 0x234   : > { %v4940_v52 = vmax.f32 %v4908_v37, 0.0  ;;  %v4906_v31 = vadd.f32 %v9464_v4, %v4867_v45 }
 0x236   : > { %v5899_v7 = vpack.c.bf16 %v4940_v52, %v4939_v16  ;;  %v4938_v29 = vmax.f32 %v4906_v31, 0.0 }
 0x238   : > { %5915 = vst [vmem:[%s9489_s5 + $0x78] sm:$0xff] %v5899_v7   ;;  %v5894_v20 = vpack.c.bf16 %v4938_v29, %v4937_v19 }
 0x23a   : > { %5914 = vst [vmem:[%s9489_s5 + $0x70] sm:$0xff] %v5894_v20  }
 0x23b   : > { %6794 = shalt.err (!%p6791_p6)
}
 0x23c   : > { %s6795_s27 = scalar_lea.hbm %s9611_s13, 2048  ;;  %s6799_s8 = scalar_lea.hbm %s9673_s4, 16384 }
 0x23d   : > { %p6796_p7 = scmp.ne.s32.totalorder %s9611_s13, %s6795_s27  ;;  %p6800_p11 = scmp.lt.s32.totalorder %s9611_s13, %s9673_s4 }
 0x23e   : > { %p6801_p12 = scmp.lt.s32.totalorder %s6799_s8, %s6795_s27 }
 0x23f   : > { %p6797_p9 = pnand %p6796_p7, %p6954_p3 }
 0x240   : > { %p6802_p13 = por %p6801_p12, %p6800_p11 }
 0x241   : > { %p6798_p10 = pneg %p6797_p9 }
 0x243   : > { %p6803_p0 = pnand %p6802_p13, %p6798_p10 }
 0x245   : > { %6806 = shalt.err (!%p6803_p0)
}
 0x246   : > { %s6876_s11 = smov 64   ;;  %s6877_s12 = smov 4  }
 0x247   : > { %6581 = dma.vmem_to_hbm [thread:$0]  (%p6954_p3), %s9613_s19, 2048, %s9611_s13, %s9618_s9, %s6876_s11, %s6876_s11, %s6877_s12  }
 0x248 PF: > { %p6587_p1 = scmp.ge.s32.totalorder %s6873_s22, 2  ;;  %s5133_s14 = sand.u32 1, %s6845_s15  }
 0x249   : > { %s5134_s23 = scalar_lea.sflag [#allocation3], %s5133_s14 }
 0x24a   : > { %p6584_p2 = pnand %p6587_p1, %p6963_p8 }
 0x24c   : > { %p6585_p4 = pneg %p6584_p2 }
 0x24e   : > { %6840 = dma.done.wait (%p6585_p4), %s5134_s23, 2048  }
 0x24f   : > { %6842 = vsyncadd (%p6585_p4), %s5134_s23, 4294965248  ;;  %s17_s22 = sadd.s32 1, %s6873_s22   ;;  %s9833_s15 = smov %s6849_s16 }
 0x250   : > { %p14_p5 = scmp.ge.s32.totalorder %s17_s22, 10   ;;  %s9834_s16 = smov %s6853_s17 }
 0x251   : > { %s9835_s17 = smov %s6972_s7  ;;  %s9836_s18 = smov %s6865_s20 }
 0x252   : > { %s9837_s19 = smov %s6869_s21  ;;  %s9838_s20 = smov %s9841_s25 }
 0x253   : > { %s9839_s21 = smov %s9845_s26  ;;  %16 = sbr.rel (!%p14_p5) target bundleno = 5 (0x5), region = 82 }
 0x258   :  { %5139 = vsyncpa [#allocation3], 1 }
 0x259   :  { %5141 = vsyncpa [#allocation3 + $0x1], 1 }

</bundles_post_ra>
